<compile_context>
chip_gen: v7x
topology: tpu7x:2x2x1
jax: 0.10.0
libtpu: 0.0.40
codegen_flags: <defaults>
</compile_context>

<pallas_src>
import numpy as np
import jax
import jax.numpy as jnp
from jax import lax
from jax.experimental import pallas as pl
from jax.experimental.pallas import tpu as pltpu

WS_EPS = 1e-5            # WeightStandardizedConv2d eps for float32 inputs
GN_EPS = 1e-5            # nn.GroupNorm default eps
LANE = 128               # lane width -> channel padding target
VMEM_LIMIT = 56 * 1024 * 1024   # <= v7x 64 MiB minus headroom


def _round_up(n, m):
    return ((n + m - 1) // m) * m


def _silu_kernel(x):
    # exp already occupies the EUP; route the divide there too (VPU relief).
    return x * pl.reciprocal(1.0 + jnp.exp(-x), approx=True)


def _silu_ref(x):
    return x * (1.0 / (1.0 + jnp.exp(-x)))


def _pad_vec(v, n):
    return jnp.pad(v, (0, n - v.shape[0]))


def _standardize_hwio(w):
    # per output-channel mean/var over (kh, kw, in); biased variance.
    m = jnp.mean(w, axis=(0, 1, 2), keepdims=True)
    v = jnp.mean((w - m) ** 2, axis=(0, 1, 2), keepdims=True)
    return (w - m) * lax.rsqrt(v + WS_EPS)


def _row_windows(x_bhwc, tile_h):
    # 1-px zero halo + overlapping row windows built once in the wrapper
    # (layout plumbing: the BlockSpec DMA absorbs the halo; no in-kernel
    # memset or masked halo stores).
    B, H, W, C = x_bhwc.shape
    nT = H // tile_h
    xp = jnp.pad(x_bhwc, ((0, 0), (1, 1), (1, 1), (0, 0)))
    wins = [xp[:, t * tile_h:t * tile_h + tile_h + 2] for t in range(nT)]
    return jnp.stack(wins, axis=1)            # (B, nT, tile_h+2, W+2, C)


# ---------------------------------------------------------------------------
# Pass A: WS-conv(3x3, pad=1) on one row tile + accumulate GN channel stats.
# Grid: (B "parallel", row-tile "arbitrary"); stats output is resident per b.
# ---------------------------------------------------------------------------
def _make_conv_stats_call(B, nT, TH, W, Cin_p, Cout_p):
    THW = TH * W

    def kernel(win_ref, w_ref, b_ref, y_ref, stats_ref):
        t = pl.program_id(1)
        # 3x3 conv = 9 accumulated K=Cin_p MXU matmuls off the halo window
        # (no im2col patch scratch, all operands lane-dense bf16).
        acc = jnp.zeros((THW, Cout_p), jnp.float32)
        for k in range(9):
            dh, dw = divmod(k, 3)
            tap = win_ref[pl.ds(dh, TH), pl.ds(dw, W), :].reshape(THW, Cin_p)
            acc = acc + jnp.dot(tap, w_ref[k],
                                preferred_element_type=jnp.float32)
        acc = acc + b_ref[...]
        y_ref[...] = acc.astype(y_ref.dtype)

        # per-sample channel [sum, sum_sq], accumulated across row tiles
        tile_stats = jnp.concatenate(
            [jnp.sum(acc, axis=0, keepdims=True),
             jnp.sum(acc * acc, axis=0, keepdims=True)], axis=0)

        @pl.when(t == 0)
        def _():
            stats_ref[...] = jnp.zeros_like(stats_ref)

        stats_ref[...] += tile_stats

    return pl.pallas_call(
        kernel,
        out_shape=(jax.ShapeDtypeStruct((B, nT * THW, Cout_p), jnp.bfloat16),
                   jax.ShapeDtypeStruct((B, 2, Cout_p), jnp.float32)),
        grid=(B, nT),
        in_specs=[
            pl.BlockSpec((None, None, TH + 2, W + 2, Cin_p),
                         lambda b, t: (b, t, 0, 0, 0)),
            pl.BlockSpec((9, Cin_p, Cout_p), lambda b, t: (0, 0, 0)),
            pl.BlockSpec((1, Cout_p), lambda b, t: (0, 0)),
        ],
        out_specs=(
            pl.BlockSpec((None, THW, Cout_p), lambda b, t: (b, t, 0)),
            pl.BlockSpec((None, 2, Cout_p), lambda b, t: (b, 0, 0)),
        ),
        compiler_params=pltpu.CompilerParams(
            dimension_semantics=("parallel", "arbitrary"),
            vmem_limit_bytes=VMEM_LIMIT),
    )


# ---------------------------------------------------------------------------
# Pass B (block1): GroupNorm + (scale+1)*x + shift + SiLU per row tile, with
# the time-embedding MLP (SiLU -> Linear) fused in.  Fully parallel grid.
# ---------------------------------------------------------------------------
def _make_norm1_call(B, nT, TH, W, Cout_p, Tdim):
    THW = TH * W

    def kernel(y_ref, stats_ref, gmat_ref, g_ref, be_ref, temb_ref,
               mw_ref, mb_ref, h_ref):
        # one matmul: [sum; sum_sq] @ gmat -> [group mean; group E[x^2]]
        st = jnp.dot(stats_ref[...], gmat_ref[...],
                     preferred_element_type=jnp.float32)
        mean = st[0:1, :]
        var = st[1:2, :] - mean * mean          # f32, safe at GN magnitudes
        inv = lax.rsqrt(var + GN_EPS)

        # fused time MLP: SiLU -> Linear -> (scale, shift)   (tiny per step)
        tt = _silu_kernel(temb_ref[...].astype(jnp.float32))
        t2 = jnp.dot(tt, mw_ref[...],
                     preferred_element_type=jnp.float32) + mb_ref[...]
        scale = t2[:, :Cout_p]
        shift = t2[:, Cout_p:]

        x = y_ref[...].astype(jnp.float32)
        y = (x - mean) * (inv * g_ref[...]) + be_ref[...]
        y = y * (scale + 1.0) + shift
        # TODO(synk): Dropout with p > 0 (training) would need pltpu PRNG;
        # module defaults are p = 0.0 (identity) so it is omitted.
        h_ref[...] = _silu_kernel(y).astype(h_ref.dtype)

    return pl.pallas_call(
        kernel,
        out_shape=jax.ShapeDtypeStruct((B, nT * THW, Cout_p), jnp.bfloat16),
        grid=(B, nT),
        in_specs=[
            pl.BlockSpec((None, THW, Cout_p), lambda b, t: (b, t, 0)),
            pl.BlockSpec((None, 2, Cout_p), lambda b, t: (b, 0, 0)),
            pl.BlockSpec((Cout_p, Cout_p), lambda b, t: (0, 0)),
            pl.BlockSpec((1, Cout_p), lambda b, t: (0, 0)),
            pl.BlockSpec((1, Cout_p), lambda b, t: (0, 0)),
            pl.BlockSpec((None, 1, Tdim), lambda b, t: (b, 0, 0)),
            pl.BlockSpec((Tdim, 2 * Cout_p), lambda b, t: (0, 0)),
            pl.BlockSpec((1, 2 * Cout_p), lambda b, t: (0, 0)),
        ],
        out_specs=pl.BlockSpec((None, THW, Cout_p), lambda b, t: (b, t, 0)),
        compiler_params=pltpu.CompilerParams(
            dimension_semantics=("parallel", "parallel"),
            vmem_limit_bytes=VMEM_LIMIT),
    )


# ---------------------------------------------------------------------------
# Pass B (block2): GroupNorm + SiLU per row tile, fused with the residual
# 1x1 conv + add epilogue.  Fully parallel grid.
# ---------------------------------------------------------------------------
def _make_norm2_res_call(B, nT, TH, W, Cin_p, Cout_p):
    THW = TH * W

    def kernel(y_ref, stats_ref, gmat_ref, g_ref, be_ref, xr_ref,
               rw_ref, rb_ref, out_ref):
        st = jnp.dot(stats_ref[...], gmat_ref[...],
                     preferred_element_type=jnp.float32)
        mean = st[0:1, :]
        var = st[1:2, :] - mean * mean
        inv = lax.rsqrt(var + GN_EPS)

        x = y_ref[...].astype(jnp.float32)
        y = (x - mean) * (inv * g_ref[...]) + be_ref[...]
        y = _silu_kernel(y)

        # fused residual 1x1 conv + add
        res = jnp.dot(xr_ref[...], rw_ref[...],
                      preferred_element_type=jnp.float32) + rb_ref[...]
        out_ref[...] = (y + res).astype(out_ref.dtype)

    return pl.pallas_call(
        kernel,
        out_shape=jax.ShapeDtypeStruct((B, nT * THW, Cout_p), jnp.float32),
        grid=(B, nT),
        in_specs=[
            pl.BlockSpec((None, THW, Cout_p), lambda b, t: (b, t, 0)),
            pl.BlockSpec((None, 2, Cout_p), lambda b, t: (b, 0, 0)),
            pl.BlockSpec((Cout_p, Cout_p), lambda b, t: (0, 0)),
            pl.BlockSpec((1, Cout_p), lambda b, t: (0, 0)),
            pl.BlockSpec((1, Cout_p), lambda b, t: (0, 0)),
            pl.BlockSpec((None, THW, Cin_p), lambda b, t: (b, t, 0)),
            pl.BlockSpec((Cin_p, Cout_p), lambda b, t: (0, 0)),
            pl.BlockSpec((1, Cout_p), lambda b, t: (0, 0)),
        ],
        out_specs=pl.BlockSpec((None, THW, Cout_p), lambda b, t: (b, t, 0)),
        compiler_params=pltpu.CompilerParams(
            dimension_semantics=("parallel", "parallel"),
            vmem_limit_bytes=VMEM_LIMIT),
    )


# ---------------------------------------------------------------------------
# Parameters (deterministic, synthetic) and the forward wrapper.
# ---------------------------------------------------------------------------
def init_params(key, dim, dim_out, time_emb_dim):
    ks = jax.random.split(key, 12)
    p = {}
    p["conv1_w"] = 0.1 * jax.random.normal(ks[0], (3, 3, dim, dim_out), jnp.float32)   # HWIO
    p["conv1_b"] = 0.05 * jax.random.normal(ks[1], (dim_out,), jnp.float32)
    p["gn1_g"] = 1.0 + 0.1 * jax.random.normal(ks[2], (dim_out,), jnp.float32)
    p["gn1_b"] = 0.1 * jax.random.normal(ks[3], (dim_out,), jnp.float32)
    p["conv2_w"] = 0.1 * jax.random.normal(ks[4], (3, 3, dim_out, dim_out), jnp.float32)
    p["conv2_b"] = 0.05 * jax.random.normal(ks[5], (dim_out,), jnp.float32)
    p["gn2_g"] = 1.0 + 0.1 * jax.random.normal(ks[6], (dim_out,), jnp.float32)
    p["gn2_b"] = 0.1 * jax.random.normal(ks[7], (dim_out,), jnp.float32)
    p["mlp_w"] = 0.1 * jax.random.normal(ks[8], (time_emb_dim, 2 * dim_out), jnp.float32)
    p["mlp_b"] = 0.05 * jax.random.normal(ks[9], (2 * dim_out,), jnp.float32)
    p["res_w"] = 0.1 * jax.random.normal(ks[10], (dim, dim_out), jnp.float32)
    p["res_b"] = 0.05 * jax.random.normal(ks[11], (dim_out,), jnp.float32)
    return p


def resnet_block_forward(x_nchw, time_emb, params, *, groups=8, tile_h=8):
    B, Cin, H, W = x_nchw.shape
    Cout = params["conv1_w"].shape[-1]
    assert Cout % groups == 0
    cpg = Cout // groups
    HW = H * W
    Cin_p = _round_up(Cin, LANE)
    Cout_p = _round_up(Cout, LANE)
    Tdim = time_emb.shape[1]
    TH = min(tile_h, H)
    # Layout / tiling contracts (per perf-review correctness notes).
    assert H % TH == 0, "row tile must divide H"
    assert W % 8 == 0, "W must be a sublane multiple for the flattened tiles"
    nT = H // TH

    # NCHW -> NHWC, channel-pad to lane width, bf16 (every consumer is MXU).
    x_nhwc = jnp.transpose(x_nchw, (0, 2, 3, 1)).astype(jnp.float32)
    x_cp = jnp.pad(x_nhwc,
                   ((0, 0), (0, 0), (0, 0), (0, Cin_p - Cin))).astype(jnp.bfloat16)

    # Group-average matrix: channel [sum, sum_sq] -> broadcast group
    # [mean, E[x^2]] (1/(cpg*HW) folded in).  Padded channels form their own
    # all-zero groups and padded gamma/beta/scale/shift stay zero, so padded
    # channels are exactly 0 end-to-end — do not change that invariant.
    gid = jnp.arange(Cout_p) // cpg
    gmat = (gid[:, None] == gid[None, :]).astype(jnp.float32) / float(cpg * HW)

    # Weight standardization hoisted out of the kernels (f32, once), then
    # zero-padded to lane-dense channel counts and cast to bf16 for the MXU.
    w1 = _standardize_hwio(params["conv1_w"])
    w1 = jnp.pad(w1, ((0, 0), (0, 0), (0, Cin_p - Cin), (0, Cout_p - Cout)))
    w1 = w1.reshape(9, Cin_p, Cout_p).astype(jnp.bfloat16)
    w2 = _standardize_hwio(params["conv2_w"])
    w2 = jnp.pad(w2, ((0, 0), (0, 0), (0, Cout_p - Cout), (0, Cout_p - Cout)))
    w2 = w2.reshape(9, Cout_p, Cout_p).astype(jnp.bfloat16)

    b1 = _pad_vec(params["conv1_b"], Cout_p)[None]
    g1 = _pad_vec(params["gn1_g"], Cout_p)[None]
    be1 = _pad_vec(params["gn1_b"], Cout_p)[None]
    b2 = _pad_vec(params["conv2_b"], Cout_p)[None]
    g2 = _pad_vec(params["gn2_g"], Cout_p)[None]
    be2 = _pad_vec(params["gn2_b"], Cout_p)[None]

    mw, mb = params["mlp_w"], params["mlp_b"]
    mlp_w = (jnp.zeros((Tdim, 2 * Cout_p), jnp.float32)
             .at[:, :Cout].set(mw[:, :Cout])
             .at[:, Cout_p:Cout_p + Cout].set(mw[:, Cout:]))
    mlp_b = (jnp.zeros((2 * Cout_p,), jnp.float32)
             .at[:Cout].set(mb[:Cout])
             .at[Cout_p:Cout_p + Cout].set(mb[Cout:]))[None]

    rw = jnp.pad(params["res_w"],
                 ((0, Cin_p - Cin), (0, Cout_p - Cout))).astype(jnp.bfloat16)
    rb = _pad_vec(params["res_b"], Cout_p)[None]

    temb = time_emb.astype(jnp.float32).reshape(B, 1, Tdim)

    # ---- block1: conv+stats pass, then normalize/modulate/SiLU pass ----
    x_win = _row_windows(x_cp, TH)
    conv1, stats1 = _make_conv_stats_call(B, nT, TH, W, Cin_p, Cout_p)(x_win, w1, b1)
    h = _make_norm1_call(B, nT, TH, W, Cout_p, Tdim)(
        conv1, stats1, gmat, g1, be1, temb, mlp_w, mlp_b)         # bf16

    # ---- block2: conv+stats, then normalize/SiLU fused with residual ----
    h_win = _row_windows(h.reshape(B, H, W, Cout_p), TH)
    conv2, stats2 = _make_conv_stats_call(B, nT, TH, W, Cout_p, Cout_p)(h_win, w2, b2)
    out = _make_norm2_res_call(B, nT, TH, W, Cin_p, Cout_p)(
        conv2, stats2, gmat, g2, be2, x_cp.reshape(B, HW, Cin_p), rw, rb)

    out = out[:, :, :Cout].reshape(B, H, W, Cout)
    return jnp.transpose(out, (0, 3, 1, 2))                       # back to NCHW


# ---------------------------------------------------------------------------
# Pure-JAX reference (f32) for correctness check.
# ---------------------------------------------------------------------------
def _ref_ws_conv(x, w, b):
    m = jnp.mean(w, axis=(0, 1, 2), keepdims=True)
    v = jnp.mean((w - m) ** 2, axis=(0, 1, 2), keepdims=True)
    wn = (w - m) * lax.rsqrt(v + WS_EPS)
    y = lax.conv_general_dilated(x, wn, (1, 1), "SAME",
                                 dimension_numbers=("NHWC", "HWIO", "NHWC"))
    return y + b


def _ref_group_norm(x, g, b, groups):
    B, H, W, C = x.shape
    xg = x.reshape(B, H, W, groups, C // groups)
    m = jnp.mean(xg, axis=(1, 2, 4), keepdims=True)
    v = jnp.mean((xg - m) ** 2, axis=(1, 2, 4), keepdims=True)
    xn = ((xg - m) * lax.rsqrt(v + GN_EPS)).reshape(B, H, W, C)
    return xn * g + b


def resnet_block_reference(x_nchw, time_emb, params, *, groups=8):
    x = jnp.transpose(x_nchw, (0, 2, 3, 1)).astype(jnp.float32)
    Cout = params["conv1_w"].shape[-1]
    t = _silu_ref(time_emb) @ params["mlp_w"] + params["mlp_b"]
    scale, shift = t[:, :Cout], t[:, Cout:]
    h = _ref_ws_conv(x, params["conv1_w"], params["conv1_b"])
    h = _ref_group_norm(h, params["gn1_g"], params["gn1_b"], groups)
    h = h * (scale[:, None, None, :] + 1.0) + shift[:, None, None, :]
    h = _silu_ref(h)
    h2 = _ref_ws_conv(h, params["conv2_w"], params["conv2_b"])
    h2 = _ref_group_norm(h2, params["gn2_g"], params["gn2_b"], groups)
    h2 = _silu_ref(h2)
    res = jnp.einsum("bhwc,cd->bhwd", x, params["res_w"]) + params["res_b"]
    return jnp.transpose(h2 + res, (0, 3, 1, 2))


if __name__ == "__main__":
    B, dim, dim_out = 2, 8, 16
    H = W = 16
    groups, time_emb_dim = 8, 32

    key = jax.random.PRNGKey(0)
    kx, kt, kp = jax.random.split(key, 3)
    x = jax.random.normal(kx, (B, dim, H, W), jnp.float32)       # NCHW, like PyTorch
    time_emb = jax.random.normal(kt, (B, time_emb_dim), jnp.float32)
    params = init_params(kp, dim, dim_out, time_emb_dim)

    fwd = jax.jit(lambda xx, tt: resnet_block_forward(xx, tt, params, groups=groups))
    out = jax.block_until_ready(fwd(x, time_emb))

    ref = resnet_block_reference(x, time_emb, params, groups=groups)
    # tolerance reflects bf16 MXU operands / bf16 intermediates (f32 accumulation)
    np.testing.assert_allclose(np.asarray(out), np.asarray(ref), rtol=2e-2, atol=2e-2)
    print("KERNEL_OK")
</pallas_src>

<mosaic_0001>
module attributes {stable_mosaic.version = 11 : i64} {
  func.func @kernel(%arg0: i32, %arg1: i32, %arg2: memref<1x1x10x18x128xbf16, #tpu.memory_space<vmem>>, %arg3: memref<9x128x128xbf16, #tpu.memory_space<vmem>>, %arg4: memref<1x128xf32, #tpu.memory_space<vmem>>, %arg5: memref<1x128x128xbf16, #tpu.memory_space<vmem>>, %arg6: memref<1x2x128xf32, #tpu.memory_space<vmem>>) attributes {dimension_semantics = [#tpu.dimension_semantics<parallel>, #tpu.dimension_semantics<arbitrary>], iteration_bounds = array<i64: 2, 2>, scalar_prefetch = 0 : i64, scratch_operands = 0 : i64, tpu.core_type = #tpu.core_type<tc>, window_params = [{transform_indices = @transform_0, window_bounds = array<i64: 1, 1, 10, 18, 128>}, {pipeline_mode = #tpu.pipeline_mode<synchronous>, transform_indices = @transform_1, window_bounds = array<i64: 9, 128, 128>}, {pipeline_mode = #tpu.pipeline_mode<synchronous>, transform_indices = @transform_2, window_bounds = array<i64: 1, 128>}, {transform_indices = @transform_3, window_bounds = array<i64: 1, 128, 128>}, {transform_indices = @transform_4, window_bounds = array<i64: 1, 2, 128>}]} {
    %cst = arith.constant 0.000000e+00 : f32
    %0 = vector.broadcast %cst : f32 to vector<128x128xf32>
    %c0 = arith.constant 0 : index
    %c0_0 = arith.constant 0 : index
    %c0_1 = arith.constant 0 : index
    %c0_2 = arith.constant 0 : index
    %c0_3 = arith.constant 0 : index
    %1 = vector.load %arg2[%c0, %c0_0, %c0_1, %c0_2, %c0_3] : memref<1x1x10x18x128xbf16, #tpu.memory_space<vmem>>, vector<1x1x8x16x128xbf16>
    %2 = vector.shape_cast %1 : vector<1x1x8x16x128xbf16> to vector<8x16x128xbf16>
    %3 = vector.shape_cast %2 : vector<8x16x128xbf16> to vector<128x128xbf16>
    %c0_4 = arith.constant 0 : index
    %c0_5 = arith.constant 0 : index
    %c0_6 = arith.constant 0 : index
    %4 = vector.load %arg3[%c0_4, %c0_5, %c0_6] : memref<9x128x128xbf16, #tpu.memory_space<vmem>>, vector<1x128x128xbf16>
    %5 = vector.shape_cast %4 : vector<1x128x128xbf16> to vector<128x128xbf16>
    %cst_7 = arith.constant dense<0.000000e+00> : vector<128x128xf32>
    %6 = tpu.matmul %3, %5, %cst_7 {dimension_numbers = #tpu.dot_dimension_numbers<[1], [0], [0], [1], [0, 0, 1, 1], [], []>} : vector<128x128xbf16>, vector<128x128xbf16>, vector<128x128xf32> -> vector<128x128xf32>
    %7 = arith.addf %0, %6 : vector<128x128xf32>
    %c0_8 = arith.constant 0 : index
    %c0_9 = arith.constant 0 : index
    %c0_10 = arith.constant 0 : index
    %c1 = arith.constant 1 : index
    %c0_11 = arith.constant 0 : index
    %8 = vector.load %arg2[%c0_8, %c0_9, %c0_10, %c1, %c0_11] : memref<1x1x10x18x128xbf16, #tpu.memory_space<vmem>>, vector<1x1x8x16x128xbf16>
    %9 = vector.shape_cast %8 : vector<1x1x8x16x128xbf16> to vector<8x16x128xbf16>
    %10 = vector.shape_cast %9 : vector<8x16x128xbf16> to vector<128x128xbf16>
    %c1_12 = arith.constant 1 : index
    %c0_13 = arith.constant 0 : index
    %c0_14 = arith.constant 0 : index
    %11 = vector.load %arg3[%c1_12, %c0_13, %c0_14] : memref<9x128x128xbf16, #tpu.memory_space<vmem>>, vector<1x128x128xbf16>
    %12 = vector.shape_cast %11 : vector<1x128x128xbf16> to vector<128x128xbf16>
    %cst_15 = arith.constant dense<0.000000e+00> : vector<128x128xf32>
    %13 = tpu.matmul %10, %12, %cst_15 {dimension_numbers = #tpu.dot_dimension_numbers<[1], [0], [0], [1], [0, 0, 1, 1], [], []>} : vector<128x128xbf16>, vector<128x128xbf16>, vector<128x128xf32> -> vector<128x128xf32>
    %14 = arith.addf %7, %13 : vector<128x128xf32>
    %c0_16 = arith.constant 0 : index
    %c0_17 = arith.constant 0 : index
    %c0_18 = arith.constant 0 : index
    %c2 = arith.constant 2 : index
    %c0_19 = arith.constant 0 : index
    %15 = vector.load %arg2[%c0_16, %c0_17, %c0_18, %c2, %c0_19] : memref<1x1x10x18x128xbf16, #tpu.memory_space<vmem>>, vector<1x1x8x16x128xbf16>
    %16 = vector.shape_cast %15 : vector<1x1x8x16x128xbf16> to vector<8x16x128xbf16>
    %17 = vector.shape_cast %16 : vector<8x16x128xbf16> to vector<128x128xbf16>
    %c2_20 = arith.constant 2 : index
    %c0_21 = arith.constant 0 : index
    %c0_22 = arith.constant 0 : index
    %18 = vector.load %arg3[%c2_20, %c0_21, %c0_22] : memref<9x128x128xbf16, #tpu.memory_space<vmem>>, vector<1x128x128xbf16>
    %19 = vector.shape_cast %18 : vector<1x128x128xbf16> to vector<128x128xbf16>
    %cst_23 = arith.constant dense<0.000000e+00> : vector<128x128xf32>
    %20 = tpu.matmul %17, %19, %cst_23 {dimension_numbers = #tpu.dot_dimension_numbers<[1], [0], [0], [1], [0, 0, 1, 1], [], []>} : vector<128x128xbf16>, vector<128x128xbf16>, vector<128x128xf32> -> vector<128x128xf32>
    %21 = arith.addf %14, %20 : vector<128x128xf32>
    %c0_24 = arith.constant 0 : index
    %c0_25 = arith.constant 0 : index
    %c1_26 = arith.constant 1 : index
    %c0_27 = arith.constant 0 : index
    %c0_28 = arith.constant 0 : index
    %22 = vector.load %arg2[%c0_24, %c0_25, %c1_26, %c0_27, %c0_28] : memref<1x1x10x18x128xbf16, #tpu.memory_space<vmem>>, vector<1x1x8x16x128xbf16>
    %23 = vector.shape_cast %22 : vector<1x1x8x16x128xbf16> to vector<8x16x128xbf16>
    %24 = vector.shape_cast %23 : vector<8x16x128xbf16> to vector<128x128xbf16>
    %c3 = arith.constant 3 : index
    %c0_29 = arith.constant 0 : index
    %c0_30 = arith.constant 0 : index
    %25 = vector.load %arg3[%c3, %c0_29, %c0_30] : memref<9x128x128xbf16, #tpu.memory_space<vmem>>, vector<1x128x128xbf16>
    %26 = vector.shape_cast %25 : vector<1x128x128xbf16> to vector<128x128xbf16>
    %cst_31 = arith.constant dense<0.000000e+00> : vector<128x128xf32>
    %27 = tpu.matmul %24, %26, %cst_31 {dimension_numbers = #tpu.dot_dimension_numbers<[1], [0], [0], [1], [0, 0, 1, 1], [], []>} : vector<128x128xbf16>, vector<128x128xbf16>, vector<128x128xf32> -> vector<128x128xf32>
    %28 = arith.addf %21, %27 : vector<128x128xf32>
    %c0_32 = arith.constant 0 : index
    %c0_33 = arith.constant 0 : index
    %c1_34 = arith.constant 1 : index
    %c1_35 = arith.constant 1 : index
    %c0_36 = arith.constant 0 : index
    %29 = vector.load %arg2[%c0_32, %c0_33, %c1_34, %c1_35, %c0_36] : memref<1x1x10x18x128xbf16, #tpu.memory_space<vmem>>, vector<1x1x8x16x128xbf16>
    %30 = vector.shape_cast %29 : vector<1x1x8x16x128xbf16> to vector<8x16x128xbf16>
    %31 = vector.shape_cast %30 : vector<8x16x128xbf16> to vector<128x128xbf16>
    %c4 = arith.constant 4 : index
    %c0_37 = arith.constant 0 : index
    %c0_38 = arith.constant 0 : index
    %32 = vector.load %arg3[%c4, %c0_37, %c0_38] : memref<9x128x128xbf16, #tpu.memory_space<vmem>>, vector<1x128x128xbf16>
    %33 = vector.shape_cast %32 : vector<1x128x128xbf16> to vector<128x128xbf16>
    %cst_39 = arith.constant dense<0.000000e+00> : vector<128x128xf32>
    %34 = tpu.matmul %31, %33, %cst_39 {dimension_numbers = #tpu.dot_dimension_numbers<[1], [0], [0], [1], [0, 0, 1, 1], [], []>} : vector<128x128xbf16>, vector<128x128xbf16>, vector<128x128xf32> -> vector<128x128xf32>
    %35 = arith.addf %28, %34 : vector<128x128xf32>
    %c0_40 = arith.constant 0 : index
    %c0_41 = arith.constant 0 : index
    %c1_42 = arith.constant 1 : index
    %c2_43 = arith.constant 2 : index
    %c0_44 = arith.constant 0 : index
    %36 = vector.load %arg2[%c0_40, %c0_41, %c1_42, %c2_43, %c0_44] : memref<1x1x10x18x128xbf16, #tpu.memory_space<vmem>>, vector<1x1x8x16x128xbf16>
    %37 = vector.shape_cast %36 : vector<1x1x8x16x128xbf16> to vector<8x16x128xbf16>
    %38 = vector.shape_cast %37 : vector<8x16x128xbf16> to vector<128x128xbf16>
    %c5 = arith.constant 5 : index
    %c0_45 = arith.constant 0 : index
    %c0_46 = arith.constant 0 : index
    %39 = vector.load %arg3[%c5, %c0_45, %c0_46] : memref<9x128x128xbf16, #tpu.memory_space<vmem>>, vector<1x128x128xbf16>
    %40 = vector.shape_cast %39 : vector<1x128x128xbf16> to vector<128x128xbf16>
    %cst_47 = arith.constant dense<0.000000e+00> : vector<128x128xf32>
    %41 = tpu.matmul %38, %40, %cst_47 {dimension_numbers = #tpu.dot_dimension_numbers<[1], [0], [0], [1], [0, 0, 1, 1], [], []>} : vector<128x128xbf16>, vector<128x128xbf16>, vector<128x128xf32> -> vector<128x128xf32>
    %42 = arith.addf %35, %41 : vector<128x128xf32>
    %c0_48 = arith.constant 0 : index
    %c0_49 = arith.constant 0 : index
    %c2_50 = arith.constant 2 : index
    %c0_51 = arith.constant 0 : index
    %c0_52 = arith.constant 0 : index
    %43 = vector.load %arg2[%c0_48, %c0_49, %c2_50, %c0_51, %c0_52] : memref<1x1x10x18x128xbf16, #tpu.memory_space<vmem>>, vector<1x1x8x16x128xbf16>
    %44 = vector.shape_cast %43 : vector<1x1x8x16x128xbf16> to vector<8x16x128xbf16>
    %45 = vector.shape_cast %44 : vector<8x16x128xbf16> to vector<128x128xbf16>
    %c6 = arith.constant 6 : index
    %c0_53 = arith.constant 0 : index
    %c0_54 = arith.constant 0 : index
    %46 = vector.load %arg3[%c6, %c0_53, %c0_54] : memref<9x128x128xbf16, #tpu.memory_space<vmem>>, vector<1x128x128xbf16>
    %47 = vector.shape_cast %46 : vector<1x128x128xbf16> to vector<128x128xbf16>
    %cst_55 = arith.constant dense<0.000000e+00> : vector<128x128xf32>
    %48 = tpu.matmul %45, %47, %cst_55 {dimension_numbers = #tpu.dot_dimension_numbers<[1], [0], [0], [1], [0, 0, 1, 1], [], []>} : vector<128x128xbf16>, vector<128x128xbf16>, vector<128x128xf32> -> vector<128x128xf32>
    %49 = arith.addf %42, %48 : vector<128x128xf32>
    %c0_56 = arith.constant 0 : index
    %c0_57 = arith.constant 0 : index
    %c2_58 = arith.constant 2 : index
    %c1_59 = arith.constant 1 : index
    %c0_60 = arith.constant 0 : index
    %50 = vector.load %arg2[%c0_56, %c0_57, %c2_58, %c1_59, %c0_60] : memref<1x1x10x18x128xbf16, #tpu.memory_space<vmem>>, vector<1x1x8x16x128xbf16>
    %51 = vector.shape_cast %50 : vector<1x1x8x16x128xbf16> to vector<8x16x128xbf16>
    %52 = vector.shape_cast %51 : vector<8x16x128xbf16> to vector<128x128xbf16>
    %c7 = arith.constant 7 : index
    %c0_61 = arith.constant 0 : index
    %c0_62 = arith.constant 0 : index
    %53 = vector.load %arg3[%c7, %c0_61, %c0_62] : memref<9x128x128xbf16, #tpu.memory_space<vmem>>, vector<1x128x128xbf16>
    %54 = vector.shape_cast %53 : vector<1x128x128xbf16> to vector<128x128xbf16>
    %cst_63 = arith.constant dense<0.000000e+00> : vector<128x128xf32>
    %55 = tpu.matmul %52, %54, %cst_63 {dimension_numbers = #tpu.dot_dimension_numbers<[1], [0], [0], [1], [0, 0, 1, 1], [], []>} : vector<128x128xbf16>, vector<128x128xbf16>, vector<128x128xf32> -> vector<128x128xf32>
    %56 = arith.addf %49, %55 : vector<128x128xf32>
    %c0_64 = arith.constant 0 : index
    %c0_65 = arith.constant 0 : index
    %c2_66 = arith.constant 2 : index
    %c2_67 = arith.constant 2 : index
    %c0_68 = arith.constant 0 : index
    %57 = vector.load %arg2[%c0_64, %c0_65, %c2_66, %c2_67, %c0_68] : memref<1x1x10x18x128xbf16, #tpu.memory_space<vmem>>, vector<1x1x8x16x128xbf16>
    %58 = vector.shape_cast %57 : vector<1x1x8x16x128xbf16> to vector<8x16x128xbf16>
    %59 = vector.shape_cast %58 : vector<8x16x128xbf16> to vector<128x128xbf16>
    %c8 = arith.constant 8 : index
    %c0_69 = arith.constant 0 : index
    %c0_70 = arith.constant 0 : index
    %60 = vector.load %arg3[%c8, %c0_69, %c0_70] : memref<9x128x128xbf16, #tpu.memory_space<vmem>>, vector<1x128x128xbf16>
    %61 = vector.shape_cast %60 : vector<1x128x128xbf16> to vector<128x128xbf16>
    %cst_71 = arith.constant dense<0.000000e+00> : vector<128x128xf32>
    %62 = tpu.matmul %59, %61, %cst_71 {dimension_numbers = #tpu.dot_dimension_numbers<[1], [0], [0], [1], [0, 0, 1, 1], [], []>} : vector<128x128xbf16>, vector<128x128xbf16>, vector<128x128xf32> -> vector<128x128xf32>
    %63 = arith.addf %56, %62 : vector<128x128xf32>
    %c0_72 = arith.constant 0 : index
    %c0_73 = arith.constant 0 : index
    %64 = vector.load %arg4[%c0_72, %c0_73] : memref<1x128xf32, #tpu.memory_space<vmem>>, vector<1x128xf32>
    %65 = vector.broadcast %64 : vector<1x128xf32> to vector<128x128xf32>
    %66 = arith.addf %63, %65 : vector<128x128xf32>
    %67 = arith.truncf %66 : vector<128x128xf32> to vector<128x128xbf16>
    %c0_74 = arith.constant 0 : index
    %c0_75 = arith.constant 0 : index
    %c0_76 = arith.constant 0 : index
    %68 = vector.load %arg5[%c0_74, %c0_75, %c0_76] : memref<1x128x128xbf16, #tpu.memory_space<vmem>>, vector<1x128x128xbf16>
    %69 = vector.shape_cast %68 : vector<1x128x128xbf16> to vector<128x128xbf16>
    %70 = vector.shape_cast %67 : vector<128x128xbf16> to vector<1x128x128xbf16>
    tpu.vector_store %arg5[%c0_74, %c0_75, %c0_76], %70 {strides = array<i32>} : memref<1x128x128xbf16, #tpu.memory_space<vmem>>, vector<1x128x128xbf16>,
    %cst_77 = arith.constant dense<0.000000e+00> : vector<128xf32>
    %71 = vector.multi_reduction <add>, %66, %cst_77 [0] : vector<128x128xf32> to vector<128xf32>
    %72 = vector.shape_cast %71 : vector<128xf32> to vector<1x128xf32>
    %73 = arith.mulf %66, %66 : vector<128x128xf32>
    %cst_78 = arith.constant dense<0.000000e+00> : vector<128xf32>
    %74 = vector.multi_reduction <add>, %73, %cst_78 [0] : vector<128x128xf32> to vector<128xf32>
    %75 = vector.shape_cast %74 : vector<128xf32> to vector<1x128xf32>
    %76 = tpu.concatenate %72, %75 in 0 : vector<1x128xf32>, vector<1x128xf32> -> vector<2x128xf32>
    %c0_i32 = arith.constant 0 : i32
    %77 = arith.cmpi eq, %arg1, %c0_i32 : i32
    %78 = arith.extui %77 : i1 to i32
    %c0_i32_79 = arith.constant 0 : i32
    %79 = arith.cmpi ne, %78, %c0_i32_79 : i32
    scf.if %79 {
      %cst_86 = arith.constant 0.000000e+00 : f32
      %86 = vector.broadcast %cst_86 : f32 to vector<2x128xf32>
      %c0_87 = arith.constant 0 : index
      %c0_88 = arith.constant 0 : index
      %c0_89 = arith.constant 0 : index
      %87 = vector.load %arg6[%c0_87, %c0_88, %c0_89] : memref<1x2x128xf32, #tpu.memory_space<vmem>>, vector<1x2x128xf32>
      %88 = vector.shape_cast %87 : vector<1x2x128xf32> to vector<2x128xf32>
      %89 = vector.shape_cast %86 : vector<2x128xf32> to vector<1x2x128xf32>
      tpu.vector_store %arg6[%c0_87, %c0_88, %c0_89], %89 {strides = array<i32>} : memref<1x2x128xf32, #tpu.memory_space<vmem>>, vector<1x2x128xf32>,
    } else {
    }
    %c0_80 = arith.constant 0 : index
    %c0_81 = arith.constant 0 : index
    %c0_82 = arith.constant 0 : index
    %80 = vector.load %arg6[%c0_80, %c0_81, %c0_82] : memref<1x2x128xf32, #tpu.memory_space<vmem>>, vector<1x2x128xf32>
    %81 = vector.shape_cast %80 : vector<1x2x128xf32> to vector<2x128xf32>
    %82 = arith.addf %81, %76 : vector<2x128xf32>
    %c0_83 = arith.constant 0 : index
    %c0_84 = arith.constant 0 : index
    %c0_85 = arith.constant 0 : index
    %83 = vector.load %arg6[%c0_83, %c0_84, %c0_85] : memref<1x2x128xf32, #tpu.memory_space<vmem>>, vector<1x2x128xf32>
    %84 = vector.shape_cast %83 : vector<1x2x128xf32> to vector<2x128xf32>
    %85 = vector.shape_cast %82 : vector<2x128xf32> to vector<1x2x128xf32>
    tpu.vector_store %arg6[%c0_83, %c0_84, %c0_85], %85 {strides = array<i32>} : memref<1x2x128xf32, #tpu.memory_space<vmem>>, vector<1x2x128xf32>,
    return
  }
  func.func @transform_0(%arg0: i32, %arg1: i32) -> (i32, i32, i32, i32, i32) {
    %c0_i32 = arith.constant 0 : i32
    %c0_i32_0 = arith.constant 0 : i32
    %c0_i32_1 = arith.constant 0 : i32
    %c0_i32_2 = arith.constant 0 : i32
    return %arg0, %arg1, %c0_i32, %c0_i32_0, %c0_i32_1 : i32, i32, i32, i32, i32
  }
  func.func @transform_1(%arg0: i32, %arg1: i32) -> (i32, i32, i32) {
    %c0_i32 = arith.constant 0 : i32
    %c0_i32_0 = arith.constant 0 : i32
    %c0_i32_1 = arith.constant 0 : i32
    %c0_i32_2 = arith.constant 0 : i32
    return %c0_i32, %c0_i32_0, %c0_i32_1 : i32, i32, i32
  }
  func.func @transform_2(%arg0: i32, %arg1: i32) -> (i32, i32) {
    %c0_i32 = arith.constant 0 : i32
    %c0_i32_0 = arith.constant 0 : i32
    %c0_i32_1 = arith.constant 0 : i32
    return %c0_i32, %c0_i32_0 : i32, i32
  }
  func.func @transform_3(%arg0: i32, %arg1: i32) -> (i32, i32, i32) {
    %c0_i32 = arith.constant 0 : i32
    %c0_i32_0 = arith.constant 0 : i32
    return %arg0, %arg1, %c0_i32 : i32, i32, i32
  }
  func.func @transform_4(%arg0: i32, %arg1: i32) -> (i32, i32, i32) {
    %c0_i32 = arith.constant 0 : i32
    %c0_i32_0 = arith.constant 0 : i32
    %c0_i32_1 = arith.constant 0 : i32
    return %arg0, %c0_i32, %c0_i32_0 : i32, i32, i32
  }
}

module attributes {stable_mosaic.version = 11 : i64} {
  func.func @kernel(%arg0: i32, %arg1: i32, %arg2: memref<1x128x128xbf16, #tpu.memory_space<vmem>>, %arg3: memref<1x2x128xf32, #tpu.memory_space<vmem>>, %arg4: memref<128x128xf32, #tpu.memory_space<vmem>>, %arg5: memref<1x128xf32, #tpu.memory_space<vmem>>, %arg6: memref<1x128xf32, #tpu.memory_space<vmem>>, %arg7: memref<1x1x32xf32, #tpu.memory_space<vmem>>, %arg8: memref<32x256xf32, #tpu.memory_space<vmem>>, %arg9: memref<1x256xf32, #tpu.memory_space<vmem>>, %arg10: memref<1x128x128xbf16, #tpu.memory_space<vmem>>) attributes {dimension_semantics = [#tpu.dimension_semantics<parallel>, #tpu.dimension_semantics<parallel>], iteration_bounds = array<i64: 2, 2>, scalar_prefetch = 0 : i64, scratch_operands = 0 : i64, tpu.core_type = #tpu.core_type<tc>, window_params = [{transform_indices = @transform_0, window_bounds = array<i64: 1, 128, 128>}, {transform_indices = @transform_1, window_bounds = array<i64: 1, 2, 128>}, {pipeline_mode = #tpu.pipeline_mode<synchronous>, transform_indices = @transform_2, window_bounds = array<i64: 128, 128>}, {pipeline_mode = #tpu.pipeline_mode<synchronous>, transform_indices = @transform_3, window_bounds = array<i64: 1, 128>}, {pipeline_mode = #tpu.pipeline_mode<synchronous>, transform_indices = @transform_4, window_bounds = array<i64: 1, 128>}, {transform_indices = @transform_5, window_bounds = array<i64: 1, 1, 32>}, {pipeline_mode = #tpu.pipeline_mode<synchronous>, transform_indices = @transform_6, window_bounds = array<i64: 32, 256>}, {pipeline_mode = #tpu.pipeline_mode<synchronous>, transform_indices = @transform_7, window_bounds = array<i64: 1, 256>}, {transform_indices = @transform_8, window_bounds = array<i64: 1, 128, 128>}]} {
    %c0 = arith.constant 0 : index
    %c0_0 = arith.constant 0 : index
    %c0_1 = arith.constant 0 : index
    %0 = vector.load %arg3[%c0, %c0_0, %c0_1] : memref<1x2x128xf32, #tpu.memory_space<vmem>>, vector<1x2x128xf32>
    %1 = vector.shape_cast %0 : vector<1x2x128xf32> to vector<2x128xf32>
    %c0_2 = arith.constant 0 : index
    %c0_3 = arith.constant 0 : index
    %2 = vector.load %arg4[%c0_2, %c0_3] : memref<128x128xf32, #tpu.memory_space<vmem>>, vector<128x128xf32>
    %cst = arith.constant dense<0.000000e+00> : vector<2x128xf32>
    %3 = tpu.matmul %1, %2, %cst {dimension_numbers = #tpu.dot_dimension_numbers<[1], [0], [0], [1], [0, 0, 1, 1], [], []>} : vector<2x128xf32>, vector<128x128xf32>, vector<2x128xf32> -> vector<2x128xf32>
    %4 = vector.extract_strided_slice %3 {offsets = [0, 0], sizes = [1, 128], strides = [1, 1]} : vector<2x128xf32> to vector<1x128xf32>
    %5 = vector.extract_strided_slice %3 {offsets = [1, 0], sizes = [1, 128], strides = [1, 1]} : vector<2x128xf32> to vector<1x128xf32>
    %6 = arith.mulf %4, %4 : vector<1x128xf32>
    %7 = arith.subf %5, %6 : vector<1x128xf32>
    %cst_4 = arith.constant 9.99999974E-6 : f32
    %8 = vector.broadcast %cst_4 : f32 to vector<1x128xf32>
    %9 = arith.addf %7, %8 : vector<1x128xf32>
    %10 = math.rsqrt %9 : vector<1x128xf32>
    %c0_5 = arith.constant 0 : index
    %c0_6 = arith.constant 0 : index
    %c0_7 = arith.constant 0 : index
    %11 = vector.load %arg7[%c0_5, %c0_6, %c0_7] : memref<1x1x32xf32, #tpu.memory_space<vmem>>, vector<1x1x32xf32>
    %12 = vector.shape_cast %11 : vector<1x1x32xf32> to vector<1x32xf32>
    %cst_8 = arith.constant 0.000000e+00 : f32
    %13 = vector.broadcast %cst_8 : f32 to vector<1x32xf32>
    %14 = arith.subf %13, %12 : vector<1x32xf32>
    %15 = math.exp %14 : vector<1x32xf32>
    %cst_9 = arith.constant 1.000000e+00 : f32
    %16 = vector.broadcast %cst_9 : f32 to vector<1x32xf32>
    %17 = arith.addf %16, %15 : vector<1x32xf32>
    %18 = tpu.reciprocal %17 {approx = true} : vector<1x32xf32> -> vector<1x32xf32>
    %19 = arith.mulf %12, %18 : vector<1x32xf32>
    %c0_10 = arith.constant 0 : index
    %c0_11 = arith.constant 0 : index
    %20 = vector.load %arg8[%c0_10, %c0_11] : memref<32x256xf32, #tpu.memory_space<vmem>>, vector<32x256xf32>
    %cst_12 = arith.constant dense<0.000000e+00> : vector<1x256xf32>
    %21 = tpu.matmul %19, %20, %cst_12 {dimension_numbers = #tpu.dot_dimension_numbers<[1], [0], [0], [1], [0, 0, 1, 1], [], []>} : vector<1x32xf32>, vector<32x256xf32>, vector<1x256xf32> -> vector<1x256xf32>
    %c0_13 = arith.constant 0 : index
    %c0_14 = arith.constant 0 : index
    %22 = vector.load %arg9[%c0_13, %c0_14] : memref<1x256xf32, #tpu.memory_space<vmem>>, vector<1x256xf32>
    %23 = arith.addf %21, %22 : vector<1x256xf32>
    %24 = vector.extract_strided_slice %23 {offsets = [0, 0], sizes = [1, 128], strides = [1, 1]} : vector<1x256xf32> to vector<1x128xf32>
    %25 = vector.extract_strided_slice %23 {offsets = [0, 128], sizes = [1, 128], strides = [1, 1]} : vector<1x256xf32> to vector<1x128xf32>
    %c0_15 = arith.constant 0 : index
    %c0_16 = arith.constant 0 : index
    %c0_17 = arith.constant 0 : index
    %26 = vector.load %arg2[%c0_15, %c0_16, %c0_17] : memref<1x128x128xbf16, #tpu.memory_space<vmem>>, vector<1x128x128xbf16>
    %27 = vector.shape_cast %26 : vector<1x128x128xbf16> to vector<128x128xbf16>
    %28 = arith.extf %27 : vector<128x128xbf16> to vector<128x128xf32>
    %29 = vector.broadcast %4 : vector<1x128xf32> to vector<128x128xf32>
    %30 = arith.subf %28, %29 : vector<128x128xf32>
    %c0_18 = arith.constant 0 : index
    %c0_19 = arith.constant 0 : index
    %31 = vector.load %arg5[%c0_18, %c0_19] : memref<1x128xf32, #tpu.memory_space<vmem>>, vector<1x128xf32>
    %32 = arith.mulf %10, %31 : vector<1x128xf32>
    %33 = vector.broadcast %32 : vector<1x128xf32> to vector<128x128xf32>
    %34 = arith.mulf %30, %33 : vector<128x128xf32>
    %c0_20 = arith.constant 0 : index
    %c0_21 = arith.constant 0 : index
    %35 = vector.load %arg6[%c0_20, %c0_21] : memref<1x128xf32, #tpu.memory_space<vmem>>, vector<1x128xf32>
    %36 = vector.broadcast %35 : vector<1x128xf32> to vector<128x128xf32>
    %37 = arith.addf %34, %36 : vector<128x128xf32>
    %cst_22 = arith.constant 1.000000e+00 : f32
    %38 = vector.broadcast %cst_22 : f32 to vector<1x128xf32>
    %39 = arith.addf %24, %38 : vector<1x128xf32>
    %40 = vector.broadcast %39 : vector<1x128xf32> to vector<128x128xf32>
    %41 = arith.mulf %37, %40 : vector<128x128xf32>
    %42 = vector.broadcast %25 : vector<1x128xf32> to vector<128x128xf32>
    %43 = arith.addf %41, %42 : vector<128x128xf32>
    %cst_23 = arith.constant 0.000000e+00 : f32
    %44 = vector.broadcast %cst_23 : f32 to vector<128x128xf32>
    %45 = arith.subf %44, %43 : vector<128x128xf32>
    %46 = math.exp %45 : vector<128x128xf32>
    %cst_24 = arith.constant 1.000000e+00 : f32
    %47 = vector.broadcast %cst_24 : f32 to vector<128x128xf32>
    %48 = arith.addf %47, %46 : vector<128x128xf32>
    %49 = tpu.reciprocal %48 {approx = true} : vector<128x128xf32> -> vector<128x128xf32>
    %50 = arith.mulf %43, %49 : vector<128x128xf32>
    %51 = arith.truncf %50 : vector<128x128xf32> to vector<128x128xbf16>
    %c0_25 = arith.constant 0 : index
    %c0_26 = arith.constant 0 : index
    %c0_27 = arith.constant 0 : index
    %52 = vector.load %arg10[%c0_25, %c0_26, %c0_27] : memref<1x128x128xbf16, #tpu.memory_space<vmem>>, vector<1x128x128xbf16>
    %53 = vector.shape_cast %52 : vector<1x128x128xbf16> to vector<128x128xbf16>
    %54 = vector.shape_cast %51 : vector<128x128xbf16> to vector<1x128x128xbf16>
    tpu.vector_store %arg10[%c0_25, %c0_26, %c0_27], %54 {strides = array<i32>} : memref<1x128x128xbf16, #tpu.memory_space<vmem>>, vector<1x128x128xbf16>,
    return
  }
  func.func @transform_0(%arg0: i32, %arg1: i32) -> (i32, i32, i32) {
    %c0_i32 = arith.constant 0 : i32
    %c0_i32_0 = arith.constant 0 : i32
    return %arg0, %arg1, %c0_i32 : i32, i32, i32
  }
  func.func @transform_1(%arg0: i32, %arg1: i32) -> (i32, i32, i32) {
    %c0_i32 = arith.constant 0 : i32
    %c0_i32_0 = arith.constant 0 : i32
    %c0_i32_1 = arith.constant 0 : i32
    return %arg0, %c0_i32, %c0_i32_0 : i32, i32, i32
  }
  func.func @transform_2(%arg0: i32, %arg1: i32) -> (i32, i32) {
    %c0_i32 = arith.constant 0 : i32
    %c0_i32_0 = arith.constant 0 : i32
    %c0_i32_1 = arith.constant 0 : i32
    return %c0_i32, %c0_i32_0 : i32, i32
  }
  func.func @transform_3(%arg0: i32, %arg1: i32) -> (i32, i32) {
    %c0_i32 = arith.constant 0 : i32
    %c0_i32_0 = arith.constant 0 : i32
    %c0_i32_1 = arith.constant 0 : i32
    return %c0_i32, %c0_i32_0 : i32, i32
  }
  func.func @transform_4(%arg0: i32, %arg1: i32) -> (i32, i32) {
    %c0_i32 = arith.constant 0 : i32
    %c0_i32_0 = arith.constant 0 : i32
    %c0_i32_1 = arith.constant 0 : i32
    return %c0_i32, %c0_i32_0 : i32, i32
  }
  func.func @transform_5(%arg0: i32, %arg1: i32) -> (i32, i32, i32) {
    %c0_i32 = arith.constant 0 : i32
    %c0_i32_0 = arith.constant 0 : i32
    %c0_i32_1 = arith.constant 0 : i32
    return %arg0, %c0_i32, %c0_i32_0 : i32, i32, i32
  }
  func.func @transform_6(%arg0: i32, %arg1: i32) -> (i32, i32) {
    %c0_i32 = arith.constant 0 : i32
    %c0_i32_0 = arith.constant 0 : i32
    %c0_i32_1 = arith.constant 0 : i32
    return %c0_i32, %c0_i32_0 : i32, i32
  }
  func.func @transform_7(%arg0: i32, %arg1: i32) -> (i32, i32) {
    %c0_i32 = arith.constant 0 : i32
    %c0_i32_0 = arith.constant 0 : i32
    %c0_i32_1 = arith.constant 0 : i32
    return %c0_i32, %c0_i32_0 : i32, i32
  }
  func.func @transform_8(%arg0: i32, %arg1: i32) -> (i32, i32, i32) {
    %c0_i32 = arith.constant 0 : i32
    %c0_i32_0 = arith.constant 0 : i32
    return %arg0, %arg1, %c0_i32 : i32, i32, i32
  }
}

module attributes {stable_mosaic.version = 11 : i64} {
  func.func @kernel(%arg0: i32, %arg1: i32, %arg2: memref<1x128x128xbf16, #tpu.memory_space<vmem>>, %arg3: memref<1x2x128xf32, #tpu.memory_space<vmem>>, %arg4: memref<128x128xf32, #tpu.memory_space<vmem>>, %arg5: memref<1x128xf32, #tpu.memory_space<vmem>>, %arg6: memref<1x128xf32, #tpu.memory_space<vmem>>, %arg7: memref<1x128x128xbf16, #tpu.memory_space<vmem>>, %arg8: memref<128x128xbf16, #tpu.memory_space<vmem>>, %arg9: memref<1x128xf32, #tpu.memory_space<vmem>>, %arg10: memref<1x128x128xf32, #tpu.memory_space<vmem>>) attributes {dimension_semantics = [#tpu.dimension_semantics<parallel>, #tpu.dimension_semantics<parallel>], iteration_bounds = array<i64: 2, 2>, scalar_prefetch = 0 : i64, scratch_operands = 0 : i64, tpu.core_type = #tpu.core_type<tc>, window_params = [{transform_indices = @transform_0, window_bounds = array<i64: 1, 128, 128>}, {transform_indices = @transform_1, window_bounds = array<i64: 1, 2, 128>}, {pipeline_mode = #tpu.pipeline_mode<synchronous>, transform_indices = @transform_2, window_bounds = array<i64: 128, 128>}, {pipeline_mode = #tpu.pipeline_mode<synchronous>, transform_indices = @transform_3, window_bounds = array<i64: 1, 128>}, {pipeline_mode = #tpu.pipeline_mode<synchronous>, transform_indices = @transform_4, window_bounds = array<i64: 1, 128>}, {transform_indices = @transform_5, window_bounds = array<i64: 1, 128, 128>}, {pipeline_mode = #tpu.pipeline_mode<synchronous>, transform_indices = @transform_6, window_bounds = array<i64: 128, 128>}, {pipeline_mode = #tpu.pipeline_mode<synchronous>, transform_indices = @transform_7, window_bounds = array<i64: 1, 128>}, {transform_indices = @transform_8, window_bounds = array<i64: 1, 128, 128>}]} {
    %c0 = arith.constant 0 : index
    %c0_0 = arith.constant 0 : index
    %c0_1 = arith.constant 0 : index
    %0 = vector.load %arg3[%c0, %c0_0, %c0_1] : memref<1x2x128xf32, #tpu.memory_space<vmem>>, vector<1x2x128xf32>
    %1 = vector.shape_cast %0 : vector<1x2x128xf32> to vector<2x128xf32>
    %c0_2 = arith.constant 0 : index
    %c0_3 = arith.constant 0 : index
    %2 = vector.load %arg4[%c0_2, %c0_3] : memref<128x128xf32, #tpu.memory_space<vmem>>, vector<128x128xf32>
    %cst = arith.constant dense<0.000000e+00> : vector<2x128xf32>
    %3 = tpu.matmul %1, %2, %cst {dimension_numbers = #tpu.dot_dimension_numbers<[1], [0], [0], [1], [0, 0, 1, 1], [], []>} : vector<2x128xf32>, vector<128x128xf32>, vector<2x128xf32> -> vector<2x128xf32>
    %4 = vector.extract_strided_slice %3 {offsets = [0, 0], sizes = [1, 128], strides = [1, 1]} : vector<2x128xf32> to vector<1x128xf32>
    %5 = vector.extract_strided_slice %3 {offsets = [1, 0], sizes = [1, 128], strides = [1, 1]} : vector<2x128xf32> to vector<1x128xf32>
    %6 = arith.mulf %4, %4 : vector<1x128xf32>
    %7 = arith.subf %5, %6 : vector<1x128xf32>
    %cst_4 = arith.constant 9.99999974E-6 : f32
    %8 = vector.broadcast %cst_4 : f32 to vector<1x128xf32>
    %9 = arith.addf %7, %8 : vector<1x128xf32>
    %10 = math.rsqrt %9 : vector<1x128xf32>
    %c0_5 = arith.constant 0 : index
    %c0_6 = arith.constant 0 : index
    %c0_7 = arith.constant 0 : index
    %11 = vector.load %arg2[%c0_5, %c0_6, %c0_7] : memref<1x128x128xbf16, #tpu.memory_space<vmem>>, vector<1x128x128xbf16>
    %12 = vector.shape_cast %11 : vector<1x128x128xbf16> to vector<128x128xbf16>
    %13 = arith.extf %12 : vector<128x128xbf16> to vector<128x128xf32>
    %14 = vector.broadcast %4 : vector<1x128xf32> to vector<128x128xf32>
    %15 = arith.subf %13, %14 : vector<128x128xf32>
    %c0_8 = arith.constant 0 : index
    %c0_9 = arith.constant 0 : index
    %16 = vector.load %arg5[%c0_8, %c0_9] : memref<1x128xf32, #tpu.memory_space<vmem>>, vector<1x128xf32>
    %17 = arith.mulf %10, %16 : vector<1x128xf32>
    %18 = vector.broadcast %17 : vector<1x128xf32> to vector<128x128xf32>
    %19 = arith.mulf %15, %18 : vector<128x128xf32>
    %c0_10 = arith.constant 0 : index
    %c0_11 = arith.constant 0 : index
    %20 = vector.load %arg6[%c0_10, %c0_11] : memref<1x128xf32, #tpu.memory_space<vmem>>, vector<1x128xf32>
    %21 = vector.broadcast %20 : vector<1x128xf32> to vector<128x128xf32>
    %22 = arith.addf %19, %21 : vector<128x128xf32>
    %cst_12 = arith.constant 0.000000e+00 : f32
    %23 = vector.broadcast %cst_12 : f32 to vector<128x128xf32>
    %24 = arith.subf %23, %22 : vector<128x128xf32>
    %25 = math.exp %24 : vector<128x128xf32>
    %cst_13 = arith.constant 1.000000e+00 : f32
    %26 = vector.broadcast %cst_13 : f32 to vector<128x128xf32>
    %27 = arith.addf %26, %25 : vector<128x128xf32>
    %28 = tpu.reciprocal %27 {approx = true} : vector<128x128xf32> -> vector<128x128xf32>
    %29 = arith.mulf %22, %28 : vector<128x128xf32>
    %c0_14 = arith.constant 0 : index
    %c0_15 = arith.constant 0 : index
    %c0_16 = arith.constant 0 : index
    %30 = vector.load %arg7[%c0_14, %c0_15, %c0_16] : memref<1x128x128xbf16, #tpu.memory_space<vmem>>, vector<1x128x128xbf16>
    %31 = vector.shape_cast %30 : vector<1x128x128xbf16> to vector<128x128xbf16>
    %c0_17 = arith.constant 0 : index
    %c0_18 = arith.constant 0 : index
    %32 = vector.load %arg8[%c0_17, %c0_18] : memref<128x128xbf16, #tpu.memory_space<vmem>>, vector<128x128xbf16>
    %cst_19 = arith.constant dense<0.000000e+00> : vector<128x128xf32>
    %33 = tpu.matmul %31, %32, %cst_19 {dimension_numbers = #tpu.dot_dimension_numbers<[1], [0], [0], [1], [0, 0, 1, 1], [], []>} : vector<128x128xbf16>, vector<128x128xbf16>, vector<128x128xf32> -> vector<128x128xf32>
    %c0_20 = arith.constant 0 : index
    %c0_21 = arith.constant 0 : index
    %34 = vector.load %arg9[%c0_20, %c0_21] : memref<1x128xf32, #tpu.memory_space<vmem>>, vector<1x128xf32>
    %35 = vector.broadcast %34 : vector<1x128xf32> to vector<128x128xf32>
    %36 = arith.addf %33, %35 : vector<128x128xf32>
    %37 = arith.addf %29, %36 : vector<128x128xf32>
    %c0_22 = arith.constant 0 : index
    %c0_23 = arith.constant 0 : index
    %c0_24 = arith.constant 0 : index
    %38 = vector.load %arg10[%c0_22, %c0_23, %c0_24] : memref<1x128x128xf32, #tpu.memory_space<vmem>>, vector<1x128x128xf32>
    %39 = vector.shape_cast %38 : vector<1x128x128xf32> to vector<128x128xf32>
    %40 = vector.shape_cast %37 : vector<128x128xf32> to vector<1x128x128xf32>
    tpu.vector_store %arg10[%c0_22, %c0_23, %c0_24], %40 {strides = array<i32>} : memref<1x128x128xf32, #tpu.memory_space<vmem>>, vector<1x128x128xf32>,
    return
  }
  func.func @transform_0(%arg0: i32, %arg1: i32) -> (i32, i32, i32) {
    %c0_i32 = arith.constant 0 : i32
    %c0_i32_0 = arith.constant 0 : i32
    return %arg0, %arg1, %c0_i32 : i32, i32, i32
  }
  func.func @transform_1(%arg0: i32, %arg1: i32) -> (i32, i32, i32) {
    %c0_i32 = arith.constant 0 : i32
    %c0_i32_0 = arith.constant 0 : i32
    %c0_i32_1 = arith.constant 0 : i32
    return %arg0, %c0_i32, %c0_i32_0 : i32, i32, i32
  }
  func.func @transform_2(%arg0: i32, %arg1: i32) -> (i32, i32) {
    %c0_i32 = arith.constant 0 : i32
    %c0_i32_0 = arith.constant 0 : i32
    %c0_i32_1 = arith.constant 0 : i32
    return %c0_i32, %c0_i32_0 : i32, i32
  }
  func.func @transform_3(%arg0: i32, %arg1: i32) -> (i32, i32) {
    %c0_i32 = arith.constant 0 : i32
    %c0_i32_0 = arith.constant 0 : i32
    %c0_i32_1 = arith.constant 0 : i32
    return %c0_i32, %c0_i32_0 : i32, i32
  }
  func.func @transform_4(%arg0: i32, %arg1: i32) -> (i32, i32) {
    %c0_i32 = arith.constant 0 : i32
    %c0_i32_0 = arith.constant 0 : i32
    %c0_i32_1 = arith.constant 0 : i32
    return %c0_i32, %c0_i32_0 : i32, i32
  }
  func.func @transform_5(%arg0: i32, %arg1: i32) -> (i32, i32, i32) {
    %c0_i32 = arith.constant 0 : i32
    %c0_i32_0 = arith.constant 0 : i32
    return %arg0, %arg1, %c0_i32 : i32, i32, i32
  }
  func.func @transform_6(%arg0: i32, %arg1: i32) -> (i32, i32) {
    %c0_i32 = arith.constant 0 : i32
    %c0_i32_0 = arith.constant 0 : i32
    %c0_i32_1 = arith.constant 0 : i32
    return %c0_i32, %c0_i32_0 : i32, i32
  }
  func.func @transform_7(%arg0: i32, %arg1: i32) -> (i32, i32) {
    %c0_i32 = arith.constant 0 : i32
    %c0_i32_0 = arith.constant 0 : i32
    %c0_i32_1 = arith.constant 0 : i32
    return %c0_i32, %c0_i32_0 : i32, i32
  }
  func.func @transform_8(%arg0: i32, %arg1: i32) -> (i32, i32, i32) {
    %c0_i32 = arith.constant 0 : i32
    %c0_i32_0 = arith.constant 0 : i32
    return %arg0, %arg1, %c0_i32 : i32, i32, i32
  }
}

</mosaic_0001>

<bundles_post_ra>
// kernel: _lambda_.5
= control target key start
LH: loop header
LB: loop body
LE: loop exit
PB: predicated region body
PF: predicated region fallthrough
CT: control target
= control target key end

     0   :  { %s1423_s27 = smov 0   ;;  %s1425_s28 = smov 0   ;;  %s1680_s0 = inlined_call_operand.vmem [shape: bf16[2,256,128], index: 0, kind: input, shape index: {}]   ;;  %s1681_s1 = inlined_call_operand.vmem [shape: f32[2,2,128], index: 1, kind: input, shape index: {}]   ;;  %s1682_s2 = inlined_call_operand.vmem [shape: f32[128,128], index: 2, kind: input, shape index: {}]   ;;  %s1683_s3 = inlined_call_operand.vmem [shape: f32[1,128], index: 3, kind: input, shape index: {}]   ;;  %s1684_s4 = inlined_call_operand.vmem [shape: f32[1,128], index: 4, kind: input, shape index: {}]   ;;  %s1685_s5 = inlined_call_operand.vmem [shape: f32[2,1,32], index: 5, kind: input, shape index: {}]   ;;  %s1686_s6 = inlined_call_operand.vmem [shape: f32[32,256], index: 6, kind: input, shape index: {}]   ;;  %s1687_s7 = inlined_call_operand.vmem [shape: f32[1,256], index: 7, kind: input, shape index: {}]   ;;  %s1688_s8 = inlined_call_operand.vmem [shape: bf16[2,256,128], index: 8, kind: output, shape index: {}]  }
   0x1   :  { %s1427_s29 = smov 0   ;;  %s1429_s30 = smov 0  }
   0x2   :  { %s1431_s9 = smov 0  }
   0x3 LB: > { %s27_s10 = sadd.s32 1, %s1365_s29  ;;  %s30_s11 = sadd.s32 1, %s1369_s30  ;;  %s1373_s9 = sphi %s1431_s9, %s18_s9   ;;  %s1369_s30 = sphi %s1429_s30, %s1692_s30   ;;  %s1365_s29 = sphi %s1427_s29, %s1691_s29   ;;  %s1361_s28 = sphi %s1425_s28, %s1690_s28   ;;  %s1357_s27 = sphi %s1423_s27, %s1689_s27  }
   0x4   : > { %p28_p0 = scmp.ge.s32.totalorder %s27_s10, 2  ;;  %p1007_p1 = scmp.ge.s32.totalorder %s1373_s9, 1 }
   0x5   : > { %p300_p2 = scmp.lt.s32.totalorder %s1373_s9, 5 }
   0x6   : > { %s1694_s10 = smov (%p28_p0, %s27_s10), 0  ;;  %s1696_s11 = smov (!%p28_p0, %s30_s11), %s1369_s30 }
   0x7   : > { %p301_p3 = pnand %p1007_p1, %p300_p2  ;;  %p32_p4 = scmp.ge.s32.totalorder %s1696_s11, 2 }
   0x8   : > { %v377_v0 = vld [vmem:[%s1682_s2] sm:$0xff] (!%p301_p3)  ;;  %v378_v1 = vld [vmem:[%s1682_s2 + $0x8] sm:$0xff] (!%p301_p3)  ;;  %v379_v2 = vld [vmem:[%s1682_s2 + $0x10] sm:$0xff] (!%p301_p3)  ;;  %v1375_v3 = vmov (!%p301_p3), 0.0|0.0   ;;  %vm1376_vm0 = vmmov (!%p301_p3), 0   ;;  %v1377_v6 = vmov (!%p301_p3), 0.0   ;;  %v487_v46 = vlaneseq (!%p301_p3) }
   0x9   : > { %s1698_s11 = smov (%p32_p4, %s1696_s11), 0  ;;  %304 = sbr.rel (%p301_p3) target bundleno = 345 (0x159), region = 52 }
   0xa   : > { %1190 = vmatprep.subr.bf16.mxu0 (!%p301_p3), %v1375_v3  ;;  %v1191_v4 = vpack.c.bf16 (!%p301_p3), %v378_v1, %v377_v0  ;;  %v380_v5 = vld [vmem:[%s1682_s2 + $0x18] sm:$0xff] (!%p301_p3)  ;;  %1187 = vmatprep.mubr.msk.f32.mxu0 (!%p301_p3), %vm1376_vm0, %v1377_v6  ;;  %p350_p5 = scmp.lt.s32.totalorder (!%p301_p3), %s1361_s28, 1  ;;  %v381_v8 = vld [vmem:[%s1682_s2 + $0x20] sm:$0xff] (!%p301_p3)  ;;  %v382_v9 = vld [vmem:[%s1682_s2 + $0x28] sm:$0xff] (!%p301_p3)  ;;  %vm497_vm1 = vcmask (!%p301_p3), 261120   ;;  %s1008_s22 = sshll.u32 (!%p301_p3), %s1357_s27, 4 }
   0xb   : > { %565 = vmatprep.mubr.f32.mxu1 (!%p301_p3), %v1377_v6  ;;  %v1194_v7 = vpack.c.bf16 (!%p301_p3), %v380_v5, %v379_v2  ;;  %v478_v10 = vld [vmem:[%s1686_s6 + $0x8] sm:$0xff] (!%p301_p3)  ;;  %v480_v11 = vld [vmem:[%s1686_s6 + $0x18] sm:$0xff] (!%p301_p3)  ;;  %v477_v13 = vld [vmem:[%s1686_s6] sm:$0xff] (!%p301_p3)  ;;  %v1197_v16 = vpack.c.bf16 (!%p301_p3), %v382_v9, %v381_v8  ;;  %p352_p6 = scmp.lt.s32.totalorder (!%p301_p3), %s1008_s22, 31  ;;  %v1555_v47 = vshrl.u32 (!%p301_p3), %v487_v46, 7 }
   0xc   : > { %1192 = vmatpush3.bf16.msra.mxu0 (!%p301_p3), %v1191_v4  ;;  %v1214_v12 = vpack.c.bf16 (!%p301_p3), %v480_v11, %v478_v10  ;;  %v479_v14 = vld [vmem:[%s1686_s6 + $0x10] sm:$0xff] (!%p301_p3)  ;;  %v482_v15 = vld [vmem:[%s1686_s6 + $0x28] sm:$0xff] (!%p301_p3)  ;;  %v484_v19 = vld [vmem:[%s1686_s6 + $0x38] sm:$0xff] (!%p301_p3) }
   0xd   : > { %1193 = vmatprep.subr.bf16.mxu0 (!%p301_p3), %v1375_v3  ;;  %v383_v17 = vld [vmem:[%s1682_s2 + $0x30] sm:$0xff] (!%p301_p3)  ;;  %v1216_v18 = vpack.c.bf16 (!%p301_p3), %v479_v14, %v477_v13  ;;  %v481_v20 = vld [vmem:[%s1686_s6 + $0x20] sm:$0xff] (!%p301_p3)  ;;  %v384_v21 = vld [vmem:[%s1682_s2 + $0x38] sm:$0xff] (!%p301_p3)  ;;  %v1218_v22 = vpack.c.bf16 (!%p301_p3), %v484_v19, %v482_v15  ;;  %v489_v53 = vsub.s32 (!%p301_p3), 0, %v1555_v47 }
   0xe   : > { %1215 = vmatprep.subr.bf16.mxu1 (!%p301_p3), %v1214_v12  ;;  %v483_v23 = vld [vmem:[%s1686_s6 + $0x30] sm:$0xff] (!%p301_p3)  ;;  %v1200_v27 = vpack.c.bf16 (!%p301_p3), %v384_v21, %v383_v17  ;;  %v385_v28 = vld [vmem:[%s1682_s2 + $0x40] sm:$0xff] (!%p301_p3)  ;;  %v386_v29 = vld [vmem:[%s1682_s2 + $0x48] sm:$0xff] (!%p301_p3) }
   0xf   : > { %1217 = vmatpush1.bf16.msra.mxu1 (!%p301_p3), %v1216_v18  ;;  %v1220_v25 = vpack.c.bf16 (!%p301_p3), %v483_v23, %v481_v20  ;;  %v1203_v31 = vpack.c.bf16 (!%p301_p3), %v386_v29, %v385_v28  ;;  %v387_v32 = vld [vmem:[%s1682_s2 + $0x50] sm:$0xff] (!%p301_p3)  ;;  %v388_v33 = vld [vmem:[%s1682_s2 + $0x58] sm:$0xff] (!%p301_p3)  ;;  %v389_v35 = vld [vmem:[%s1682_s2 + $0x60] sm:$0xff] (!%p301_p3) }
  0x10   : > { %s1700_s28 = smov (!%p350_p5, %s1361_s28), 1  ;;  %1195 = vmatpush3.bf16.msra.mxu0 %v1194_v7  ;;  %1219 = vmatprep.subr.bf16.mxu1 %v1218_v22  ;;  %v1206_v34 = vpack.c.bf16 %v388_v33, %v387_v32  ;;  %v390_v36 = vld [vmem:[%s1682_s2 + $0x68] sm:$0xff]  ;;  %v391_v38 = vld [vmem:[%s1682_s2 + $0x70] sm:$0xff]  ;;  %v392_v39 = vld [vmem:[%s1682_s2 + $0x78] sm:$0xff]  ;;  %s1702_s22 = smov (!%p352_p6, %s1008_s22), 31 }
  0x11   : > { %s365_s12 = scalar_lea.vmem %s1685_s5, %s1700_s28  ;;  %1196 = vmatprep.subr.bf16.mxu0 %v1375_v3  ;;  %v1209_v37 = vpack.c.bf16 %v390_v36, %v389_v35  ;;  %s1011_s18 = sshll.u32 %s1700_s28, 1  ;;  %v1212_v41 = vpack.c.bf16 %v392_v39, %v391_v38  ;;  %v485_v32 = vld [vmem:[%s1687_s7] sm:$0x3]  ;;  %v493_v36 = vsub.s32 1, %v1555_v47 }
  0x12   : > { %v470_v24 = vld [vmem:[%s365_s12] sm:$0x1]  ;;  %s362_s21 = scalar_lea.vmem %s1681_s1, %s1011_s18  ;;  %s1009_s23 = sshll.u32 %s1700_s28, 5  ;;  %v490_v35 = vrot.slane %v485_v32, %v489_v53 }
  0x13   : > { %v471_v26 = vsub.f32 0.0, %v470_v24  ;;  %1221 = vmatpush1.bf16.msra.mxu1 %v1220_v25  ;;  %v376_v43 = vld [vmem:[%s362_s21] sm:$0x3]  ;;  %s1547_s24 = sadd.s32 %s1009_s23, %s1702_s22  ;;  %v494_v38 = vrot.slane %v485_v32, %v493_v36 }
  0x14   : > { %1198 = vmatpush3.bf16.msra.mxu0 %v1197_v16  ;;  %s1010_s25 = sshll.u32 %s1547_s24, 2  ;;  %v1016_v39 = vld [vmem:[%s1683_s3] ss:$0 sm:$0xff] }
  0x15   : > { %1199 = vmatprep.subr.bf16.mxu0 %v1375_v3  ;;  %v472_v30 = vmul.f32 1.442695, %v471_v26  ;;  %s357_s13 = scalar_lea.vmem %s1680_s0, %s1010_s25  ;;  %s1641_s20 = scalar_lea.vmem %s1688_s8, %s1010_s25 }
  0x16   : > { %v1053_v48 = vld [vmem:[%s357_s13] sm:$0xff]   ;;  %v1124_v49 = vld [vmem:[%s357_s13 + $0x8] sm:$0xff]   ;;  %v1125_v50 = vld [vmem:[%s357_s13 + $0x10] sm:$0xff]  }
  0x17   : > { %1265 = vpow2.f32 %v472_v30  ;;  %v1126_v51 = vld [vmem:[%s357_s13 + $0x18] sm:$0xff]   ;;  %v1127_v52 = vld [vmem:[%s357_s13 + $0x20] sm:$0xff]   ;;  %v1054_v54 = vunpack.c.l.bf16 %v1053_v48  ;;  %v1055_v55 = vunpack.c.h.bf16 %v1053_v48  ;;  %v1128_v56 = vld [vmem:[%s357_s13 + $0x28] sm:$0xff]   ;;  %v1058_v57 = vunpack.c.l.bf16 %v1124_v49 }
  0x18   : > { %1201 = vmatpush3.bf16.msra.mxu0 %v1200_v27  ;;  %v1059_v58 = vunpack.c.h.bf16 %v1124_v49  ;;  %v1062_v59 = vunpack.c.l.bf16 %v1125_v50  ;;  %v1063_v60 = vunpack.c.h.bf16 %v1125_v50  ;;  %v1129_v61 = vld [vmem:[%s357_s13 + $0x30] sm:$0xff]   ;;  %v1130_v62 = vld [vmem:[%s357_s13 + $0x38] sm:$0xff]   ;;  %v1066_v63 = vunpack.c.l.bf16 %v1126_v51 }
  0x19   : > { %1202 = vmatprep.subr.bf16.mxu0 %v1375_v3  ;;  %v1067_v0 = vunpack.c.h.bf16 %v1126_v51  ;;  %v1070_v1 = vunpack.c.l.bf16 %v1127_v52  ;;  %v1071_v2 = vunpack.c.h.bf16 %v1127_v52  ;;  %v1074_v4 = vunpack.c.l.bf16 %v1128_v56 }
  0x1a   : > { %v1075_v5 = vunpack.c.h.bf16 %v1128_v56  ;;  %v1078_v9 = vunpack.c.l.bf16 %v1129_v61  ;;  %v1079_v10 = vunpack.c.h.bf16 %v1129_v61  ;;  %v1082_v11 = vunpack.c.l.bf16 %v1130_v62  ;;  %v1017_v56 = vld [vmem:[%s1684_s4] ss:$0 sm:$0xff] }
  0x1b   : > { %v1083_v12 = vunpack.c.h.bf16 %v1130_v62 }
  0x1c   : > { %1204 = vmatpush3.bf16.msra.mxu0 %v1203_v31 }
  0x1d   : > { %1205 = vmatprep.subr.bf16.mxu0 %v1375_v3 }
  0x20   : > { %1207 = vmatpush3.bf16.msra.mxu0 %v1206_v34 }
  0x21   : > { %1208 = vmatprep.subr.bf16.mxu0 %v1375_v3  ;;  %v1266_v40 = vpop.eup %1265 }
  0x22   : > { %v474_v42 = vadd.f32 1.0, %v1266_v40 }
  0x24   : > { %1210 = vmatpush3.bf16.msra.mxu0 %v1209_v37  ;;  %1267 = vrcp.f32 %v474_v42 }
  0x25   : > { %1211 = vmatprep.subr.bf16.mxu0 %v1375_v3 }
  0x28   : > { %1213 = vmatpush3.bf16.msra.mxu0 %v1212_v41 }
  0x2b   : > { %1188 = vmatmul.mubr.f32.vlgmr.msra.gmra.mrb[0].mxu0 %v376_v43 }
  0x2e   : > { %v1268_v44 = vpop.eup %1267 }
  0x2f   : > { %v476_v45 = vmul.f32 %v1268_v44, %v470_v24 }
  0x31   : > { %1015 = vmatmul.mubr.msk.f32.vlgmr.msra.gmra.mrb[0].mxu1 %vm497_vm1, %v476_v45 }
  0xfe   : > { %v459_v3 = vpop.f32.mrb[0].mxu0 }
  0xff   : > { %v463_v6 = vmul.f32 %v459_v3, %v459_v3  ;;  %v607_v7 = vrot.slane %v459_v3, %v489_v53  ;;  %v1189_v8 = vpop.f32.mrb[1].mxu0 }
 0x101   : > { %v465_v13 = vrot.slane %v463_v6, 7  ;;  %v608_v14 = vsub.f32 %v1054_v54, %v607_v7  ;;  %v609_v15 = vsub.f32 %v1055_v55, %v607_v7  ;;  %v610_v16 = vsub.f32 %v1058_v57, %v607_v7 }
 0x102   : > { %v611_v17 = vsub.f32 %v1059_v58, %v607_v7  ;;  %v612_v18 = vsub.f32 %v1062_v59, %v607_v7  ;;  %v613_v19 = vsub.f32 %v1063_v60, %v607_v7  ;;  %v614_v20 = vsub.f32 %v1066_v63, %v607_v7 }
 0x103   : > { %v467_v21 = vsub.f32 %v459_v3, %v465_v13  ;;  %v615_v22 = vsub.f32 %v1067_v0, %v607_v7  ;;  %v616_v23 = vsub.f32 %v1070_v1, %v607_v7  ;;  %v617_v24 = vsub.f32 %v1071_v2, %v607_v7 }
 0x104   : > { %v618_v25 = vsub.f32 %v1074_v4, %v607_v7  ;;  %v619_v26 = vsub.f32 %v1075_v5, %v607_v7  ;;  %v620_v27 = vsub.f32 %v1078_v9, %v607_v7  ;;  %v621_v28 = vsub.f32 %v1079_v10, %v607_v7  ;;  %v567_v33 = vpop.f32.mrb[0].mxu1 }
 0x105   : > { %v468_v29 = vadd.f32 1e-05, %v467_v21  ;;  %v622_v30 = vsub.f32 %v1082_v11, %v607_v7  ;;  %v623_v31 = vsub.f32 %v1083_v12, %v607_v7  ;;  %v569_v34 = vpop.f32.mrb[1].mxu1  ;;  %v568_v37 = vadd.f32 %v567_v33, %v490_v35 }
 0x106   : > { %v570_v42 = vadd.f32 %v569_v34, %v494_v38 }
 0x107   : > { %1269 = vrsqrt.f32 %v468_v29  ;;  %v675_v41 = vadd.f32 1.0, %v568_v37 }
 0x108   : > { %v1565_v46 = vrot.slane %v570_v42, %v489_v53 }
 0x109   : > { %v679_v45 = vrot.slane %v675_v41, %v489_v53 }
 0x111   : > { %v1270_v40 = vpop.eup %1269 }
 0x112   : > { %v631_v43 = vmul.f32 %v1270_v40, %v1016_v39 }
 0x114   : > { %v635_v44 = vrot.slane %v631_v43, %v493_v36 }
 0x116   : > { %v636_v48 = vmul.f32 %v635_v44, %v608_v14  ;;  %v637_v49 = vmul.f32 %v635_v44, %v609_v15  ;;  %v638_v50 = vmul.f32 %v635_v44, %v610_v16  ;;  %v639_v51 = vmul.f32 %v635_v44, %v611_v17 }
 0x117   : > { %v640_v52 = vmul.f32 %v635_v44, %v612_v18  ;;  %v641_v47 = vmul.f32 %v635_v44, %v613_v19  ;;  %v642_v54 = vmul.f32 %v635_v44, %v614_v20  ;;  %v643_v55 = vmul.f32 %v635_v44, %v615_v22 }
 0x118   : > { %v644_v57 = vmul.f32 %v635_v44, %v616_v23  ;;  %v645_v58 = vmul.f32 %v635_v44, %v617_v24  ;;  %v646_v59 = vmul.f32 %v635_v44, %v618_v25  ;;  %v647_v60 = vmul.f32 %v635_v44, %v619_v26 }
 0x119   : > { %v648_v61 = vmul.f32 %v635_v44, %v620_v27  ;;  %v649_v62 = vmul.f32 %v635_v44, %v621_v28  ;;  %v650_v53 = vmul.f32 %v635_v44, %v622_v30  ;;  %v651_v63 = vmul.f32 %v635_v44, %v623_v31 }
 0x11a   : > { %v659_v0 = vadd.f32 %v1017_v56, %v636_v48  ;;  %v660_v1 = vadd.f32 %v1017_v56, %v637_v49  ;;  %v661_v2 = vadd.f32 %v1017_v56, %v638_v50  ;;  %v662_v3 = vadd.f32 %v1017_v56, %v639_v51 }
 0x11b   : > { %v663_v4 = vadd.f32 %v1017_v56, %v640_v52  ;;  %v664_v5 = vadd.f32 %v1017_v56, %v641_v47  ;;  %v665_v6 = vadd.f32 %v1017_v56, %v642_v54  ;;  %v666_v7 = vadd.f32 %v1017_v56, %v643_v55 }
 0x11c   : > { %v667_v8 = vadd.f32 %v1017_v56, %v644_v57  ;;  %v668_v9 = vadd.f32 %v1017_v56, %v645_v58  ;;  %v669_v10 = vadd.f32 %v1017_v56, %v646_v59  ;;  %v670_v11 = vadd.f32 %v1017_v56, %v647_v60 }
 0x11d   : > { %v671_v12 = vadd.f32 %v1017_v56, %v648_v61  ;;  %v672_v13 = vadd.f32 %v1017_v56, %v649_v62  ;;  %v673_v14 = vadd.f32 %v1017_v56, %v650_v53  ;;  %v674_v15 = vadd.f32 %v1017_v56, %v651_v63 }
 0x11e   : > { %v680_v16 = vmul.f32 %v679_v45, %v659_v0  ;;  %v681_v17 = vmul.f32 %v679_v45, %v660_v1  ;;  %v682_v18 = vmul.f32 %v679_v45, %v661_v2  ;;  %v683_v19 = vmul.f32 %v679_v45, %v662_v3 }
 0x11f   : > { %v684_v20 = vmul.f32 %v679_v45, %v663_v4  ;;  %v685_v21 = vmul.f32 %v679_v45, %v664_v5  ;;  %v686_v22 = vmul.f32 %v679_v45, %v665_v6  ;;  %v687_v23 = vmul.f32 %v679_v45, %v666_v7 }
 0x120   : > { %v688_v24 = vmul.f32 %v679_v45, %v667_v8  ;;  %v689_v25 = vmul.f32 %v679_v45, %v668_v9  ;;  %v690_v26 = vmul.f32 %v679_v45, %v669_v10  ;;  %v691_v27 = vmul.f32 %v679_v45, %v670_v11 }
 0x121   : > { %v692_v28 = vmul.f32 %v679_v45, %v671_v12  ;;  %v693_v29 = vmul.f32 %v679_v45, %v672_v13  ;;  %v694_v30 = vmul.f32 %v679_v45, %v673_v14  ;;  %v695_v31 = vmul.f32 %v679_v45, %v674_v15 }
 0x122   : > { %v1571_v32 = vadd.f32 %v1565_v46, %v680_v16  ;;  %v1574_v33 = vadd.f32 %v1565_v46, %v681_v17  ;;  %v1577_v34 = vadd.f32 %v1565_v46, %v682_v18  ;;  %v1580_v35 = vadd.f32 %v1565_v46, %v683_v19 }
 0x123   : > { %v1583_v36 = vadd.f32 %v1565_v46, %v684_v20  ;;  %v1586_v37 = vadd.f32 %v1565_v46, %v685_v21  ;;  %v1589_v38 = vadd.f32 %v1565_v46, %v686_v22  ;;  %v1592_v39 = vadd.f32 %v1565_v46, %v687_v23 }
 0x124   : > { %v1595_v40 = vadd.f32 %v1565_v46, %v688_v24  ;;  %v1598_v41 = vadd.f32 %v1565_v46, %v689_v25  ;;  %v1601_v42 = vadd.f32 %v1565_v46, %v690_v26  ;;  %v1604_v43 = vadd.f32 %v1565_v46, %v691_v27 }
 0x125   : > { %v1607_v44 = vadd.f32 %v1565_v46, %v692_v28  ;;  %v1610_v45 = vadd.f32 %v1565_v46, %v693_v29  ;;  %v1613_v48 = vadd.f32 %v1565_v46, %v694_v30  ;;  %v1616_v49 = vadd.f32 %v1565_v46, %v695_v31 }
 0x126   : > { %v716_v50 = vsub.f32 0.0, %v1571_v32  ;;  %v717_v51 = vsub.f32 0.0, %v1574_v33  ;;  %v718_v52 = vsub.f32 0.0, %v1577_v34  ;;  %v719_v47 = vsub.f32 0.0, %v1580_v35 }
 0x127   : > { %v720_v54 = vsub.f32 0.0, %v1583_v36  ;;  %v721_v55 = vsub.f32 0.0, %v1586_v37  ;;  %v722_v56 = vsub.f32 0.0, %v1589_v38  ;;  %v723_v46 = vsub.f32 0.0, %v1592_v39 }
 0x128   : > { %v732_v57 = vmul.f32 1.442695, %v716_v50  ;;  %v734_v58 = vmul.f32 1.442695, %v717_v51  ;;  %v736_v59 = vmul.f32 1.442695, %v718_v52 }
 0x129   : > { %v738_v60 = vmul.f32 1.442695, %v719_v47  ;;  %v724_v61 = vsub.f32 0.0, %v1595_v40  ;;  %v740_v62 = vmul.f32 1.442695, %v720_v54  ;;  %v725_v53 = vsub.f32 0.0, %v1598_v41 }
 0x12a   : > { %1271 = vpow2.f32 %v732_v57  ;;  %v742_v63 = vmul.f32 1.442695, %v721_v55  ;;  %v726_v0 = vsub.f32 0.0, %v1601_v42  ;;  %v744_v1 = vmul.f32 1.442695, %v722_v56 }
 0x12b   : > { %1273 = vpow2.f32 %v734_v58  ;;  %v727_v2 = vsub.f32 0.0, %v1604_v43  ;;  %v746_v3 = vmul.f32 1.442695, %v723_v46  ;;  %v728_v4 = vsub.f32 0.0, %v1607_v44 }
 0x12c   : > { %1275 = vpow2.f32 %v736_v59  ;;  %v748_v5 = vmul.f32 1.442695, %v724_v61  ;;  %v729_v6 = vsub.f32 0.0, %v1610_v45  ;;  %v750_v7 = vmul.f32 1.442695, %v725_v53 }
 0x12d   : > { %1277 = vpow2.f32 %v738_v60  ;;  %v730_v8 = vsub.f32 0.0, %v1613_v48  ;;  %v752_v9 = vmul.f32 1.442695, %v726_v0  ;;  %v731_v10 = vsub.f32 0.0, %v1616_v49 }
 0x12e   : > { %1279 = vpow2.f32 %v740_v62  ;;  %v754_v11 = vmul.f32 1.442695, %v727_v2  ;;  %v756_v12 = vmul.f32 1.442695, %v728_v4  ;;  %v758_v13 = vmul.f32 1.442695, %v729_v6 }
 0x12f   : > { %1281 = vpow2.f32 %v742_v63  ;;  %v760_v15 = vmul.f32 1.442695, %v730_v8  ;;  %v762_v17 = vmul.f32 1.442695, %v731_v10 }
 0x130   : > { %1283 = vpow2.f32 %v744_v1 }
 0x131   : > { %1285 = vpow2.f32 %v746_v3 }
 0x132   : > { %1287 = vpow2.f32 %v748_v5 }
 0x133   : > { %1289 = vpow2.f32 %v750_v7 }
 0x134   : > { %v1272_v14 = vpop.eup %1271  ;;  %1291 = vpow2.f32 %v752_v9 }
 0x135   : > { %v1274_v16 = vpop.eup %1273  ;;  %1293 = vpow2.f32 %v754_v11  ;;  %v764_v19 = vadd.f32 1.0, %v1272_v14 }
 0x136   : > { %v1276_v18 = vpop.eup %1275  ;;  %1295 = vpow2.f32 %v756_v12  ;;  %v765_v21 = vadd.f32 1.0, %v1274_v16 }
 0x137   : > { %v1278_v20 = vpop.eup %1277  ;;  %1297 = vpow2.f32 %v758_v13  ;;  %v766_v23 = vadd.f32 1.0, %v1276_v18 }
 0x138   : > { %v1280_v22 = vpop.eup %1279  ;;  %1299 = vpow2.f32 %v760_v15  ;;  %v767_v25 = vadd.f32 1.0, %v1278_v20 }
 0x139   : > { %v1282_v24 = vpop.eup %1281  ;;  %1301 = vpow2.f32 %v762_v17  ;;  %v768_v27 = vadd.f32 1.0, %v1280_v22 }
 0x13a   : > { %v1284_v26 = vpop.eup %1283  ;;  %1303 = vrcp.f32 %v764_v19  ;;  %v769_v29 = vadd.f32 1.0, %v1282_v24 }
 0x13b   : > { %v1286_v28 = vpop.eup %1285  ;;  %1305 = vrcp.f32 %v765_v21  ;;  %v770_v31 = vadd.f32 1.0, %v1284_v26 }
 0x13c   : > { %v1288_v30 = vpop.eup %1287  ;;  %1307 = vrcp.f32 %v766_v23  ;;  %v771_v51 = vadd.f32 1.0, %v1286_v28 }
 0x13d   : > { %v1290_v50 = vpop.eup %1289  ;;  %1309 = vrcp.f32 %v767_v25  ;;  %v772_v47 = vadd.f32 1.0, %v1288_v30 }
 0x13e   : > { %v1292_v52 = vpop.eup %1291  ;;  %1311 = vrcp.f32 %v768_v27  ;;  %v773_v55 = vadd.f32 1.0, %v1290_v50 }
 0x13f   : > { %v1294_v54 = vpop.eup %1293  ;;  %1313 = vrcp.f32 %v769_v29  ;;  %v774_v57 = vadd.f32 1.0, %v1292_v52 }
 0x140   : > { %v1296_v56 = vpop.eup %1295  ;;  %1315 = vrcp.f32 %v770_v31  ;;  %v775_v59 = vadd.f32 1.0, %v1294_v54 }
 0x141   : > { %v1298_v58 = vpop.eup %1297  ;;  %1317 = vrcp.f32 %v771_v51  ;;  %v776_v60 = vadd.f32 1.0, %v1296_v56 }
 0x142   : > { %v1300_v46 = vpop.eup %1299  ;;  %1319 = vrcp.f32 %v772_v47  ;;  %v777_v62 = vadd.f32 1.0, %v1298_v58 }
 0x143   : > { %v1302_v61 = vpop.eup %1301  ;;  %1321 = vrcp.f32 %v773_v55  ;;  %v778_v63 = vadd.f32 1.0, %v1300_v46 }
 0x144   : > { %v1304_v53 = vpop.eup %1303  ;;  %1323 = vrcp.f32 %v774_v57  ;;  %v779_v1 = vadd.f32 1.0, %v1302_v61 }
 0x145   : > { %v1306_v0 = vpop.eup %1305  ;;  %1325 = vrcp.f32 %v775_v59  ;;  %v796_v2 = vmul.f32 %v1304_v53, %v1571_v32 }
 0x146   : > { %v1308_v3 = vpop.eup %1307  ;;  %1327 = vrcp.f32 %v776_v60  ;;  %v797_v4 = vmul.f32 %v1306_v0, %v1574_v33 }
 0x147   : > { %v1310_v5 = vpop.eup %1309  ;;  %1329 = vrcp.f32 %v777_v62  ;;  %v798_v6 = vmul.f32 %v1308_v3, %v1577_v34 }
 0x148   : > { %v1312_v7 = vpop.eup %1311  ;;  %1331 = vrcp.f32 %v778_v63  ;;  %v799_v32 = vmul.f32 %v1310_v5, %v1580_v35  ;;  %v1087_v8 = vpack.c.bf16 %v797_v4, %v796_v2 }
 0x149   : > { %v1314_v9 = vpop.eup %1313  ;;  %1333 = vrcp.f32 %v779_v1  ;;  %v800_v33 = vmul.f32 %v1312_v7, %v1583_v36 }
 0x14a   : > { %v1316_v10 = vpop.eup %1315  ;;  %v801_v11 = vmul.f32 %v1314_v9, %v1586_v37  ;;  %1088 = vst [vmem:[%s1641_s20] sm:$0xff] %v1087_v8   ;;  %v1092_v12 = vpack.c.bf16 %v799_v32, %v798_v6 }
 0x14b   : > { %v1318_v13 = vpop.eup %1317  ;;  %v802_v34 = vmul.f32 %v1316_v10, %v1589_v38 }
 0x14c   : > { %v1320_v14 = vpop.eup %1319  ;;  %v803_v15 = vmul.f32 %v1318_v13, %v1592_v39  ;;  %1131 = vst [vmem:[%s1641_s20 + $0x8] sm:$0xff] %v1092_v12   ;;  %v1097_v35 = vpack.c.bf16 %v801_v11, %v800_v33 }
 0x14d   : > { %v1322_v16 = vpop.eup %1321  ;;  %v804_v17 = vmul.f32 %v1320_v14, %v1595_v40 }
 0x14e   : > { %v1324_v18 = vpop.eup %1323  ;;  %v805_v36 = vmul.f32 %v1322_v16, %v1598_v41  ;;  %1132 = vst [vmem:[%s1641_s20 + $0x10] sm:$0xff] %v1097_v35   ;;  %v1102_v37 = vpack.c.bf16 %v803_v15, %v802_v34 }
 0x14f   : > { %v1326_v19 = vpop.eup %1325  ;;  %v806_v20 = vmul.f32 %v1324_v18, %v1601_v42 }
 0x150   : > { %v1328_v38 = vpop.eup %1327  ;;  %v807_v21 = vmul.f32 %v1326_v19, %v1604_v43  ;;  %1133 = vst [vmem:[%s1641_s20 + $0x18] sm:$0xff] %v1102_v37   ;;  %v1107_v39 = vpack.c.bf16 %v805_v36, %v804_v17 }
 0x151   : > { %v1330_v22 = vpop.eup %1329  ;;  %v808_v23 = vmul.f32 %v1328_v38, %v1607_v44 }
 0x152   : > { %v1332_v40 = vpop.eup %1331  ;;  %v809_v24 = vmul.f32 %v1330_v22, %v1610_v45  ;;  %1134 = vst [vmem:[%s1641_s20 + $0x20] sm:$0xff] %v1107_v39   ;;  %v1112_v41 = vpack.c.bf16 %v807_v21, %v806_v20 }
 0x153   : > { %v1334_v25 = vpop.eup %1333  ;;  %v810_v26 = vmul.f32 %v1332_v40, %v1613_v48 }
 0x154   : > { %v811_v42 = vmul.f32 %v1334_v25, %v1616_v49  ;;  %1135 = vst [vmem:[%s1641_s20 + $0x28] sm:$0xff] %v1112_v41   ;;  %v1117_v27 = vpack.c.bf16 %v809_v24, %v808_v23 }
 0x156   : > { %1136 = vst [vmem:[%s1641_s20 + $0x30] sm:$0xff] %v1117_v27   ;;  %v1122_v43 = vpack.c.bf16 %v811_v42, %v810_v26 }
 0x158   : > { %1137 = vst [vmem:[%s1641_s20 + $0x38] sm:$0xff] %v1122_v43  }
 0x159 PF: > { %s18_s9 = sadd.s32 1, %s1373_s9   ;;  %s1689_s27 = smov %s1365_s29 }
 0x15a   : > { %p15_p7 = scmp.ge.s32.totalorder %s18_s9, 6   ;;  %s1690_s28 = smov %s1369_s30 }
 0x15b   : > { %s1691_s29 = smov %s1694_s10  ;;  %s1692_s30 = smov %s1698_s11 }
 0x15c   :  { %17 = sbr.rel (!%p15_p7) target bundleno = 3 (0x3), region = 88 }

// kernel: _lambda_.7
= control target key start
LH: loop header
LB: loop body
LE: loop exit
PB: predicated region body
PF: predicated region fallthrough
CT: control target
= control target key end

     0   :  { %s1488_s27 = smov 0   ;;  %s1490_s28 = smov 0   ;;  %s1869_s0 = inlined_call_operand.vmem [shape: bf16[2,256,128], index: 0, kind: input, shape index: {}]   ;;  %s1870_s1 = inlined_call_operand.vmem [shape: f32[2,2,128], index: 1, kind: input, shape index: {}]   ;;  %s1871_s2 = inlined_call_operand.vmem [shape: f32[128,128], index: 2, kind: input, shape index: {}]   ;;  %s1872_s3 = inlined_call_operand.vmem [shape: f32[1,128], index: 3, kind: input, shape index: {}]   ;;  %s1873_s4 = inlined_call_operand.vmem [shape: f32[1,128], index: 4, kind: input, shape index: {}]   ;;  %s1874_s5 = inlined_call_operand.vmem [shape: bf16[2,256,128], index: 5, kind: input, shape index: {}]   ;;  %s1875_s6 = inlined_call_operand.vmem [shape: bf16[128,128], index: 6, kind: input, shape index: {}]   ;;  %s1876_s7 = inlined_call_operand.vmem [shape: f32[1,128], index: 7, kind: input, shape index: {}]   ;;  %s1877_s8 = inlined_call_operand.vmem [shape: f32[2,256,128], index: 8, kind: output, shape index: {}]  }
   0x1   :  { %s1492_s29 = smov 0   ;;  %s1494_s30 = smov 0  }
   0x2   :  { %s1496_s9 = smov 0  }
   0x3 LB: > { %s27_s10 = sadd.s32 1, %s1430_s29  ;;  %s30_s11 = sadd.s32 1, %s1434_s30  ;;  %s1438_s9 = sphi %s1496_s9, %s18_s9   ;;  %s1434_s30 = sphi %s1494_s30, %s1881_s30   ;;  %s1430_s29 = sphi %s1492_s29, %s1880_s29   ;;  %s1426_s28 = sphi %s1490_s28, %s1879_s28   ;;  %s1422_s27 = sphi %s1488_s27, %s1878_s27  }
   0x4   : > { %p28_p0 = scmp.ge.s32.totalorder %s27_s10, 2  ;;  %p1080_p1 = scmp.ge.s32.totalorder %s1438_s9, 1 }
   0x5   : > { %p309_p2 = scmp.lt.s32.totalorder %s1438_s9, 5 }
   0x6   : > { %s1883_s10 = smov (%p28_p0, %s27_s10), 0  ;;  %s1885_s11 = smov (!%p28_p0, %s30_s11), %s1434_s30 }
   0x7   : > { %p310_p3 = pnand %p1080_p1, %p309_p2  ;;  %p32_p4 = scmp.ge.s32.totalorder %s1885_s11, 2 }
   0x8   : > { %v400_v0 = vld [vmem:[%s1871_s2] sm:$0xff] (!%p310_p3)  ;;  %v401_v1 = vld [vmem:[%s1871_s2 + $0x8] sm:$0xff] (!%p310_p3)  ;;  %v402_v2 = vld [vmem:[%s1871_s2 + $0x10] sm:$0xff] (!%p310_p3)  ;;  %v1440_v3 = vmov (!%p310_p3), 0.0|0.0   ;;  %vm1441_vm0 = vmmov (!%p310_p3), 0   ;;  %v1442_v6 = vmov (!%p310_p3), 0.0   ;;  %v525_v43 = vlaneseq (!%p310_p3) }
   0x9   : > { %s1887_s11 = smov (%p32_p4, %s1885_s11), 0  ;;  %313 = sbr.rel (%p310_p3) target bundleno = 343 (0x157), region = 52 }
   0xa   : > { %1251 = vmatprep.subr.bf16.mxu0 (!%p310_p3), %v1440_v3  ;;  %v1252_v4 = vpack.c.bf16 (!%p310_p3), %v401_v1, %v400_v0  ;;  %v403_v5 = vld [vmem:[%s1871_s2 + $0x18] sm:$0xff] (!%p310_p3)  ;;  %1216 = vmatprep.mubr.msk.f32.mxu0 (!%p310_p3), %vm1441_vm0, %v1442_v6  ;;  %s1081_s20 = sshll.u32 (!%p310_p3), %s1422_s27, 4  ;;  %p365_p5 = scmp.lt.s32.totalorder (!%p310_p3), %s1426_s28, 1  ;;  %v404_v8 = vld [vmem:[%s1871_s2 + $0x20] sm:$0xff] (!%p310_p3)  ;;  %v405_v9 = vld [vmem:[%s1871_s2 + $0x28] sm:$0xff] (!%p310_p3)  ;;  %v1635_v44 = vshrl.u32 (!%p310_p3), %v525_v43, 7 }
   0xb   : > { %p367_p6 = scmp.lt.s32.totalorder (!%p310_p3), %s1081_s20, 31  ;;  %v1255_v7 = vpack.c.bf16 (!%p310_p3), %v403_v5, %v402_v2  ;;  %v1318_v10 = vld [vmem:[%s1875_s6] sm:$0xff] (!%p310_p3)   ;;  %v1258_v11 = vpack.c.bf16 (!%p310_p3), %v405_v9, %v404_v8  ;;  %v406_v12 = vld [vmem:[%s1871_s2 + $0x30] sm:$0xff] (!%p310_p3)  ;;  %v407_v13 = vld [vmem:[%s1871_s2 + $0x38] sm:$0xff] (!%p310_p3) }
   0xc   : > { %1253 = vmatpush3.bf16.msra.mxu0 (!%p310_p3), %v1252_v4  ;;  %1219 = vmatprep.subr.bf16.mxu1 (!%p310_p3), %v1318_v10  ;;  %v1319_v14 = vld [vmem:[%s1875_s6 + $0x8] sm:$0xff] (!%p310_p3)   ;;  %v1320_v15 = vld [vmem:[%s1875_s6 + $0x10] sm:$0xff] (!%p310_p3)   ;;  %v1261_v16 = vpack.c.bf16 (!%p310_p3), %v407_v13, %v406_v12  ;;  %v408_v17 = vld [vmem:[%s1871_s2 + $0x40] sm:$0xff] (!%p310_p3)  ;;  %v527_v49 = vsub.s32 (!%p310_p3), 0, %v1635_v44 }
   0xd   : > { %1254 = vmatprep.subr.bf16.mxu0 (!%p310_p3), %v1440_v3  ;;  %1220 = vmatpush3.bf16.msra.mxu1 (!%p310_p3), %v1318_v10  ;;  %v409_v18 = vld [vmem:[%s1871_s2 + $0x48] sm:$0xff] (!%p310_p3)  ;;  %v1321_v19 = vld [vmem:[%s1875_s6 + $0x18] sm:$0xff] (!%p310_p3)   ;;  %v410_v22 = vld [vmem:[%s1871_s2 + $0x50] sm:$0xff] (!%p310_p3) }
   0xe   : > { %1221 = vmatprep.subr.bf16.mxu1 (!%p310_p3), %v1319_v14  ;;  %v1264_v21 = vpack.c.bf16 (!%p310_p3), %v409_v18, %v408_v17  ;;  %v411_v23 = vld [vmem:[%s1871_s2 + $0x58] sm:$0xff] (!%p310_p3)  ;;  %v1322_v24 = vld [vmem:[%s1875_s6 + $0x20] sm:$0xff] (!%p310_p3)   ;;  %v413_v27 = vld [vmem:[%s1871_s2 + $0x68] sm:$0xff] (!%p310_p3) }
   0xf   : > { %v1267_v25 = vpack.c.bf16 (!%p310_p3), %v411_v23, %v410_v22  ;;  %v412_v26 = vld [vmem:[%s1871_s2 + $0x60] sm:$0xff] (!%p310_p3)  ;;  %v1323_v28 = vld [vmem:[%s1875_s6 + $0x28] sm:$0xff] (!%p310_p3)   ;;  %v414_v30 = vld [vmem:[%s1871_s2 + $0x70] sm:$0xff] (!%p310_p3) }
  0x10   : > { %s1889_s28 = smov (!%p365_p5, %s1426_s28), 1  ;;  %s1891_s20 = smov (!%p367_p6, %s1081_s20), 31  ;;  %1256 = vmatpush3.bf16.msra.mxu0 %v1255_v7  ;;  %v1270_v29 = vpack.c.bf16 %v413_v27, %v412_v26  ;;  %v415_v31 = vld [vmem:[%s1871_s2 + $0x78] sm:$0xff]  ;;  %v1324_v32 = vld [vmem:[%s1875_s6 + $0x30] sm:$0xff]  }
  0x11   : > { %s1082_s27 = sshll.u32 %s1889_s28, 5  ;;  %1257 = vmatprep.subr.bf16.mxu0 %v1440_v3  ;;  %1222 = vmatpush3.bf16.msra.mxu1 %v1319_v14  ;;  %v1273_v33 = vpack.c.bf16 %v415_v31, %v414_v30  ;;  %v1325_v34 = vld [vmem:[%s1875_s6 + $0x38] sm:$0xff]  }
  0x12   : > { %s1551_s12 = sadd.s32 %s1082_s27, %s1891_s20  ;;  %1223 = vmatprep.subr.bf16.mxu1 %v1320_v15  ;;  %s1084_s20 = sshll.u32 %s1889_s28, 1 }
  0x13   : > { %s1083_s19 = sshll.u32 %s1551_s12, 2  ;;  %s377_s25 = scalar_lea.vmem %s1870_s1, %s1084_s20 }
  0x14   : > { %1259 = vmatpush3.bf16.msra.mxu0 %v1258_v11  ;;  %s1575_s26 = scalar_lea.vmem %s1874_s5, %s1083_s19  ;;  %v399_v35 = vld [vmem:[%s377_s25] sm:$0x3]  ;;  %s372_s15 = scalar_lea.vmem %s1869_s0, %s1083_s19 }
  0x15   : > { %1260 = vmatprep.subr.bf16.mxu0 %v1440_v3  ;;  %v1326_v20 = vld [vmem:[%s1575_s26] sm:$0xff]   ;;  %1224 = vmatpush3.bf16.msra.mxu1 %v1320_v15  ;;  %v1327_v36 = vld [vmem:[%s1575_s26 + $0x8] sm:$0xff]   ;;  %v1328_v37 = vld [vmem:[%s1575_s26 + $0x10] sm:$0xff]   ;;  %s1090_s21 = sshll.u32 %s1551_s12, 3 }
  0x16   : > { %1225 = vmatprep.subr.bf16.mxu1 %v1321_v19  ;;  %1235 = vmatprep.mubr.bf16.mxu1 %v1326_v20  ;;  %v1329_v38 = vld [vmem:[%s1575_s26 + $0x18] sm:$0xff]   ;;  %v1330_v39 = vld [vmem:[%s1575_s26 + $0x20] sm:$0xff]   ;;  %v1331_v40 = vld [vmem:[%s1575_s26 + $0x28] sm:$0xff]   ;;  %s1791_s12 = scalar_lea.vmem %s1877_s8, %s1090_s21 }
  0x17   : > { %v1332_v41 = vld [vmem:[%s1575_s26 + $0x30] sm:$0xff]   ;;  %v1333_v42 = vld [vmem:[%s1575_s26 + $0x38] sm:$0xff]   ;;  %v1144_v45 = vld [vmem:[%s372_s15 + $0x8] sm:$0xff]  }
  0x18   : > { %1262 = vmatpush3.bf16.msra.mxu0 %v1261_v16  ;;  %v1113_v46 = vld [vmem:[%s372_s15] sm:$0xff]   ;;  %v1146_v47 = vld [vmem:[%s372_s15 + $0x18] sm:$0xff]   ;;  %v1145_v48 = vld [vmem:[%s372_s15 + $0x10] sm:$0xff]   ;;  %v1118_v52 = vunpack.c.l.bf16 %v1144_v45  ;;  %v1119_v54 = vunpack.c.h.bf16 %v1144_v45 }
  0x19   : > { %1263 = vmatprep.subr.bf16.mxu0 %v1440_v3  ;;  %1226 = vmatpush3.bf16.msra.mxu1 %v1321_v19  ;;  %v1148_v50 = vld [vmem:[%s372_s15 + $0x28] sm:$0xff]   ;;  %v1147_v51 = vld [vmem:[%s372_s15 + $0x20] sm:$0xff]   ;;  %v1114_v53 = vunpack.c.l.bf16 %v1113_v46  ;;  %v1115_v55 = vunpack.c.h.bf16 %v1113_v46  ;;  %v1126_v56 = vunpack.c.l.bf16 %v1146_v47  ;;  %v1122_v57 = vunpack.c.l.bf16 %v1145_v48  ;;  %v1150_v58 = vld [vmem:[%s372_s15 + $0x38] sm:$0xff]  }
  0x1a   : > { %1227 = vmatprep.subr.bf16.mxu1 %v1322_v24  ;;  %v1149_v59 = vld [vmem:[%s372_s15 + $0x30] sm:$0xff]   ;;  %v1127_v61 = vunpack.c.h.bf16 %v1146_v47  ;;  %v1123_v62 = vunpack.c.h.bf16 %v1145_v48  ;;  %v1134_v63 = vunpack.c.l.bf16 %v1148_v50  ;;  %v1130_v0 = vunpack.c.l.bf16 %v1147_v51  ;;  %v1679_v45 = vld [vmem:[%s1873_s4] ss:$0 sm:$0xff] }
  0x1b   : > { %v1135_v4 = vunpack.c.h.bf16 %v1148_v50  ;;  %v1131_v5 = vunpack.c.h.bf16 %v1147_v51  ;;  %v1142_v6 = vunpack.c.l.bf16 %v1150_v58  ;;  %v1138_v7 = vunpack.c.l.bf16 %v1149_v59 }
  0x1c   : > { %1265 = vmatpush3.bf16.msra.mxu0 %v1264_v21  ;;  %v1143_v8 = vunpack.c.h.bf16 %v1150_v58  ;;  %v1139_v9 = vunpack.c.h.bf16 %v1149_v59 }
  0x1d   : > { %1266 = vmatprep.subr.bf16.mxu0 %v1440_v3  ;;  %1228 = vmatpush3.bf16.msra.mxu1 %v1322_v24 }
  0x1e   : > { %1229 = vmatprep.subr.bf16.mxu1 %v1323_v28 }
  0x20   : > { %1268 = vmatpush3.bf16.msra.mxu0 %v1267_v25 }
  0x21   : > { %1269 = vmatprep.subr.bf16.mxu0 %v1440_v3  ;;  %1230 = vmatpush3.bf16.msra.mxu1 %v1323_v28 }
  0x22   : > { %1231 = vmatprep.subr.bf16.mxu1 %v1324_v32 }
  0x24   : > { %1271 = vmatpush3.bf16.msra.mxu0 %v1270_v29 }
  0x25   : > { %1272 = vmatprep.subr.bf16.mxu0 %v1440_v3  ;;  %1232 = vmatpush3.bf16.msra.mxu1 %v1324_v32 }
  0x26   : > { %1233 = vmatprep.subr.bf16.mxu1 %v1325_v34 }
  0x28   : > { %1274 = vmatpush3.bf16.msra.mxu0 %v1273_v33 }
  0x29   : > { %1234 = vmatpush3.bf16.msra.mxu1 %v1325_v34 }
  0x2b   : > { %1217 = vmatmul.mubr.f32.vlgmr.msra.gmra.mrb[0].mxu0 %v399_v35 }
  0x2c   : > { %1236 = vmatmul.mubr.bf16.vlgmr.msra.gmra.mrb[0].mxu1 %v1327_v36 }
  0x2d   : > { %1239 = vmatprep.mubr.bf16.mxu1 %v1328_v37  ;;  %v1091_v37 = vld [vmem:[%s1872_s3] ss:$0 sm:$0xff] }
  0x34   : > { %1240 = vmatmul.mubr.bf16.gmra.mrb[4].mxu1 %v1329_v38  ;;  %v555_v38 = vsub.s32 1, %v1635_v44 }
  0x35   : > { %1243 = vmatprep.mubr.bf16.mxu1 %v1330_v39 }
  0x3c   : > { %1244 = vmatmul.mubr.bf16.gmra.mrb[8].mxu1 %v1331_v40 }
  0x3d   : > { %1247 = vmatprep.mubr.bf16.mxu1 %v1332_v41 }
  0x44   : > { %1248 = vmatmul.mubr.bf16.gmra.mrb[12].mxu1 %v1333_v42 }
  0xfe   : > { %v482_v60 = vpop.f32.mrb[0].mxu0 }
  0xff   : > { %v486_v1 = vmul.f32 %v482_v60, %v482_v60  ;;  %v528_v2 = vrot.slane %v482_v60, %v527_v49  ;;  %v1218_v3 = vpop.f32.mrb[1].mxu0  ;;  %v1638_v19 = vpop.f32.mrb[0].mxu1 }
 0x100   : > { %v1640_v23 = vpop.f32.mrb[1].mxu1 }
 0x101   : > { %v488_v10 = vrot.slane %v486_v1, 7  ;;  %v531_v11 = vsub.f32 %v1118_v52, %v528_v2  ;;  %v529_v12 = vsub.f32 %v1114_v53, %v528_v2  ;;  %v532_v13 = vsub.f32 %v1119_v54, %v528_v2  ;;  %v1648_v28 = vpop.f32.mrb[2].mxu1 }
 0x102   : > { %v530_v14 = vsub.f32 %v1115_v55, %v528_v2  ;;  %v535_v15 = vsub.f32 %v1126_v56, %v528_v2  ;;  %v533_v16 = vsub.f32 %v1122_v57, %v528_v2  ;;  %v536_v17 = vsub.f32 %v1127_v61, %v528_v2  ;;  %v1654_v31 = vpop.f32.mrb[3].mxu1 }
 0x103   : > { %v490_v18 = vsub.f32 %v482_v60, %v488_v10  ;;  %v534_v20 = vsub.f32 %v1123_v62, %v528_v2  ;;  %v539_v21 = vsub.f32 %v1134_v63, %v528_v2  ;;  %v537_v22 = vsub.f32 %v1130_v0, %v528_v2 }
 0x104   : > { %v1642_v24 = vsub.f32 %v1135_v4, %v528_v2  ;;  %v1644_v25 = vsub.f32 %v1131_v5, %v528_v2  ;;  %v1646_v26 = vsub.f32 %v1142_v6, %v528_v2  ;;  %v1650_v29 = vsub.f32 %v1138_v7, %v528_v2 }
 0x105   : > { %v491_v27 = vadd.f32 1e-05, %v490_v18  ;;  %v1652_v30 = vsub.f32 %v1143_v8, %v528_v2  ;;  %v1656_v32 = vsub.f32 %v1139_v9, %v528_v2 }
 0x107   : > { %1334 = vrsqrt.f32 %v491_v27  ;;  %v1658_v33 = vpop.f32.mrb[4].mxu1 }
 0x108   : > { %v1660_v34 = vpop.f32.mrb[5].mxu1 }
 0x109   : > { %v1662_v35 = vpop.f32.mrb[6].mxu1 }
 0x10a   : > { %v1664_v36 = vpop.f32.mrb[7].mxu1 }
 0x10f   : > { %v1670_v41 = vpop.f32.mrb[8].mxu1 }
 0x110   : > { %v1674_v43 = vpop.f32.mrb[9].mxu1 }
 0x111   : > { %v1335_v39 = vpop.eup %1334  ;;  %v1681_v46 = vpop.f32.mrb[10].mxu1 }
 0x112   : > { %v552_v40 = vmul.f32 %v1335_v39, %v1091_v37  ;;  %v1687_v50 = vpop.f32.mrb[11].mxu1 }
 0x114   : > { %v1672_v42 = vrot.slane %v552_v40, %v555_v38 }
 0x116   : > { %v559_v47 = vmul.f32 %v1672_v42, %v531_v11  ;;  %v557_v48 = vmul.f32 %v1672_v42, %v529_v12  ;;  %v560_v44 = vmul.f32 %v1672_v42, %v532_v13  ;;  %v558_v49 = vmul.f32 %v1672_v42, %v530_v14 }
 0x117   : > { %v563_v51 = vmul.f32 %v1672_v42, %v535_v15  ;;  %v561_v52 = vmul.f32 %v1672_v42, %v533_v16  ;;  %v564_v53 = vmul.f32 %v1672_v42, %v536_v17  ;;  %v562_v54 = vmul.f32 %v1672_v42, %v534_v20  ;;  %v1725_v7 = vpop.f32.mrb[12].mxu1 }
 0x118   : > { %v1694_v55 = vadd.f32 %v1679_v45, %v559_v47  ;;  %v1697_v56 = vadd.f32 %v1679_v45, %v557_v48  ;;  %v1700_v57 = vadd.f32 %v1679_v45, %v560_v44  ;;  %v1703_v58 = vadd.f32 %v1679_v45, %v558_v49  ;;  %v1732_v17 = vpop.f32.mrb[13].mxu1 }
 0x119   : > { %v1706_v59 = vadd.f32 %v1679_v45, %v563_v51  ;;  %v1709_v60 = vadd.f32 %v1679_v45, %v561_v52  ;;  %v1712_v61 = vadd.f32 %v1679_v45, %v564_v53  ;;  %v1715_v62 = vadd.f32 %v1679_v45, %v562_v54 }
 0x11a   : > { %v598_v63 = vsub.f32 0.0, %v1694_v55  ;;  %v596_v0 = vsub.f32 0.0, %v1697_v56  ;;  %v599_v1 = vsub.f32 0.0, %v1700_v57  ;;  %v597_v2 = vsub.f32 0.0, %v1703_v58 }
 0x11b   : > { %v602_v3 = vsub.f32 0.0, %v1706_v59  ;;  %v600_v4 = vsub.f32 0.0, %v1709_v60  ;;  %v603_v5 = vsub.f32 0.0, %v1712_v61  ;;  %v601_v6 = vsub.f32 0.0, %v1715_v62 }
 0x11c   : > { %v616_v8 = vmul.f32 1.442695, %v598_v63  ;;  %v612_v9 = vmul.f32 1.442695, %v596_v0  ;;  %v618_v10 = vmul.f32 1.442695, %v599_v1  ;;  %v567_v11 = vmul.f32 %v1672_v42, %v539_v21 }
 0x11d   : > { %v614_v12 = vmul.f32 1.442695, %v597_v2  ;;  %v565_v13 = vmul.f32 %v1672_v42, %v537_v22  ;;  %v624_v14 = vmul.f32 1.442695, %v602_v3  ;;  %v620_v15 = vmul.f32 1.442695, %v600_v4 }
 0x11e   : > { %1336 = vpow2.f32 %v616_v8  ;;  %v1730_v16 = vadd.f32 %v1679_v45, %v567_v11  ;;  %v626_v18 = vmul.f32 1.442695, %v603_v5  ;;  %v568_v27 = vmul.f32 %v1672_v42, %v1642_v24  ;;  %v1739_v21 = vpop.f32.mrb[14].mxu1 }
 0x11f   : > { %1338 = vpow2.f32 %v612_v9  ;;  %v1735_v20 = vadd.f32 %v1679_v45, %v565_v13  ;;  %v622_v22 = vmul.f32 1.442695, %v601_v6  ;;  %v566_v38 = vmul.f32 %v1672_v42, %v1644_v25  ;;  %v1744_v39 = vpop.f32.mrb[15].mxu1 }
 0x120   : > { %1340 = vpow2.f32 %v618_v10  ;;  %v606_v37 = vsub.f32 0.0, %v1730_v16  ;;  %v1748_v47 = vadd.f32 %v1679_v45, %v568_v27  ;;  %v571_v24 = vmul.f32 %v1672_v42, %v1646_v26 }
 0x121   : > { %1342 = vpow2.f32 %v614_v12  ;;  %v604_v40 = vsub.f32 0.0, %v1735_v20  ;;  %v1753_v44 = vadd.f32 %v1679_v45, %v566_v38  ;;  %v569_v53 = vmul.f32 %v1672_v42, %v1650_v29 }
 0x122   : > { %1344 = vpow2.f32 %v624_v14  ;;  %v632_v48 = vmul.f32 1.442695, %v606_v37  ;;  %v607_v25 = vsub.f32 0.0, %v1748_v47  ;;  %v1757_v51 = vadd.f32 %v1679_v45, %v571_v24 }
 0x123   : > { %1346 = vpow2.f32 %v620_v15  ;;  %v628_v49 = vmul.f32 1.442695, %v604_v40  ;;  %v605_v52 = vsub.f32 0.0, %v1753_v44  ;;  %v572_v63 = vmul.f32 %v1672_v42, %v1652_v30 }
 0x124   : > { %1348 = vpow2.f32 %v626_v18  ;;  %v634_v26 = vmul.f32 1.442695, %v607_v25  ;;  %v610_v54 = vsub.f32 0.0, %v1757_v51  ;;  %v570_v2 = vmul.f32 %v1672_v42, %v1656_v32 }
 0x125   : > { %1350 = vpow2.f32 %v622_v22  ;;  %v630_v0 = vmul.f32 1.442695, %v605_v52  ;;  %v1768_v11 = vadd.f32 %v1679_v45, %v569_v53  ;;  %v1771_v42 = vadd.f32 %v1679_v45, %v572_v63  ;;  %v1782_v53 = vld [vmem:[%s1876_s7] ss:$0 sm:$0xff] }
 0x126   : > { %1352 = vpow2.f32 %v632_v48  ;;  %v640_v1 = vmul.f32 1.442695, %v610_v54  ;;  %v1774_v15 = vadd.f32 %v1679_v45, %v570_v2 }
 0x127   : > { %1354 = vpow2.f32 %v628_v49  ;;  %v608_v38 = vsub.f32 0.0, %v1768_v11  ;;  %v611_v48 = vsub.f32 0.0, %v1771_v42 }
 0x128   : > { %v1337_v3 = vpop.eup %1336  ;;  %1356 = vpow2.f32 %v634_v26  ;;  %v609_v45 = vsub.f32 0.0, %v1774_v15 }
 0x129   : > { %v1339_v4 = vpop.eup %1338  ;;  %v646_v5 = vadd.f32 1.0, %v1337_v3  ;;  %1358 = vpow2.f32 %v630_v0  ;;  %v636_v0 = vmul.f32 1.442695, %v608_v38  ;;  %v642_v3 = vmul.f32 1.442695, %v611_v48 }
 0x12a   : > { %v1341_v29 = vpop.eup %1340  ;;  %v644_v6 = vadd.f32 1.0, %v1339_v4  ;;  %1360 = vpow2.f32 %v640_v1 }
 0x12b   : > { %v1343_v8 = vpop.eup %1342  ;;  %1362 = vrcp.f32 %v646_v5  ;;  %v647_v9 = vadd.f32 1.0, %v1341_v29  ;;  %v870_v29 = vadd.f32 %v1638_v19, %v1782_v53 }
 0x12c   : > { %v1345_v10 = vpop.eup %1344  ;;  %1364 = vrcp.f32 %v644_v6  ;;  %v645_v30 = vadd.f32 1.0, %v1343_v8  ;;  %v638_v6 = vmul.f32 1.442695, %v609_v45 }
 0x12d   : > { %v1347_v12 = vpop.eup %1346  ;;  %1366 = vrcp.f32 %v647_v9  ;;  %v650_v32 = vadd.f32 1.0, %v1345_v10  ;;  %v862_v10 = vadd.f32 %v1782_v53, %v1640_v23 }
 0x12e   : > { %v1349_v13 = vpop.eup %1348  ;;  %1368 = vrcp.f32 %v645_v30  ;;  %v648_v14 = vadd.f32 1.0, %v1347_v12  ;;  %v873_v12 = vadd.f32 %v1648_v28, %v1782_v53 }
 0x12f   : > { %v1351_v18 = vpop.eup %1350  ;;  %1370 = vrcp.f32 %v650_v32  ;;  %v651_v27 = vadd.f32 1.0, %v1349_v13 }
 0x130   : > { %v1353_v22 = vpop.eup %1352  ;;  %1372 = vrcp.f32 %v648_v14  ;;  %v649_v37 = vadd.f32 1.0, %v1351_v18 }
 0x131   : > { %v1355_v40 = vpop.eup %1354  ;;  %1374 = vrcp.f32 %v651_v27  ;;  %v654_v24 = vadd.f32 1.0, %v1353_v22 }
 0x132   : > { %v1357_v49 = vpop.eup %1356  ;;  %1376 = vrcp.f32 %v649_v37  ;;  %v652_v25 = vadd.f32 1.0, %v1355_v40 }
 0x133   : > { %v1359_v52 = vpop.eup %1358  ;;  %1378 = vrcp.f32 %v654_v24  ;;  %v655_v26 = vadd.f32 1.0, %v1357_v49 }
 0x134   : > { %v1361_v54 = vpop.eup %1360  ;;  %1380 = vrcp.f32 %v652_v25  ;;  %v653_v63 = vadd.f32 1.0, %v1359_v52 }
 0x135   : > { %v1363_v1 = vpop.eup %1362  ;;  %1382 = vrcp.f32 %v655_v26  ;;  %v658_v2 = vadd.f32 1.0, %v1361_v54 }
 0x136   : > { %v1365_v4 = vpop.eup %1364  ;;  %v678_v5 = vmul.f32 %v1363_v1, %v1694_v55  ;;  %1384 = vrcp.f32 %v653_v63 }
 0x137   : > { %v1367_v8 = vpop.eup %1366  ;;  %v676_v9 = vmul.f32 %v1365_v4, %v1697_v56  ;;  %1386 = vrcp.f32 %v658_v2  ;;  %v865_v56 = vadd.f32 %v1782_v53, %v1654_v31  ;;  %v878_v31 = vadd.f32 %v1782_v53, %v1660_v34 }
 0x138   : > { %v1369_v30 = vpop.eup %1368  ;;  %v926_v55 = vadd.f32 %v870_v29, %v678_v5  ;;  %v679_v19 = vmul.f32 %v1367_v8, %v1700_v57  ;;  %1388 = vpow2.f32 %v636_v0  ;;  %v886_v57 = vadd.f32 %v1658_v33, %v1782_v53 }
 0x139   : > { %v1371_v32 = vpop.eup %1370  ;;  %v924_v13 = vadd.f32 %v862_v10, %v676_v9  ;;  %v677_v14 = vmul.f32 %v1369_v30, %v1703_v58  ;;  %1390 = vpow2.f32 %v642_v3  ;;  %v910_v8 = vadd.f32 %v1782_v53, %v1732_v17 }
 0x13a   : > { %v1373_v23 = vpop.eup %1372  ;;  %942 = vst [vmem:[%s1791_s12 + $0x10] sm:$0xff] %v926_v55  ;;  %v927_v18 = vadd.f32 %v873_v12, %v679_v19  ;;  %v682_v27 = vmul.f32 %v1371_v32, %v1706_v59  ;;  %1392 = vpow2.f32 %v638_v6  ;;  %v889_v59 = vadd.f32 %v1662_v35, %v1782_v53 }
 0x13b   : > { %v1375_v28 = vpop.eup %1374  ;;  %940 = vst [vmem:[%s1791_s12] sm:$0xff] %v924_v13  ;;  %v925_v22 = vadd.f32 %v865_v56, %v677_v14  ;;  %v680_v58 = vmul.f32 %v1373_v23, %v1709_v60  ;;  %v881_v60 = vadd.f32 %v1782_v53, %v1664_v36  ;;  %v921_v30 = vadd.f32 %v1739_v21, %v1782_v53 }
 0x13c   : > { %v1377_v37 = vpop.eup %1376  ;;  %943 = vst [vmem:[%s1791_s12 + $0x18] sm:$0xff] %v927_v18  ;;  %v930_v38 = vadd.f32 %v886_v57, %v682_v27  ;;  %v683_v40 = vmul.f32 %v1375_v28, %v1712_v61  ;;  %v902_v61 = vadd.f32 %v1670_v41, %v1782_v53  ;;  %v913_v12 = vadd.f32 %v1782_v53, %v1744_v39 }
 0x13d   : > { %v1379_v33 = vpop.eup %1378  ;;  %941 = vst [vmem:[%s1791_s12 + $0x8] sm:$0xff] %v925_v22  ;;  %v928_v24 = vadd.f32 %v878_v31, %v680_v58  ;;  %v681_v48 = vmul.f32 %v1377_v37, %v1715_v62  ;;  %v894_v62 = vadd.f32 %v1782_v53, %v1674_v43 }
 0x13e   : > { %v1381_v49 = vpop.eup %1380  ;;  %946 = vst [vmem:[%s1791_s12 + $0x30] sm:$0xff] %v930_v38  ;;  %v931_v34 = vadd.f32 %v889_v59, %v683_v40  ;;  %v686_v25 = vmul.f32 %v1379_v33, %v1730_v16  ;;  %v905_v16 = vadd.f32 %v1681_v46, %v1782_v53 }
 0x13f   : > { %v1383_v45 = vpop.eup %1382  ;;  %944 = vst [vmem:[%s1791_s12 + $0x20] sm:$0xff] %v928_v24  ;;  %v929_v35 = vadd.f32 %v881_v60, %v681_v48  ;;  %v684_v52 = vmul.f32 %v1381_v49, %v1735_v20  ;;  %v897_v20 = vadd.f32 %v1782_v53, %v1687_v50 }
 0x140   : > { %v1385_v26 = vpop.eup %1384  ;;  %947 = vst [vmem:[%s1791_s12 + $0x38] sm:$0xff] %v931_v34  ;;  %v934_v36 = vadd.f32 %v902_v61, %v686_v25  ;;  %v687_v54 = vmul.f32 %v1383_v45, %v1748_v47  ;;  %v918_v47 = vadd.f32 %v1725_v7, %v1782_v53 }
 0x141   : > { %v1387_v41 = vpop.eup %1386  ;;  %945 = vst [vmem:[%s1791_s12 + $0x28] sm:$0xff] %v929_v35  ;;  %v932_v63 = vadd.f32 %v894_v62, %v684_v52  ;;  %v685_v0 = vmul.f32 %v1385_v26, %v1753_v44 }
 0x142   : > { %v1389_v43 = vpop.eup %1388  ;;  %950 = vst [vmem:[%s1791_s12 + $0x50] sm:$0xff] %v934_v36  ;;  %v935_v1 = vadd.f32 %v905_v16, %v687_v54  ;;  %v690_v2 = vmul.f32 %v1387_v41, %v1757_v51 }
 0x143   : > { %v1391_v46 = vpop.eup %1390  ;;  %948 = vst [vmem:[%s1791_s12 + $0x40] sm:$0xff] %v932_v63  ;;  %v933_v3 = vadd.f32 %v897_v20, %v685_v0  ;;  %v656_v4 = vadd.f32 1.0, %v1389_v43 }
 0x144   : > { %v1393_v5 = vpop.eup %1392  ;;  %951 = vst [vmem:[%s1791_s12 + $0x58] sm:$0xff] %v935_v1  ;;  %v938_v29 = vadd.f32 %v918_v47, %v690_v2  ;;  %v659_v44 = vadd.f32 1.0, %v1391_v46 }
 0x145   : > { %949 = vst [vmem:[%s1791_s12 + $0x48] sm:$0xff] %v933_v3  ;;  %1394 = vrcp.f32 %v656_v4  ;;  %v657_v50 = vadd.f32 1.0, %v1393_v5 }
 0x146   : > { %954 = vst [vmem:[%s1791_s12 + $0x70] sm:$0xff] %v938_v29  ;;  %1396 = vrcp.f32 %v659_v44 }
 0x147   : > { %1398 = vrcp.f32 %v657_v50 }
 0x14f   : > { %v1395_v51 = vpop.eup %1394 }
 0x150   : > { %v1397_v6 = vpop.eup %1396  ;;  %v688_v7 = vmul.f32 %v1395_v51, %v1768_v11 }
 0x151   : > { %v1399_v9 = vpop.eup %1398  ;;  %v691_v10 = vmul.f32 %v1397_v6, %v1771_v42 }
 0x152   : > { %v936_v55 = vadd.f32 %v910_v8, %v688_v7  ;;  %v689_v19 = vmul.f32 %v1399_v9, %v1774_v15 }
 0x153   : > { %v939_v32 = vadd.f32 %v921_v30, %v691_v10 }
 0x154   : > { %952 = vst [vmem:[%s1791_s12 + $0x60] sm:$0xff] %v936_v55  ;;  %v937_v13 = vadd.f32 %v913_v12, %v689_v19 }
 0x155   : > { %955 = vst [vmem:[%s1791_s12 + $0x78] sm:$0xff] %v939_v32 }
 0x156   : > { %953 = vst [vmem:[%s1791_s12 + $0x68] sm:$0xff] %v937_v13 }
 0x157 PF: > { %s18_s9 = sadd.s32 1, %s1438_s9   ;;  %s1878_s27 = smov %s1430_s29 }
 0x158   : > { %p15_p7 = scmp.ge.s32.totalorder %s18_s9, 6   ;;  %s1879_s28 = smov %s1434_s30 }
 0x159   : > { %s1880_s29 = smov %s1883_s10  ;;  %s1881_s30 = smov %s1887_s11 }
 0x15a   :  { %17 = sbr.rel (!%p15_p7) target bundleno = 3 (0x3), region = 88 }

// kernel: _lambda_.4
= control target key start
LH: loop header
LB: loop body
LE: loop exit
PB: predicated region body
PF: predicated region fallthrough
CT: control target
= control target key end

     0   :  { %s4661_s15 = smov 0   ;;  %s4663_s16 = smov 0   ;;  %s5784_s0 = inlined_call_operand.vmem [shape: bf16[2,2,10,18,128], index: 0, kind: input, shape index: {}]   ;;  %s5785_s1 = inlined_call_operand.vmem [shape: bf16[9,128,128], index: 1, kind: input, shape index: {}]   ;;  %s5786_s2 = inlined_call_operand.vmem [shape: f32[1,128], index: 2, kind: input, shape index: {}]   ;;  %s5787_s3 = inlined_call_operand.vmem [shape: bf16[2,256,128], index: 3, kind: output, shape index: {0}]   ;;  %s5788_s4 = inlined_call_operand.vmem [shape: f32[2,2,128], index: 4, kind: output, shape index: {1}]  }
   0x1   :  { %s4665_s17 = smov 0   ;;  %s4667_s18 = smov 0  }
   0x2   :  { %s4669_s19 = smov 0  }
   0x3 LB: > { %s24_s20 = sadd.s32 1, %s4625_s17  ;;  %s27_s21 = sadd.s32 1, %s4629_s18  ;;  %s4633_s19 = sphi %s4669_s19, %s15_s19   ;;  %s4629_s18 = sphi %s4667_s18, %s5805_s18   ;;  %s4625_s17 = sphi %s4665_s17, %s5804_s17   ;;  %s4621_s16 = sphi %s4663_s16, %s5803_s16   ;;  %s4617_s15 = sphi %s4661_s15, %s5802_s15  }
   0x4   : > { %p25_p0 = scmp.ge.s32.totalorder %s24_s20, 2  ;;  %p3395_p1 = scmp.ge.s32.totalorder %s4633_s19, 1 }
   0x5   : > { %p185_p2 = scmp.lt.s32.totalorder %s4633_s19, 5 }
   0x6   : > { %s5807_s20 = smov (%p25_p0, %s24_s20), 0  ;;  %s5809_s21 = smov (!%p25_p0, %s27_s21), %s4629_s18 }
   0x7   : > { %p186_p3 = pnand %p3395_p1, %p185_p2  ;;  %p29_p4 = scmp.ge.s32.totalorder %s5809_s21, 2 }
   0x9   : > { %s5811_s21 = smov (%p29_p4, %s5809_s21), 0  ;;  %189 = sbr.rel (%p186_p3) target bundleno = 474 (0x1da), region = 32 }
  0x10   : > { %v4495_v0 = vld [vmem:[%s5785_s1 + $0x40] sm:$0xff]   ;;  %p223_p5 = scmp.lt.s32.totalorder %s4621_s16, 1  ;;  %p225_p6 = scmp.lt.s32.totalorder %s4617_s15, 1  ;;  %v4497_v2 = vld [vmem:[%s5785_s1 + $0x48] sm:$0xff]   ;;  %v4499_v4 = vld [vmem:[%s5785_s1 + $0x50] sm:$0xff]   ;;  %vm893_vm3 = vcmask 1042432  }
  0x11   : > { %v4496_v1 = vld [vmem:[%s5785_s1 + $0x100] sm:$0xff]   ;;  %4020 = vmatprep.subr.bf16.mxu1 %v4495_v0  ;;  %v4498_v3 = vld [vmem:[%s5785_s1 + $0x108] sm:$0xff]   ;;  %v4500_v5 = vld [vmem:[%s5785_s1 + $0x110] sm:$0xff]   ;;  %vm287_vm0 = vsmask.f32 3328  ;;  %vm894_vm4 = vcmask 1046532  }
  0x12   : > { %s5813_s16 = smov (!%p223_p5, %s4621_s16), 1  ;;  %4148 = vmatprep.subr.bf16.mxu0 %v4496_v1  ;;  %4021 = vmatpush3.bf16.msra.mxu1 %v4495_v0  ;;  %v4501_v6 = vld [vmem:[%s5785_s1 + $0x58] sm:$0xff]   ;;  %v4503_v8 = vld [vmem:[%s5785_s1 + $0x60] sm:$0xff]   ;;  %v4505_v10 = vld [vmem:[%s5785_s1 + $0x68] sm:$0xff]   ;;  %vm288_vm1 = vsmask.f32 7440 }
  0x13   : > { %s226_s30 = scalar_select %p225_p6, %s4617_s15, 1  ;;  %4149 = vmatpush3.bf16.msra.mxu0 %v4496_v1  ;;  %4022 = vmatprep.subr.bf16.mxu1 %v4497_v2  ;;  %v4502_v7 = vld [vmem:[%s5785_s1 + $0x118] sm:$0xff]   ;;  %v4504_v9 = vld [vmem:[%s5785_s1 + $0x120] sm:$0xff]   ;;  %v4506_v11 = vld [vmem:[%s5785_s1 + $0x128] sm:$0xff]   ;;  %vm3257_vm6 = vcmask 1040384  }
  0x14   : > { %s4453_s7 = smul.u32 60, %s5813_s16  ;;  %4150 = vmatprep.subr.bf16.mxu0 %v4498_v3  ;;  %s3400_s11 = sshll.u32 %s5813_s16, 1  ;;  %v4507_v25 = vld [vmem:[%s5785_s1 + $0x70] sm:$0xff]   ;;  %v4509_v35 = vld [vmem:[%s5785_s1 + $0x78] sm:$0xff]   ;;  %vm4782_vm2 = vmor %vm287_vm0, %vm288_vm1 }
  0x15   : > { %s4452_s10 = smul.u32 30, %s226_s30  ;;  %s4720_s22 = scalar_lea.vmem %s5788_s4, %s3400_s11  ;;  %v4508_v29 = vld [vmem:[%s5785_s1 + $0x130] sm:$0xff]   ;;  %v4510_v50 = vld [vmem:[%s5785_s1 + $0x138] sm:$0xff]   ;;  %vm5079_vm5 = vmor %vm893_vm3, %vm894_vm4 }
  0x16   : > { %4023 = vmatpush3.bf16.msra.mxu1 %v4497_v2  ;;  %v4511_v2 = vld [vmem:[%s5785_s1] sm:$0xff]   ;;  %s3398_s14 = sshll.u32 %s5813_s16, 5  ;;  %p3810_p8 = scmp.ne.s32.totalorder %s4617_s15, 0 }
  0x17   : > { %s229_s12 = sadd.s32 %s4453_s7, %s4452_s10  ;;  %4151 = vmatpush3.bf16.msra.mxu0 %v4498_v3  ;;  %4024 = vmatprep.subr.bf16.mxu1 %v4499_v4  ;;  %v4814_v3 = vld [vmem:[%s5785_s1 + $0x140] sm:$0xff]  }
  0x18   : > { %4152 = vmatprep.subr.bf16.mxu0 %v4500_v5  ;;  %s3396_s27 = sshll.u32 %s229_s12, 2 }
  0x19   : > { %s4737_s8 = scalar_lea.vmem %s5784_s0, %s3396_s27 }
  0x1a   : > { %4025 = vmatpush3.bf16.msra.mxu1 %v4499_v4  ;;  %v4746_v12 = vld [vmem:[%s4737_s8] sm:$0xf]  ;;  %v4749_v13 = vld [vmem:[%s4737_s8 + $0x4] sm:$0xf]  ;;  %v4752_v14 = vld [vmem:[%s4737_s8 + $0x8] sm:$0x1] }
  0x1b   : > { %4153 = vmatpush3.bf16.msra.mxu0 %v4500_v5  ;;  %4026 = vmatprep.subr.bf16.mxu1 %v4501_v6  ;;  %v291_v15 = vshrl.u32 %v4746_v12, 16  ;;  %v294_v16 = vshll.u32 %v4746_v12, 16  ;;  %v300_v17 = vshll.u32 %v4749_v13, 16  ;;  %v304_v18 = vshrl.u32 %v4749_v13, 16  ;;  %v3537_v20 = vld [vmem:[%s4737_s8 + $0xc] sm:$0xf] }
  0x1c   : > { %4154 = vmatprep.subr.bf16.mxu0 %v4502_v7  ;;  %v310_v19 = vshll.u32 %v4752_v14, 16  ;;  %v4761_v23 = vld [vmem:[%s4737_s8 + $0x10] sm:$0xf]  ;;  %v4764_v24 = vld [vmem:[%s4737_s8 + $0x14] sm:$0x1]  ;;  %v1430_v28 = vshrl.u32 %v3537_v20, 16 }
  0x1d   : > { %v293_v21 = vrot.slane %v291_v15, 4  ;;  %v296_v22 = vrot.slane %v294_v16, 5  ;;  %v302_v26 = vrot.slane %v300_v17, 5  ;;  %v306_v27 = vrot.slane %v304_v18, 4  ;;  %v4775_v34 = vld [vmem:[%s4737_s8 + $0xc] sm:$0xf] }
  0x1e   : > { %4027 = vmatpush3.bf16.msra.mxu1 %v4501_v6  ;;  %v1433_v31 = vshll.u32 %v3537_v20, 16  ;;  %v1439_v32 = vshll.u32 %v4761_v23, 16  ;;  %v1443_v33 = vshrl.u32 %v4761_v23, 16  ;;  %v312_v38 = vrot.slane %v310_v19, 5  ;;  %v4788_v41 = vld [vmem:[%s4737_s8 + $0x10] sm:$0xf] }
  0x1f   : > { %4155 = vmatpush3.bf16.msra.mxu0 %v4502_v7  ;;  %4028 = vmatprep.subr.bf16.mxu1 %v4503_v8  ;;  %v297_v30 = vor.u32 %v296_v22, %v293_v21  ;;  %v307_v37 = vor.u32 %v306_v27, %v302_v26  ;;  %v1432_v39 = vrot.slane %v1430_v28, 4  ;;  %v1449_v40 = vshll.u32 %v4764_v24, 16  ;;  %v4798_v54 = vld [vmem:[%s4737_s8 + $0x14] sm:$0x1]  ;;  %v3540_v56 = vld [vmem:[%s4737_s8 + $0x18] sm:$0xf] }
  0x20   : > { %4156 = vmatprep.subr.bf16.mxu0 %v4504_v9  ;;  %v1435_v43 = vrot.slane %v1433_v31, 5  ;;  %v1441_v44 = vrot.slane %v1439_v32, 5  ;;  %v1445_v45 = vrot.slane %v1443_v33, 4  ;;  %v315_v48 = vshrl.u32 %v4775_v34, 16  ;;  %v4806_v61 = vld [vmem:[%s4737_s8 + $0x1c] sm:$0xf] }
  0x21   : > { %v298_v42 = vrot.slane %v297_v30, 4  ;;  %v308_v46 = vrot.slane %v307_v37, 4  ;;  %v1451_v47 = vrot.slane %v1449_v40, 5  ;;  %v318_v49 = vshll.u32 %v4775_v34, 16  ;;  %v4818_v7 = vld [vmem:[%s4737_s8 + $0x20] sm:$0x1] }
  0x22   : > { %4029 = vmatpush3.bf16.msra.mxu1 %v4503_v8  ;;  %v1436_v52 = vor.u32 %v1435_v43, %v1432_v39  ;;  %v1446_v53 = vor.u32 %v1445_v45, %v1441_v44  ;;  %v324_v55 = vshll.u32 %v4788_v41, 16  ;;  %v317_v58 = vrot.slane %v315_v48, 4  ;;  %v4835_v33 = vld [vmem:[%s4737_s8 + $0x1c] sm:$0xf] }
  0x23   : > { %4157 = vmatpush3.bf16.msra.mxu0 %v4504_v9  ;;  %4030 = vmatprep.subr.bf16.mxu1 %v4505_v10  ;;  %v303_v51 = vsel %vm4782_vm2, %v298_v42, %v302_v26  ;;  %v313_v57 = vsel %vm4782_vm2, %v308_v46, %v312_v38  ;;  %v320_v59 = vrot.slane %v318_v49, 5  ;;  %v328_v60 = vshrl.u32 %v4788_v41, 16  ;;  %v3543_v42 = vld [vmem:[%s4737_s8 + $0x24] sm:$0xf]  ;;  %v4513_v46 = vld [vmem:[%s5785_s1 + $0x8] sm:$0xff]  }
  0x24   : > { %4158 = vmatprep.subr.bf16.mxu0 %v4506_v11  ;;  %v3417_v62 = vcombine.low %v303_v51, %v313_v57  ;;  %v1437_v63 = vrot.slane %v1436_v52, 4  ;;  %v1447_v0 = vrot.slane %v1446_v53, 4  ;;  %v326_v1 = vrot.slane %v324_v55, 5  ;;  %v4850_v52 = vld [vmem:[%s4737_s8 + $0x28] sm:$0xf] }
  0x25   : > { %v321_v4 = vor.u32 %v320_v59, %v317_v58  ;;  %v330_v5 = vrot.slane %v328_v60, 4  ;;  %v334_v6 = vshll.u32 %v4798_v54, 16  ;;  %v1463_v21 = vshll.u32 %v4806_v61, 16  ;;  %v4855_v57 = vld [vmem:[%s4737_s8 + $0x2c] sm:$0x1]  ;;  %v4515_v59 = vld [vmem:[%s5785_s1 + $0x10] sm:$0xff]  }
  0x26   : > { %4031 = vmatpush3.bf16.msra.mxu1 %v4505_v10  ;;  %4036 = vmatprep.mubr.bf16.mxu1 %v3417_v62  ;;  %v1442_v8 = vsel %vm4782_vm2, %v1437_v63, %v1441_v44  ;;  %v1452_v9 = vsel %vm4782_vm2, %v1447_v0, %v1451_v47  ;;  %v1454_v10 = vshrl.u32 %v3540_v56, 16  ;;  %v1467_v22 = vshrl.u32 %v4806_v61, 16  ;;  %v4514_v60 = vld [vmem:[%s5785_s1 + $0x148] sm:$0xff]  }
  0x27   : > { %4159 = vmatpush3.bf16.msra.mxu0 %v4506_v11  ;;  %4032 = vmatprep.subr.bf16.mxu1 %v4507_v25  ;;  %v1457_v11 = vshll.u32 %v3540_v56, 16  ;;  %v3577_v15 = vcombine.low %v1442_v8, %v1452_v9  ;;  %v322_v16 = vrot.slane %v321_v4, 4  ;;  %v331_v17 = vor.u32 %v330_v5, %v326_v1  ;;  %v4864_v4 = vld [vmem:[%s4737_s8 + $0x24] sm:$0xf] }
  0x28   : > { %4160 = vmatprep.subr.bf16.mxu0 %v4508_v29  ;;  %v336_v18 = vrot.slane %v334_v6, 5  ;;  %v1456_v19 = vrot.slane %v1454_v10, 4  ;;  %v1465_v31 = vrot.slane %v1463_v21, 5  ;;  %v1469_v32 = vrot.slane %v1467_v22, 4  ;;  %v3546_v22 = vld [vmem:[%s4737_s8 + $0x30] sm:$0xf] }
  0x29   : > { %v1459_v20 = vrot.slane %v1457_v11, 5  ;;  %4164 = vmatprep.mubr.bf16.mxu0 %v3577_v15  ;;  %v327_v27 = vsel %vm4782_vm2, %v322_v16, %v326_v1  ;;  %v332_v28 = vrot.slane %v331_v17, 4  ;;  %v348_v49 = vshll.u32 %v4835_v33, 16  ;;  %v4871_v16 = vld [vmem:[%s4737_s8 + $0x28] sm:$0xf] }
  0x2a   : > { %4033 = vmatpush3.bf16.msra.mxu1 %v4507_v25  ;;  %v4827_v25 = vld [vmem:[%s4737_s8 + $0x18] sm:$0xf]  ;;  %v1470_v45 = vor.u32 %v1469_v32, %v1465_v31  ;;  %v1478_v58 = vshrl.u32 %v3543_v42, 16  ;;  %v1481_v1 = vshll.u32 %v3543_v42, 16  ;;  %v1491_v15 = vshrl.u32 %v4850_v52, 16  ;;  %v4516_v32 = vld [vmem:[%s5785_s1 + $0x150] sm:$0xff]  }
  0x2b   : > { %4161 = vmatpush3.bf16.msra.mxu0 %v4508_v29  ;;  %4034 = vmatprep.subr.bf16.mxu1 %v4509_v35  ;;  %v1473_v29 = vshll.u32 %v4818_v7, 16  ;;  %v1460_v30 = vor.u32 %v1459_v20, %v1456_v19  ;;  %v337_v37 = vsel %vm4782_vm2, %v332_v28, %v336_v18  ;;  %v339_v40 = vshrl.u32 %v4827_v25, 16  ;;  %v4874_v17 = vld [vmem:[%s4737_s8 + $0x2c] sm:$0x1]  ;;  %v4517_v42 = vld [vmem:[%s5785_s1 + $0x18] sm:$0xff]  }
  0x2c   : > { %4162 = vmatprep.subr.bf16.mxu0 %v4510_v50  ;;  %v3418_v43 = vcombine.low %v327_v27, %v337_v37  ;;  %v342_v47 = vshll.u32 %v4827_v25, 16  ;;  %v1471_v55 = vrot.slane %v1470_v45, 4  ;;  %v350_v62 = vrot.slane %v348_v49, 5 }
  0x2d   : > { %v1475_v38 = vrot.slane %v1473_v29, 5  ;;  %v1461_v44 = vrot.slane %v1460_v30, 4  ;;  %v341_v48 = vrot.slane %v339_v40, 4  ;;  %v1480_v8 = vrot.slane %v1478_v58, 4  ;;  %v4518_v58 = vld [vmem:[%s5785_s1 + $0x158] sm:$0xff]  }
  0x2e   : > { %4035 = vmatpush3.bf16.msra.mxu1 %v4509_v35  ;;  %v281_v35 = vld [vmem:[%s4737_s8 + $0x20] sm:$0x1]  ;;  %v344_v56 = vrot.slane %v342_v47, 5  ;;  %v1483_v11 = vrot.slane %v1481_v1, 5  ;;  %v1497_v20 = vshll.u32 %v4855_v57, 16  ;;  %v363_v21 = vshrl.u32 %v4864_v4, 16 }
  0x2f   : > { %4163 = vmatpush3.bf16.msra.mxu0 %v4510_v50  ;;  %4052 = vmatprep.subr.bf16.mxu1 %v4511_v2  ;;  %v352_v50 = vshrl.u32 %v4835_v33, 16  ;;  %v358_v51 = vshll.u32 %v281_v35, 16  ;;  %v1466_v53 = vsel %vm4782_vm2, %v1461_v44, %v1465_v31  ;;  %v1476_v5 = vsel %vm4782_vm2, %v1471_v55, %v1475_v38  ;;  %v4881_v31 = vld [vmem:[%s4737_s8 + $0x34] sm:$0xf]  ;;  %v4900_v55 = vld [vmem:[%s4737_s8 + $0x38] sm:$0x1] }
  0x30   : > { %4180 = vmatprep.subr.bf16.mxu0 %v4814_v3  ;;  %v345_v6 = vor.u32 %v344_v56, %v341_v48  ;;  %v3578_v9 = vcombine.low %v1466_v53, %v1476_v5  ;;  %v1484_v28 = vor.u32 %v1483_v11, %v1480_v8  ;;  %v1493_v29 = vrot.slane %v1491_v15, 4  ;;  %v4907_v5 = vld [vmem:[%s4737_s8 + $0x30] sm:$0xf] }
  0x31   : > { %4037 = vmatmul.mubr.bf16.vlgmr.msra.gmra.mrb[0].mxu1 %v3418_v43  ;;  %v354_v63 = vrot.slane %v352_v50, 4  ;;  %v360_v0 = vrot.slane %v358_v51, 5  ;;  %v366_v30 = vshll.u32 %v4864_v4, 16  ;;  %v1499_v37 = vrot.slane %v1497_v20, 5 }
  0x32   : > { %4053 = vmatpush3.bf16.msra.mxu1 %v4511_v2  ;;  %v1487_v2 = vshll.u32 %v4850_v52, 16  ;;  %v346_v18 = vrot.slane %v345_v6, 4  ;;  %4165 = vmatmul.mubr.bf16.vlgmr.msra.gmra.mrb[0].mxu0 %v3578_v9  ;;  %v365_v38 = vrot.slane %v363_v21, 4  ;;  %v372_v40 = vshll.u32 %v4871_v16, 16  ;;  %v4913_v9 = vld [vmem:[%s4737_s8 + $0x34] sm:$0xf] }
  0x33   : > { %4054 = vmatprep.subr.bf16.mxu1 %v4513_v46  ;;  %v355_v10 = vor.u32 %v354_v63, %v350_v62  ;;  %4181 = vmatpush3.bf16.msra.mxu0 %v4814_v3  ;;  %v1485_v44 = vrot.slane %v1484_v28, 4  ;;  %v368_v3 = vrot.slane %v366_v30, 5  ;;  %v376_v48 = vshrl.u32 %v4871_v16, 16 }
  0x34   : > { %v1489_v19 = vrot.slane %v1487_v2, 5  ;;  %v351_v35 = vsel %vm4782_vm2, %v346_v18, %v350_v62  ;;  %4182 = vmatprep.subr.bf16.mxu0 %v4514_v60  ;;  %v374_v47 = vrot.slane %v372_v40, 5  ;;  %v382_v49 = vshll.u32 %v4874_v17, 16 }
  0x35   : > { %v356_v27 = vrot.slane %v355_v10, 4  ;;  %v369_v53 = vor.u32 %v368_v3, %v365_v38  ;;  %v1502_v56 = vshrl.u32 %v3546_v22, 16  ;;  %v378_v62 = vrot.slane %v376_v48, 4  ;;  %v4938_v48 = vld [vmem:[%s4737_s8 + $0x40] sm:$0xf] }
  0x36   : > { %4055 = vmatpush3.bf16.msra.mxu1 %v4513_v46  ;;  %v1494_v45 = vor.u32 %v1493_v29, %v1489_v19  ;;  %v1490_v50 = vsel %vm4782_vm2, %v1485_v44, %v1489_v19  ;;  %v384_v63 = vrot.slane %v382_v49, 5  ;;  %v1511_v1 = vshll.u32 %v4881_v31, 16  ;;  %v4923_v29 = vld [vmem:[%s4737_s8 + $0x38] sm:$0x1]  ;;  %v3549_v44 = vld [vmem:[%s4737_s8 + $0x3c] sm:$0xf] }
  0x37   : > { %4056 = vmatprep.subr.bf16.mxu1 %v4515_v59  ;;  %v361_v43 = vsel %vm4782_vm2, %v356_v27, %v360_v0  ;;  %4183 = vmatpush3.bf16.msra.mxu0 %v4514_v60  ;;  %v1505_v0 = vshll.u32 %v3546_v22, 16  ;;  %v370_v8 = vrot.slane %v369_v53, 4  ;;  %v1504_v2 = vrot.slane %v1502_v56, 4  ;;  %v4519_v60 = vld [vmem:[%s5785_s1 + $0x20] sm:$0xff]   ;;  %v4523_v56 = vld [vmem:[%s5785_s1 + $0x30] sm:$0xff]  }
  0x38   : > { %v3419_v46 = vcombine.low %v351_v35, %v361_v43  ;;  %v1495_v51 = vrot.slane %v1494_v45, 4  ;;  %4184 = vmatprep.subr.bf16.mxu0 %v4516_v32  ;;  %v379_v11 = vor.u32 %v378_v62, %v374_v47  ;;  %v1513_v18 = vrot.slane %v1511_v1, 5 }
  0x39   : > { %v1507_v15 = vrot.slane %v1505_v0, 5  ;;  %v375_v19 = vsel %vm4782_vm2, %v370_v8, %v374_v47  ;;  %v1521_v21 = vshll.u32 %v4900_v55, 16  ;;  %v387_v22 = vshrl.u32 %v4907_v5, 16  ;;  %v4947_v0 = vld [vmem:[%s4737_s8 + $0x44] sm:$0x1]  ;;  %v4522_v8 = vld [vmem:[%s5785_s1 + $0x168] sm:$0xff]  }
  0x3a   : > { %4057 = vmatpush3.bf16.msra.mxu1 %v4515_v59  ;;  %4040 = vmatprep.mubr.bf16.mxu1 %v3419_v46  ;;  %v1500_v6 = vsel %vm4782_vm2, %v1495_v51, %v1499_v37  ;;  %v1515_v59 = vshrl.u32 %v4881_v31, 16  ;;  %v380_v27 = vrot.slane %v379_v11, 4  ;;  %v390_v30 = vshll.u32 %v4907_v5, 16  ;;  %v4521_v37 = vld [vmem:[%s5785_s1 + $0x28] sm:$0xff]   ;;  %v4959_v11 = vld [vmem:[%s4737_s8 + $0x40] sm:$0xf] }
  0x3b   : > { %4058 = vmatprep.subr.bf16.mxu1 %v4517_v42  ;;  %v3579_v10 = vcombine.low %v1490_v50, %v1500_v6  ;;  %v1508_v28 = vor.u32 %v1507_v15, %v1504_v2  ;;  %4185 = vmatpush3.bf16.msra.mxu0 %v4516_v32  ;;  %v396_v35 = vshll.u32 %v4913_v9, 16  ;;  %v1523_v40 = vrot.slane %v1521_v21, 5  ;;  %v4520_v32 = vld [vmem:[%s5785_s1 + $0x160] sm:$0xff]  }
  0x3c   : > { %v1517_v20 = vrot.slane %v1515_v59, 4  ;;  %4186 = vmatprep.subr.bf16.mxu0 %v4518_v58  ;;  %v400_v43 = vshrl.u32 %v4913_v9, 16  ;;  %v385_v45 = vsel %vm4782_vm2, %v380_v27, %v384_v63  ;;  %v392_v46 = vrot.slane %v390_v30, 5  ;;  %v4962_v21 = vld [vmem:[%s4737_s8 + $0x44] sm:$0x1] }
  0x3d   : > { %4168 = vmatprep.mubr.bf16.mxu0 %v3579_v10  ;;  %v1509_v3 = vrot.slane %v1508_v28, 4  ;;  %v398_v47 = vrot.slane %v396_v35, 5  ;;  %v3420_v49 = vcombine.low %v375_v19, %v385_v45  ;;  %v406_v53 = vshll.u32 %v4923_v29, 16  ;;  %v4956_v10 = vld [vmem:[%s4737_s8 + $0x3c] sm:$0xf]  ;;  %5793 = vst [vmem:[#allocation2_spill] sm:$0xff] %v4962_v21 }
  0x3e   : > { %4059 = vmatpush3.bf16.msra.mxu1 %v4517_v42  ;;  %v1518_v38 = vor.u32 %v1517_v20, %v1513_v18  ;;  %v389_v42 = vrot.slane %v387_v22, 4  ;;  %v402_v51 = vrot.slane %v400_v43, 4  ;;  %v1526_v1 = vshrl.u32 %v3549_v44, 16  ;;  %v4525_v22 = vld [vmem:[%s5785_s1 + $0x38] sm:$0xff]   ;;  %v4975_v45 = vld [vmem:[%s4737_s8 + $0x4c] sm:$0xf] }
  0x3f   : > { %4060 = vmatprep.subr.bf16.mxu1 %v4519_v60  ;;  %v1514_v62 = vsel %vm4782_vm2, %v1509_v3, %v1513_v18  ;;  %4187 = vmatpush3.bf16.msra.mxu0 %v4518_v58  ;;  %v1529_v6 = vshll.u32 %v3549_v44, 16  ;;  %v1535_v58 = vshll.u32 %v4938_v48, 16  ;;  %v1539_v30 = vshrl.u32 %v4938_v48, 16 }
  0x40   : > { %v1519_v50 = vrot.slane %v1518_v38, 4  ;;  %v393_v63 = vor.u32 %v392_v46, %v389_v42  ;;  %4041 = vmatmul.mubr.bf16.gmra.mrb[4].mxu1 %v3420_v49  ;;  %v403_v59 = vor.u32 %v402_v51, %v398_v47  ;;  %4188 = vmatprep.subr.bf16.mxu0 %v4520_v32  ;;  %v1528_v19 = vrot.slane %v1526_v1, 4  ;;  %v3552_v38 = vld [vmem:[%s4737_s8 + $0x48] sm:$0xf] }
  0x41   : > { %v1531_v20 = vrot.slane %v1529_v6, 5  ;;  %v1537_v28 = vrot.slane %v1535_v58, 5  ;;  %v1545_v35 = vshll.u32 %v4947_v0, 16  ;;  %v411_v43 = vshrl.u32 %v4956_v10, 16 }
  0x42   : > { %4061 = vmatpush3.bf16.msra.mxu1 %v4519_v60  ;;  %v1524_v2 = vsel %vm4782_vm2, %v1519_v50, %v1523_v40  ;;  %v408_v60 = vrot.slane %v406_v53, 5  ;;  %v394_v18 = vrot.slane %v393_v63, 4  ;;  %v404_v27 = vrot.slane %v403_v59, 4 }
  0x43   : > { %4062 = vmatprep.subr.bf16.mxu1 %v4521_v37  ;;  %v3580_v15 = vcombine.low %v1514_v62, %v1524_v2  ;;  %v1532_v42 = vor.u32 %v1531_v20, %v1528_v19  ;;  %v414_v44 = vshll.u32 %v4956_v10, 16  ;;  %v1541_v46 = vrot.slane %v1539_v30, 4  ;;  %4189 = vmatpush3.bf16.msra.mxu0 %v4520_v32  ;;  %v4524_v62 = vld [vmem:[%s5785_s1 + $0x170] sm:$0xff]  }
  0x44   : > { %v399_v40 = vsel %vm4782_vm2, %v394_v18, %v398_v47  ;;  %v409_v3 = vsel %vm4782_vm2, %v404_v27, %v408_v60  ;;  %v1547_v49 = vrot.slane %v1545_v35, 5  ;;  %v420_v50 = vshll.u32 %v4959_v11, 16  ;;  %4190 = vmatprep.subr.bf16.mxu0 %v4522_v8  ;;  %v4988_v60 = vld [vmem:[%s4737_s8 + $0x50] sm:$0x1]  ;;  %v4993_v18 = vld [vmem:[%s5785_s1 + $0x80] sm:$0xff]  }
  0x45   : > { %4169 = vmatmul.mubr.bf16.gmra.mrb[4].mxu0 %v3580_v15  ;;  %v1533_v51 = vrot.slane %v1532_v42, 4  ;;  %v413_v47 = vrot.slane %v411_v43, 4  ;;  %v416_v53 = vrot.slane %v414_v44, 5  ;;  %v1542_v63 = vor.u32 %v1541_v46, %v1537_v28  ;;  %v5001_v42 = vld [vmem:[%s4737_s8 + $0x48] sm:$0xf] }
  0x46   : > { %4063 = vmatpush3.bf16.msra.mxu1 %v4521_v37  ;;  %v3421_v37 = vcombine.low %v399_v40, %v409_v3  ;;  %v422_v1 = vrot.slane %v420_v50, 5  ;;  %v424_v6 = vshrl.u32 %v4959_v11, 16  ;;  %v430_v2 = vshll.u32 %v4962_v21, 16  ;;  %v5007_v46 = vld [vmem:[%s4737_s8 + $0x4c] sm:$0xf] }
  0x47   : > { %4064 = vmatprep.subr.bf16.mxu1 %v4523_v56  ;;  %v1538_v32 = vsel %vm4782_vm2, %v1533_v51, %v1537_v28  ;;  %v417_v59 = vor.u32 %v416_v53, %v413_v47  ;;  %v1550_v58 = vshrl.u32 %v3552_v38, 16  ;;  %v1553_v15 = vshll.u32 %v3552_v38, 16  ;;  %4191 = vmatpush3.bf16.msra.mxu0 %v4522_v8  ;;  %v4526_v28 = vld [vmem:[%s5785_s1 + $0x178] sm:$0xff]   ;;  %v5012_v53 = vld [vmem:[%s4737_s8 + $0x50] sm:$0x1] }
  0x48   : > { %4044 = vmatprep.mubr.bf16.mxu1 %v3421_v37  ;;  %v1543_v19 = vrot.slane %v1542_v63, 4  ;;  %v426_v20 = vrot.slane %v424_v6, 4  ;;  %v1559_v27 = vshll.u32 %v4975_v45, 16  ;;  %v1563_v40 = vshrl.u32 %v4975_v45, 16  ;;  %4192 = vmatprep.subr.bf16.mxu0 %v4524_v62  ;;  %5794 = vst [vmem:[#allocation3_spill] sm:$0xff] %v5012_v53 }
  0x49   : > { %v418_v30 = vrot.slane %v417_v59, 4  ;;  %v1552_v35 = vrot.slane %v1550_v58, 4  ;;  %v1555_v38 = vrot.slane %v1553_v15, 5  ;;  %v1569_v8 = vshll.u32 %v4988_v60, 16  ;;  %v3555_v63 = vld [vmem:[%s4737_s8 + $0x54] sm:$0xf] }
  0x4a   : > { %4065 = vmatpush3.bf16.msra.mxu1 %v4523_v56  ;;  %v432_v56 = vrot.slane %v430_v2, 5  ;;  %v1548_v43 = vsel %vm4782_vm2, %v1543_v19, %v1547_v49  ;;  %v427_v44 = vor.u32 %v426_v20, %v422_v1  ;;  %v1561_v3 = vrot.slane %v1559_v27, 5  ;;  %v5023_v15 = vld [vmem:[%s5785_s1 + $0x180] sm:$0xff]  }
  0x4b   : > { %4066 = vmatprep.subr.bf16.mxu1 %v4525_v22  ;;  %v3581_v50 = vcombine.low %v1538_v32, %v1548_v43  ;;  %v423_v37 = vsel %vm4782_vm2, %v418_v30, %v422_v1  ;;  %v1556_v51 = vor.u32 %v1555_v38, %v1552_v35  ;;  %v1565_v47 = vrot.slane %v1563_v40, 4  ;;  %4193 = vmatpush3.bf16.msra.mxu0 %v4524_v62  ;;  %v5029_v30 = vld [vmem:[%s4737_s8 + $0x58] sm:$0xf] }
  0x4c   : > { %v428_v6 = vrot.slane %v427_v44, 4  ;;  %v1571_v49 = vrot.slane %v1569_v8, 5  ;;  %v435_v2 = vshrl.u32 %v5001_v42, 16  ;;  %v438_v59 = vshll.u32 %v5001_v42, 16  ;;  %4194 = vmatprep.subr.bf16.mxu0 %v4526_v28  ;;  %v5034_v44 = vld [vmem:[%s4737_s8 + $0x5c] sm:$0x1] }
  0x4d   : > { %4172 = vmatprep.mubr.bf16.mxu0 %v3581_v50  ;;  %v1566_v1 = vor.u32 %v1565_v47, %v1561_v3  ;;  %v444_v32 = vshll.u32 %v5007_v46, 16  ;;  %v448_v58 = vshrl.u32 %v5007_v46, 16  ;;  %v454_v27 = vshll.u32 %v5012_v53, 16  ;;  %v5037_v8 = vld [vmem:[%s4737_s8 + $0x54] sm:$0xf] }
  0x4e   : > { %4067 = vmatpush3.bf16.msra.mxu1 %v4525_v22  ;;  %v1557_v22 = vrot.slane %v1556_v51, 4  ;;  %v433_v19 = vsel %vm4782_vm2, %v428_v6, %v432_v56  ;;  %v437_v62 = vrot.slane %v435_v2, 4  ;;  %v440_v20 = vrot.slane %v438_v59, 5  ;;  %v5040_v6 = vld [vmem:[%s4737_s8 + $0x58] sm:$0xf] }
  0x4f   : > { %4084 = vmatprep.subr.bf16.mxu1 %v4993_v18  ;;  %v3422_v35 = vcombine.low %v423_v37, %v433_v19  ;;  %v1567_v40 = vrot.slane %v1566_v1, 4  ;;  %v446_v43 = vrot.slane %v444_v32, 5  ;;  %v450_v51 = vrot.slane %v448_v58, 4  ;;  %4195 = vmatpush3.bf16.msra.mxu0 %v4526_v28  ;;  %v5064_v53 = vld [vmem:[%s4737_s8 + $0x68] sm:$0x1] }
  0x50   : > { %v1562_v38 = vsel %vm4782_vm2, %v1557_v22, %v1561_v3  ;;  %v441_v50 = vor.u32 %v440_v20, %v437_v62  ;;  %v456_v47 = vrot.slane %v454_v27, 5  ;;  %v1574_v56 = vshrl.u32 %v3555_v63, 16  ;;  %4212 = vmatprep.subr.bf16.mxu0 %v5023_v15  ;;  %v5049_v20 = vld [vmem:[%s4737_s8 + $0x5c] sm:$0x1] }
  0x51   : > { %4045 = vmatmul.mubr.bf16.gmra.mrb[8].mxu1 %v3422_v35  ;;  %v1572_v37 = vsel %vm4782_vm2, %v1567_v40, %v1571_v49  ;;  %v1577_v3 = vshll.u32 %v3555_v63, 16  ;;  %v1583_v2 = vshll.u32 %v5029_v30, 16  ;;  %v1587_v59 = vshrl.u32 %v5029_v30, 16  ;;  %v3558_v63 = vld [vmem:[%s4737_s8 + $0x60] sm:$0xf] }
  0x52   : > { %v3582_v22 = vcombine.low %v1562_v38, %v1572_v37  ;;  %v442_v1 = vrot.slane %v441_v50, 4  ;;  %v451_v32 = vor.u32 %v450_v51, %v446_v43  ;;  %v1576_v58 = vrot.slane %v1574_v56, 4 }
  0x53   : > { %v1579_v28 = vrot.slane %v1577_v3, 5  ;;  %v1585_v19 = vrot.slane %v1583_v2, 5  ;;  %v1589_v62 = vrot.slane %v1587_v59, 4  ;;  %v1593_v49 = vshll.u32 %v5034_v44, 16  ;;  %v5058_v3 = vld [vmem:[%s4737_s8 + $0x64] sm:$0xf] }
  0x54   : > { %4173 = vmatmul.mubr.bf16.gmra.mrb[8].mxu0 %v3582_v22  ;;  %v447_v27 = vsel %vm4782_vm2, %v442_v1, %v446_v43  ;;  %v452_v35 = vrot.slane %v451_v32, 4  ;;  %v459_v38 = vshrl.u32 %v5037_v8, 16  ;;  %v462_v40 = vshll.u32 %v5037_v8, 16 }
  0x55   : > { %v1580_v50 = vor.u32 %v1579_v28, %v1576_v58  ;;  %v1590_v51 = vor.u32 %v1589_v62, %v1585_v19  ;;  %v1595_v56 = vrot.slane %v1593_v49, 5  ;;  %v468_v37 = vshll.u32 %v5040_v6, 16  ;;  %v3593_v58 = vld [vmem:[%s4737_s8 + $0xc] sm:$0xe] }
  0x56   : > { %v457_v2 = vsel %vm4782_vm2, %v452_v35, %v456_v47  ;;  %v461_v59 = vrot.slane %v459_v38, 4  ;;  %v464_v22 = vrot.slane %v462_v40, 5  ;;  %v472_v43 = vshrl.u32 %v5040_v6, 16 }
  0x57   : > { %v3423_v1 = vcombine.low %v447_v27, %v457_v2  ;;  %v1581_v32 = vrot.slane %v1580_v50, 4  ;;  %v1591_v26 = vrot.slane %v1590_v51, 4  ;;  %v470_v39 = vrot.slane %v468_v37, 5 }
  0x58   : > { %v465_v28 = vor.u32 %v464_v22, %v461_v59  ;;  %v474_v62 = vrot.slane %v472_v43, 4  ;;  %v478_v49 = vshll.u32 %v5049_v20, 16  ;;  %v1598_v21 = vshrl.u32 %v3558_v63, 16 }
  0x59   : > { %4048 = vmatprep.mubr.bf16.mxu1 %v3423_v1  ;;  %v1586_v47 = vsel %vm4782_vm2, %v1581_v32, %v1585_v19  ;;  %v1596_v35 = vsel %vm4782_vm2, %v1591_v26, %v1595_v56  ;;  %v1601_v38 = vshll.u32 %v3558_v63, 16  ;;  %v1607_v27 = vshll.u32 %v5058_v3, 16 }
  0x5a   : > { %v3583_v40 = vcombine.low %v1586_v47, %v1596_v35  ;;  %v466_v50 = vrot.slane %v465_v28, 4  ;;  %v475_v51 = vor.u32 %v474_v62, %v470_v39  ;;  %v480_v37 = vrot.slane %v478_v49, 5  ;;  %v3594_v49 = vld [vmem:[%s4737_s8 + $0x18] sm:$0xe]  ;;  %v3595_v47 = vld [vmem:[%s4737_s8 + $0x24] sm:$0xe] }
  0x5b   : > { %v1600_v2 = vrot.slane %v1598_v21, 4  ;;  %v1603_v59 = vrot.slane %v1601_v38, 5  ;;  %v1609_v22 = vrot.slane %v1607_v27, 5  ;;  %v1611_v43 = vshrl.u32 %v5058_v3, 16 }
  0x5c   : > { %4176 = vmatprep.mubr.bf16.mxu0 %v3583_v40  ;;  %v471_v19 = vsel %vm4782_vm2, %v466_v50, %v470_v39  ;;  %v476_v1 = vrot.slane %v475_v51, 4  ;;  %v1617_v26 = vshll.u32 %v5064_v53, 16  ;;  %v3601_v63 = vrot.slane %v3593_v58, 9 }
  0x5d   : > { %v1604_v56 = vor.u32 %v1603_v59, %v1600_v2  ;;  %v1613_v32 = vrot.slane %v1611_v43, 4  ;;  %v1865_v21 = vrot.slane %v4761_v23, 5  ;;  %v3433_v39 = vcombine.low %v4746_v12, %v4749_v13 }
  0x5e   : > { %v481_v62 = vsel %vm4782_vm2, %v476_v1, %v480_v37  ;;  %v1619_v27 = vrot.slane %v1617_v26, 5  ;;  %v1879_v37 = vrot.slane %v4850_v52, 5  ;;  %v5797_v12 = vrot.slane %v4806_v61, 5  ;;  %v5129_v61 = vld [vmem:[%s4737_s8 + $0x48] sm:$0xe] }
  0x5f   : > { %v3424_v35 = vcombine.low %v471_v19, %v481_v62  ;;  %v1605_v58 = vrot.slane %v1604_v56, 4  ;;  %v1614_v38 = vor.u32 %v1613_v32, %v1609_v22  ;;  %v1866_v40 = vsel %vm5079_vm5, %v3601_v63, %v1865_v21  ;;  %v3596_v63 = vld [vmem:[%s4737_s8 + $0x30] sm:$0xe] }
  0x60   : > { %v1867_v50 = vrot.slane %v1865_v21, 4  ;;  %v1874_v13 = vrot.slane %v5797_v12, 4  ;;  %v1875_v2 = vrot.slane %v4818_v7, 5  ;;  %v5798_v59 = vrot.slane %v4764_v24, 5 }
  0x61   : > { %4049 = vmatmul.mubr.bf16.gmra.mrb[12].mxu1 %v3424_v35  ;;  %v1610_v23 = vsel %vm4782_vm2, %v1605_v58, %v1609_v22  ;;  %v1615_v51 = vrot.slane %v1614_v38, 4  ;;  %v3602_v22 = vrot.slane %v3594_v49, 9  ;;  %v3603_v26 = vrot.slane %v3595_v47, 9  ;;  %v3597_v49 = vld [vmem:[%s4737_s8 + $0x3c] sm:$0xe]  ;;  %v4531_v35 = vld [vmem:[%s5785_s1 + $0x88] sm:$0xff]  }
  0x62   : > { %4068 = vmatprep.mubr.bf16.mxu1 %v3433_v39  ;;  %v1869_v43 = vsel %vm5079_vm5, %v1867_v50, %v5798_v59  ;;  %v1881_v56 = vrot.slane %v1879_v37, 4  ;;  %v1882_v32 = vrot.slane %v4855_v57, 5  ;;  %v901_v7 = vrot.slane %v4752_v14, 5 }
  0x63   : > { %v1620_v19 = vsel %vm4782_vm2, %v1615_v51, %v1619_v27  ;;  %v3625_v1 = vcombine.low %v1866_v40, %v1869_v43  ;;  %v908_v24 = vrot.slane %v4798_v54, 5  ;;  %v3434_v21 = vcombine.low %v4775_v34, %v4788_v41  ;;  %v4537_v43 = vld [vmem:[%s5785_s1 + $0x98] sm:$0xff]  }
  0x64   : > { %v3584_v52 = vcombine.low %v1610_v23, %v1620_v19  ;;  %v1876_v62 = vsel %vm5079_vm5, %v1874_v13, %v1875_v2  ;;  %v3435_v39 = vcombine.low %v4827_v25, %v4835_v33  ;;  %v5799_v47 = vmov %v5797_v12  ;;  %v5139_v23 = vld [vmem:[%s4737_s8 + $0x54] sm:$0xe] }
  0x65   : > { %v1873_v57 = vsel %vm5079_vm5, %v3602_v22, %v5799_v47  ;;  %v3604_v34 = vrot.slane %v3596_v63, 9  ;;  %v1886_v41 = vrot.slane %v4881_v31, 5  ;;  %v1893_v58 = vrot.slane %v4938_v48, 5  ;;  %v4532_v48 = vld [vmem:[%s5785_s1 + $0x188] sm:$0xff]  }
  0x66   : > { %4177 = vmatmul.mubr.bf16.gmra.mrb[12].mxu0 %v3584_v52  ;;  %v1880_v25 = vsel %vm5079_vm5, %v3603_v26, %v1879_v37  ;;  %v1883_v33 = vsel %vm5079_vm5, %v1881_v56, %v1882_v32  ;;  %v1889_v38 = vrot.slane %v4900_v55, 5  ;;  %v3605_v27 = vrot.slane %v3597_v49, 9  ;;  %v5142_v55 = vld [vmem:[%s4737_s8 + $0x60] sm:$0xe]  ;;  %v5169_v56 = vld [vmem:[%s4737_s8 + $0x4] sm:$0xf] }
  0x67   : > { %4196 = vmatprep.mubr.bf16.mxu0 %v3625_v1  ;;  %v1896_v40 = vrot.slane %v4947_v0, 5  ;;  %v1900_v50 = vrot.slane %v4975_v45, 5  ;;  %v3626_v31 = vcombine.low %v1873_v57, %v1876_v62  ;;  %v3627_v51 = vcombine.low %v1880_v25, %v1883_v33  ;;  %v4541_v49 = vld [vmem:[%s5785_s1 + $0xa0] sm:$0xff]   ;;  %v5224_v45 = vld [vmem:[%s4737_s8 + $0x18] sm:$0xe] }
  0x68   : > { %v1888_v37 = vrot.slane %v1886_v41, 4  ;;  %v1895_v12 = vrot.slane %v1893_v58, 4  ;;  %v3436_v0 = vcombine.low %v4864_v4, %v4871_v16  ;;  %v1887_v13 = vsel %vm5079_vm5, %v3604_v34, %v1886_v41  ;;  %v5192_v41 = vld [vmem:[%s4737_s8 + $0x10] sm:$0xf] }
  0x69   : > { %4069 = vmatmul.mubr.bf16.vlgmr.msra.gmra.mrb[0].mxu1 %v3434_v21  ;;  %v3437_v2 = vcombine.low %v4907_v5, %v4913_v9  ;;  %v3606_v59 = vrot.slane %v5129_v61, 9  ;;  %v1902_v4 = vrot.slane %v1900_v50, 4  ;;  %v1903_v19 = vrot.slane %v4988_v60, 5  ;;  %v4536_v5 = vld [vmem:[%s5785_s1 + $0x190] sm:$0xff]   ;;  %v869_v21 = vld [vmem:[%s4737_s8] sm:$0xe] }
  0x6a   : > { %4085 = vmatpush3.bf16.msra.mxu1 %v4993_v18  ;;  %4072 = vmatprep.mubr.bf16.mxu1 %v3435_v39  ;;  %v4535_v18 = vld [vmem:[%s5785_s1 + $0x90] sm:$0xff]   ;;  %v3607_v1 = vrot.slane %v5139_v23, 9  ;;  %v1907_v22 = vrot.slane %v5029_v30, 5  ;;  %v1910_v26 = vrot.slane %v5034_v44, 5  ;;  %v3608_v63 = vrot.slane %v5142_v55, 9 }
  0x6b   : > { %4086 = vmatprep.subr.bf16.mxu1 %v4531_v35  ;;  %v1914_v52 = vrot.slane %v5058_v3, 5  ;;  %v898_v60 = vrot.slane %v5169_v56, 5  ;;  %v1890_v30 = vsel %vm5079_vm5, %v1888_v37, %v1889_v38  ;;  %v1894_v32 = vsel %vm5079_vm5, %v3605_v27, %v1893_v58  ;;  %v872_v61 = vld [vmem:[%s4737_s8 + $0x24] sm:$0xe]  ;;  %v874_v56 = vld [vmem:[%s4737_s8 + $0x3c] sm:$0xe] }
  0x6c   : > { %v1897_v44 = vsel %vm5079_vm5, %v1895_v12, %v1896_v40  ;;  %v3628_v62 = vcombine.low %v1887_v13, %v1890_v30  ;;  %v1909_v47 = vrot.slane %v1907_v22, 4  ;;  %v1917_v57 = vrot.slane %v5064_v53, 5  ;;  %v4543_v40 = vld [vmem:[%s5785_s1 + $0xa8] sm:$0xff]   ;;  %v4593_v30 = vld [vmem:[%s4737_s8 + $0x1c] sm:$0xf]  ;;  %v4548_v53 = vld [vmem:[%s5785_s1 + $0x1b0] sm:$0xff]  }
  0x6d   : > { %v3629_v39 = vcombine.low %v1894_v32, %v1897_v44  ;;  %v3449_v34 = vrot.slane %v869_v21, 9  ;;  %v905_v58 = vrot.slane %v5192_v41, 5  ;;  %v919_v25 = vrot.slane %v4871_v16, 5  ;;  %v876_v41 = vld [vmem:[%s4737_s8 + $0x54] sm:$0xe] }
  0x6e   : > { %4197 = vmatmul.mubr.bf16.vlgmr.msra.gmra.mrb[0].mxu0 %v3626_v31  ;;  %4087 = vmatpush3.bf16.msra.mxu1 %v4531_v35  ;;  %v5189_v35 = vrot.slane %v1914_v52, 4  ;;  %v900_v33 = vrot.slane %v898_v60, 4  ;;  %v922_v38 = vrot.slane %v4874_v17, 5  ;;  %v3438_v27 = vcombine.low %v4956_v10, %v4959_v11 }
  0x6f   : > { %4213 = vmatpush3.bf16.msra.mxu0 %v5023_v15  ;;  %4200 = vmatprep.mubr.bf16.mxu0 %v3627_v51  ;;  %v4538_v15 = vld [vmem:[%s5785_s1 + $0x198] sm:$0xff]   ;;  %v3439_v31 = vcombine.low %v5001_v42, %v5007_v46  ;;  %v3452_v16 = vrot.slane %v872_v61, 9  ;;  %v921_v23 = vrot.slane %v919_v25, 4  ;;  %v1901_v17 = vsel %vm5079_vm5, %v3606_v59, %v1900_v50  ;;  %v4542_v51 = vld [vmem:[%s5785_s1 + $0x1a0] sm:$0xff]  }
  0x70   : > { %4214 = vmatprep.subr.bf16.mxu0 %v4532_v48  ;;  %4088 = vmatprep.subr.bf16.mxu1 %v4535_v18  ;;  %v1904_v10 = vsel %vm5079_vm5, %v1902_v4, %v1903_v19  ;;  %v1908_v42 = vsel %vm5079_vm5, %v3607_v1, %v1907_v22  ;;  %v1911_v37 = vsel %vm5079_vm5, %v1909_v47, %v1910_v26  ;;  %v926_v13 = vrot.slane %v4913_v9, 5  ;;  %v873_v4 = vld [vmem:[%s4737_s8 + $0x30] sm:$0xe]  ;;  %v4544_v1 = vld [vmem:[%s5785_s1 + $0x1a8] sm:$0xff]  }
  0x71   : > { %4073 = vmatmul.mubr.bf16.gmra.mrb[4].mxu1 %v3436_v0  ;;  %v5228_v50 = vsel %vm5079_vm5, %v3452_v16, %v919_v25  ;;  %v5232_v12 = vsel %vm5079_vm5, %v921_v23, %v922_v38  ;;  %v3440_v59 = vcombine.low %v5037_v8, %v5040_v6  ;;  %v929_v19 = vrot.slane %v4923_v29, 5  ;;  %v4547_v29 = vld [vmem:[%s5785_s1 + $0xb0] sm:$0xff]   ;;  %v5801_v38 = vld [vmem:[#allocation3_spill] sm:$0xff]  ;;  %v4550_v16 = vld [vmem:[%s5785_s1 + $0x1b8] sm:$0xff]  }
  0x72   : > { %4089 = vmatpush3.bf16.msra.mxu1 %v4535_v18  ;;  %4076 = vmatprep.mubr.bf16.mxu1 %v3437_v2  ;;  %v3476_v18 = vcombine.low %v5228_v50, %v5232_v12  ;;  %v3630_v2 = vcombine.low %v1901_v17, %v1904_v10  ;;  %v3631_v9 = vcombine.low %v1908_v42, %v1911_v37  ;;  %v3453_v8 = vrot.slane %v873_v4, 9  ;;  %v4563_v50 = vld [vmem:[%s4737_s8 + $0x48] sm:$0xff]   ;;  %v4564_v12 = vld [vmem:[%s5785_s1 + $0xe0] sm:$0xff]  }
  0x73   : > { %4215 = vmatpush3.bf16.msra.mxu0 %v4532_v48  ;;  %4090 = vmatprep.subr.bf16.mxu1 %v4537_v43  ;;  %v5208_v48 = vld [vmem:[%s4737_s8 + $0xc] sm:$0xe]  ;;  %v899_v22 = vsel %vm5079_vm5, %v3449_v34, %v898_v60  ;;  %v902_v26 = vsel %vm5079_vm5, %v900_v33, %v901_v7  ;;  %v912_v32 = vrot.slane %v4593_v30, 5  ;;  %v933_v44 = vrot.slane %v4959_v11, 5  ;;  %v5800_v60 = vld [vmem:[#allocation2_spill] sm:$0xff]  ;;  %v4549_v7 = vld [vmem:[%s5785_s1 + $0xb8] sm:$0xff]  }
  0x74   : > { %4216 = vmatprep.subr.bf16.mxu0 %v4536_v5  ;;  %v3450_v0 = vrot.slane %v5208_v48, 9  ;;  %v936_v21 = vrot.slane %v5800_v60, 5  ;;  %v1915_v11 = vsel %vm5079_vm5, %v3608_v63, %v1914_v52  ;;  %v1918_v3 = vsel %vm5079_vm5, %v5189_v35, %v1917_v57  ;;  %v875_v35 = vld [vmem:[%s4737_s8 + $0x48] sm:$0xe] }
  0x75   : > { %v935_v25 = vrot.slane %v933_v44, 4  ;;  %v3473_v55 = vcombine.low %v899_v22, %v902_v26  ;;  %v914_v52 = vrot.slane %v912_v32, 4  ;;  %v940_v61 = vrot.slane %v5007_v46, 5  ;;  %v5359_v26 = vld [vmem:[%s4737_s8 + $0x20] sm:$0x1] }
  0x76   : > { %4201 = vmatmul.mubr.bf16.gmra.mrb[4].mxu0 %v3628_v62  ;;  %4091 = vmatpush3.bf16.msra.mxu1 %v4537_v43  ;;  %v907_v43 = vrot.slane %v905_v58, 4  ;;  %v3451_v62 = vrot.slane %v5224_v45, 9  ;;  %v906_v46 = vsel %vm5079_vm5, %v3450_v0, %v905_v58  ;;  %v947_v10 = vrot.slane %v5040_v6, 5  ;;  %v4552_v6 = vld [vmem:[%s5785_s1 + $0xc0] sm:$0xff]  }
  0x77   : > { %4217 = vmatpush3.bf16.msra.mxu0 %v4536_v5  ;;  %4204 = vmatprep.mubr.bf16.mxu0 %v3629_v39  ;;  %v928_v5 = vrot.slane %v926_v13, 4  ;;  %v3454_v39 = vrot.slane %v874_v56, 9  ;;  %v5294_v33 = vsel %vm5079_vm5, %v935_v25, %v936_v21  ;;  %v942_v48 = vrot.slane %v940_v61, 4  ;;  %v4556_v56 = vld [vmem:[%s5785_s1 + $0x1c8] sm:$0xff]  }
  0x78   : > { %4218 = vmatprep.subr.bf16.mxu0 %v4538_v15  ;;  %4092 = vmatprep.subr.bf16.mxu1 %v4541_v49  ;;  %v909_v23 = vsel %vm5079_vm5, %v907_v43, %v908_v24  ;;  %v913_v17 = vsel %vm5079_vm5, %v3451_v62, %v912_v32  ;;  %v950_v58 = vrot.slane %v5049_v20, 5  ;;  %v3456_v37 = vrot.slane %v876_v41, 9  ;;  %v4555_v43 = vld [vmem:[%s5785_s1 + $0xc8] sm:$0xff]   ;;  %v3692_v62 = vld [vmem:[%s4737_s8 + $0x24] sm:$0xf] }
  0x79   : > { %4077 = vmatmul.mubr.bf16.gmra.mrb[8].mxu1 %v3438_v27  ;;  %v5269_v14 = vsel %vm5079_vm5, %v928_v5, %v929_v19  ;;  %v5290_v63 = vsel %vm5079_vm5, %v3454_v39, %v933_v44  ;;  %v943_v27 = vrot.slane %v5801_v38, 5  ;;  %v949_v45 = vrot.slane %v947_v10, 4  ;;  %v4554_v19 = vld [vmem:[%s5785_s1 + $0x1c0] sm:$0xff]   ;;  %v4558_v44 = vld [vmem:[%s5785_s1 + $0xd0] sm:$0xff]   ;;  %v5380_v25 = vld [vmem:[%s4737_s8 + $0x28] sm:$0xf] }
  0x7a   : > { %4093 = vmatpush3.bf16.msra.mxu1 %v4541_v49  ;;  %4080 = vmatprep.mubr.bf16.mxu1 %v3439_v31  ;;  %v4594_v49 = vld [vmem:[%s4737_s8 + $0x20] sm:$0x1]  ;;  %v3478_v57 = vcombine.low %v5290_v63, %v5294_v33  ;;  %v3455_v31 = vrot.slane %v875_v35, 9  ;;  %v3474_v0 = vcombine.low %v906_v46, %v909_v23  ;;  %v4553_v5 = vld [vmem:[%s4737_s8 + $0x24] sm:$0xff]   ;;  %v4560_v39 = vld [vmem:[%s5785_s1 + $0x1d0] sm:$0xff]  }
  0x7b   : > { %4219 = vmatpush3.bf16.msra.mxu0 %v4538_v15  ;;  %4094 = vmatprep.subr.bf16.mxu1 %v4543_v40  ;;  %v5265_v15 = vsel %vm5079_vm5, %v3453_v8, %v926_v13  ;;  %v915_v47 = vrot.slane %v4594_v49, 5  ;;  %v5329_v24 = vsel %vm5079_vm5, %v942_v48, %v943_v27  ;;  %v5338_v13 = vsel %vm5079_vm5, %v3456_v37, %v947_v10  ;;  %v4559_v35 = vld [vmem:[%s4737_s8 + $0x3c] sm:$0xff]   ;;  %v5399_v46 = vld [vmem:[%s4737_s8 + $0x34] sm:$0xf]  ;;  %v5422_v37 = vld [vmem:[%s4737_s8 + $0x38] sm:$0x1] }
  0x7c   : > { %4220 = vmatprep.subr.bf16.mxu0 %v4542_v51  ;;  %v3477_v34 = vcombine.low %v5265_v15, %v5269_v14  ;;  %v5325_v54 = vsel %vm5079_vm5, %v3455_v31, %v940_v61  ;;  %v4562_v38 = vld [vmem:[%s5785_s1 + $0x1d8] sm:$0xff]   ;;  %v2430_v27 = vshll.u32 %v5380_v25, 16  ;;  %v2454_v41 = vshll.u32 %v5399_v46, 16 }
  0x7d   : > { %v916_v42 = vsel %vm5079_vm5, %v914_v52, %v915_v47  ;;  %v3479_v20 = vcombine.low %v5325_v54, %v5329_v24  ;;  %v2424_v52 = vshll.u32 %v3692_v62, 16  ;;  %v2458_v10 = vshrl.u32 %v5399_v46, 16  ;;  %v4568_v54 = vld [vmem:[%s5785_s1 + $0x1e8] sm:$0xff]   ;;  %v4570_v24 = vld [vmem:[%s5785_s1 + $0xf0] sm:$0xff]  }
  0x7e   : > { %4205 = vmatmul.mubr.bf16.gmra.mrb[8].mxu0 %v3630_v2  ;;  %4095 = vmatpush3.bf16.msra.mxu1 %v4543_v40  ;;  %v3632_v40 = vcombine.low %v1915_v11, %v1918_v3  ;;  %v3475_v2 = vcombine.low %v913_v17, %v916_v42  ;;  %v4561_v11 = vld [vmem:[%s5785_s1 + $0xd8] sm:$0xff]   ;;  %v5383_v3 = vld [vmem:[%s4737_s8 + $0x2c] sm:$0x1]  ;;  %v2846_v36 = vrot.slane %v5399_v46, 5 }
  0x7f   : > { %4221 = vmatpush3.bf16.msra.mxu0 %v4542_v51  ;;  %4208 = vmatprep.mubr.bf16.mxu0 %v3631_v9  ;;  %v4551_v51 = vld [vmem:[%s4737_s8 + $0x18] sm:$0xff]   ;;  %v2440_v48 = vshll.u32 %v5383_v3, 16  ;;  %v2842_v46 = vrot.slane %v5383_v3, 5 }
  0x80   : > { %4222 = vmatprep.subr.bf16.mxu0 %v4544_v1  ;;  %4096 = vmatprep.subr.bf16.mxu1 %v4547_v29  ;;  %v5354_v9 = vld [vmem:[%s4737_s8 + $0x1c] sm:$0xf] }
  0x81   : > { %4081 = vmatmul.mubr.bf16.gmra.mrb[12].mxu1 %v3440_v59  ;;  %v5342_v59 = vsel %vm5079_vm5, %v949_v45, %v950_v58  ;;  %v2406_v30 = vshll.u32 %v5354_v9, 16  ;;  %v2410_v32 = vshrl.u32 %v5354_v9, 16  ;;  %v4566_v58 = vld [vmem:[%s5785_s1 + $0x1e0] sm:$0xff]  }
  0x82   : > { %4097 = vmatpush3.bf16.msra.mxu1 %v4547_v29  ;;  %4100 = vmatprep.mubr.bf16.mxu1 %v3473_v55  ;;  %v3480_v4 = vcombine.low %v5338_v13, %v5342_v59  ;;  %v4557_v29 = vld [vmem:[%s4737_s8 + $0x30] sm:$0xff]   ;;  %v2421_v55 = vshrl.u32 %v3692_v62, 16  ;;  %v5466_v62 = vrot.slane %v2440_v48, 5 }
  0x83   : > { %4223 = vmatpush3.bf16.msra.mxu0 %v4544_v1  ;;  %4098 = vmatprep.subr.bf16.mxu1 %v4549_v7  ;;  %v3689_v1 = vld [vmem:[%s4737_s8 + $0x18] sm:$0xf]  ;;  %v5377_v49 = vrot.slane %v2406_v30, 5  ;;  %v2412_v47 = vrot.slane %v2410_v32, 4 }
  0x84   : > { %4224 = vmatprep.subr.bf16.mxu0 %v4548_v53  ;;  %v2397_v22 = vshrl.u32 %v3689_v1, 16  ;;  %v2400_v8 = vshll.u32 %v3689_v1, 16  ;;  %v2423_v14 = vrot.slane %v2421_v55, 4  ;;  %v4569_v1 = vld [vmem:[%s4737_s8 + $0x60] sm:$0xff]   ;;  %v4573_v55 = vld [vmem:[%s5785_s1 + $0xf8] sm:$0xff]  }
  0x86   : > { %4209 = vmatmul.mubr.bf16.gmra.mrb[12].mxu0 %v3632_v40  ;;  %4099 = vmatpush3.bf16.msra.mxu1 %v4549_v7  ;;  %v2399_v60 = vrot.slane %v2397_v22, 4  ;;  %v2402_v21 = vrot.slane %v2400_v8, 5  ;;  %v2416_v7 = vshll.u32 %v5359_v26, 16  ;;  %v2434_v40 = vshrl.u32 %v5380_v25, 16 }
  0x87   : > { %4225 = vmatpush3.bf16.msra.mxu0 %v4548_v53  ;;  %4228 = vmatprep.mubr.bf16.mxu0 %v4551_v51  ;;  %v3695_v53 = vld [vmem:[%s4737_s8 + $0x30] sm:$0xf]  ;;  %v5419_v51 = vrot.slane %v2430_v27, 5  ;;  %v5437_v8 = vrot.slane %v2454_v41, 5  ;;  %v5484_v27 = vld [vmem:[%s4737_s8 + $0x44] sm:$0x1] }
  0x88   : > { %4226 = vmatprep.subr.bf16.mxu0 %v4550_v16  ;;  %4116 = vmatprep.subr.bf16.mxu1 %v4552_v6  ;;  %v2403_v61 = vor.u32 %v2402_v21, %v2399_v60  ;;  %v2445_v31 = vshrl.u32 %v3695_v53, 16  ;;  %v5406_v15 = vrot.slane %v2416_v7, 5  ;;  %v2448_v17 = vshll.u32 %v3695_v53, 16 }
  0x89   : > { %4101 = vmatmul.mubr.bf16.vlgmr.msra.gmra.mrb[0].mxu1 %v3474_v0  ;;  %v2436_v42 = vrot.slane %v2434_v40, 4  ;;  %v3698_v0 = vld [vmem:[%s4737_s8 + $0x3c] sm:$0xf] }
  0x8a   : > { %4117 = vmatpush3.bf16.msra.mxu1 %v4552_v6  ;;  %4104 = vmatprep.mubr.bf16.mxu1 %v3475_v2  ;;  %v5412_v23 = vrot.slane %v2403_v61, 4  ;;  %v5426_v45 = vrot.slane %v2445_v31, 4  ;;  %v2450_v22 = vrot.slane %v2448_v17, 5  ;;  %v2469_v32 = vshrl.u32 %v3698_v0, 16  ;;  %v4571_v31 = vld [vmem:[%s4737_s8 + $0x6c] sm:$0xff]  }
  0x8b   : > { %4227 = vmatpush3.bf16.msra.mxu0 %v4550_v16  ;;  %4118 = vmatprep.subr.bf16.mxu1 %v4555_v43  ;;  %v4567_v16 = vld [vmem:[%s5785_s1 + $0xe8] sm:$0xff]   ;;  %v2437_v30 = vor.u32 %v2436_v42, %v5419_v51  ;;  %v2472_v63 = vshll.u32 %v3698_v0, 16 }
  0x8c   : > { %4244 = vmatprep.subr.bf16.mxu0 %v4554_v19  ;;  %v2451_v53 = vor.u32 %v2450_v22, %v5426_v45  ;;  %v2471_v40 = vrot.slane %v2469_v32, 4  ;;  %v4576_v45 = vld [vmem:[%s4737_s8 + $0x18] sm:$0xff]   ;;  %v5522_v32 = vld [vmem:[%s4737_s8 + $0x64] sm:$0xf] }
  0x8d   : > { %v5477_v61 = vrot.slane %v2437_v30, 4  ;;  %v3707_v30 = vld [vmem:[%s4737_s8 + $0x60] sm:$0xf] }
  0x8e   : > { %4229 = vmatmul.mubr.bf16.vlgmr.msra.gmra.mrb[0].mxu0 %v4553_v5  ;;  %4119 = vmatpush3.bf16.msra.mxu1 %v4555_v43  ;;  %v5430_v43 = vld [vmem:[%s4737_s8 + $0x40] sm:$0xf]  ;;  %v2460_v5 = vrot.slane %v2458_v10, 4  ;;  %v2452_v41 = vrot.slane %v2451_v53, 4  ;;  %v2488_v10 = vshll.u32 %v5484_v27, 16 }
  0x8f   : > { %4245 = vmatpush3.bf16.msra.mxu0 %v4554_v19  ;;  %4232 = vmatprep.mubr.bf16.mxu0 %v4557_v29  ;;  %v4565_v19 = vld [vmem:[%s4737_s8 + $0x54] sm:$0xff]   ;;  %v2464_v29 = vshll.u32 %v5422_v37, 16  ;;  %v2478_v33 = vshll.u32 %v5430_v43, 16  ;;  %v5550_v53 = vld [vmem:[%s4737_s8 + $0x5c] sm:$0x1] }
  0x90   : > { %4246 = vmatprep.subr.bf16.mxu0 %v4556_v56  ;;  %4120 = vmatprep.subr.bf16.mxu1 %v4558_v44 }
  0x91   : > { %4105 = vmatmul.mubr.bf16.gmra.mrb[4].mxu1 %v3476_v18  ;;  %v2413_v18 = vor.u32 %v2412_v47, %v5377_v49 }
  0x92   : > { %4121 = vmatpush3.bf16.msra.mxu1 %v4558_v44  ;;  %4108 = vmatprep.mubr.bf16.mxu1 %v3477_v34  ;;  %v2426_v34 = vrot.slane %v2424_v52, 5  ;;  %v5448_v44 = vld [vmem:[%s4737_s8 + $0x4c] sm:$0xf] }
  0x93   : > { %4247 = vmatpush3.bf16.msra.mxu0 %v4556_v56  ;;  %4122 = vmatprep.subr.bf16.mxu1 %v4561_v11  ;;  %v5424_v6 = vrot.slane %v2413_v18, 4  ;;  %v3701_v56 = vld [vmem:[%s4737_s8 + $0x48] sm:$0xf]  ;;  %v2502_v7 = vshll.u32 %v5448_v44, 16  ;;  %v2506_v47 = vshrl.u32 %v5448_v44, 16  ;;  %v4575_v52 = vld [vmem:[%s4737_s8 + $0xc] sm:$0xff]  }
  0x94   : > { %4248 = vmatprep.subr.bf16.mxu0 %v4560_v39  ;;  %v2427_v2 = vor.u32 %v2426_v34, %v2423_v14 }
  0x95   : > { %v2419_v60 = vsel %vm4782_vm2, %v5424_v6, %v5406_v15  ;;  %v5490_v15 = vld [vmem:[%s4737_s8 + $0x50] sm:$0x1]  ;;  %v5495_v48 = vrot.slane %v2502_v7, 5  ;;  %v5505_v6 = vld [vmem:[%s4737_s8 + $0x58] sm:$0xf] }
  0x96   : > { %4233 = vmatmul.mubr.bf16.gmra.mrb[4].mxu0 %v4559_v35  ;;  %4123 = vmatpush3.bf16.msra.mxu1 %v4561_v11  ;;  %v5464_v21 = vrot.slane %v2427_v2, 4  ;;  %v2496_v11 = vshll.u32 %v3701_v56, 16  ;;  %v2461_v35 = vor.u32 %v2460_v5, %v5437_v8  ;;  %v2512_v42 = vshll.u32 %v5490_v15, 16 }
  0x97   : > { %4249 = vmatpush3.bf16.msra.mxu0 %v4560_v39  ;;  %4236 = vmatprep.mubr.bf16.mxu0 %v4563_v50  ;;  %v2493_v39 = vshrl.u32 %v3701_v56, 16  ;;  %v2474_v50 = vrot.slane %v2472_v63, 5  ;;  %v2443_v2 = vsel %vm4782_vm2, %v5477_v61, %v5466_v62  ;;  %v2457_v63 = vsel %vm4782_vm2, %v2452_v41, %v5437_v8  ;;  %v5547_v61 = vld [vmem:[%s5785_s1 + $0x210] sm:$0xff]  }
  0x98   : > { %4250 = vmatprep.subr.bf16.mxu0 %v4562_v38  ;;  %4124 = vmatprep.subr.bf16.mxu1 %v4564_v12  ;;  %v2498_v34 = vrot.slane %v2496_v11, 5  ;;  %v2462_v13 = vrot.slane %v2461_v35, 4  ;;  %v2433_v0 = vsel %vm4782_vm2, %v5464_v21, %v5419_v51  ;;  %v4579_v51 = vld [vmem:[%s4737_s8 + $0x24] sm:$0xff]   ;;  %v2530_v56 = vshrl.u32 %v5505_v6, 16 }
  0x99   : > { %4109 = vmatmul.mubr.bf16.gmra.mrb[8].mxu1 %v3478_v57  ;;  %v2482_v57 = vshrl.u32 %v5430_v43, 16  ;;  %v2495_v14 = vrot.slane %v2493_v39, 4  ;;  %v2475_v59 = vor.u32 %v2474_v50, %v2471_v40  ;;  %v5540_v8 = vrot.slane %v2512_v42, 5  ;;  %v3710_v50 = vld [vmem:[%s4737_s8 + $0x6c] sm:$0xf] }
  0x9a   : > { %4125 = vmatpush3.bf16.msra.mxu1 %v4564_v12  ;;  %4112 = vmatprep.mubr.bf16.mxu1 %v3479_v20  ;;  %v2409_v20 = vsel %vm4782_vm2, %v5412_v23, %v5377_v49  ;;  %v4572_v49 = vld [vmem:[%s5785_s1 + $0x1f0] sm:$0xff]   ;;  %v5486_v12 = vrot.slane %v2478_v33, 5  ;;  %v4574_v23 = vld [vmem:[%s5785_s1 + $0x1f8] sm:$0xff]   ;;  %v5528_v33 = vrot.slane %v2488_v10, 5  ;;  %v2541_v21 = vshrl.u32 %v3707_v30, 16 }
  0x9b   : > { %4251 = vmatpush3.bf16.msra.mxu0 %v4562_v38  ;;  %4126 = vmatprep.subr.bf16.mxu1 %v4567_v16  ;;  %v5481_v38 = vrot.slane %v2464_v29, 5  ;;  %v2484_v18 = vrot.slane %v2482_v57, 4  ;;  %v3729_v17 = vcombine.low %v2409_v20, %v2419_v60  ;;  %v2526_v57 = vshll.u32 %v5505_v6, 16 }
  0x9c   : > { %4252 = vmatprep.subr.bf16.mxu0 %v4566_v58  ;;  %v2476_v20 = vrot.slane %v2475_v59, 4  ;;  %v2544_v62 = vshll.u32 %v3707_v30, 16  ;;  %v2550_v39 = vshll.u32 %v5522_v32, 16  ;;  %v2554_v11 = vshrl.u32 %v5522_v32, 16 }
  0x9d   : > { %v5552_v35 = vrot.slane %v2526_v57, 5  ;;  %v2565_v59 = vshrl.u32 %v3710_v50, 16 }
  0x9e   : > { %4237 = vmatmul.mubr.bf16.gmra.mrb[8].mxu0 %v4565_v19  ;;  %4127 = vmatpush3.bf16.msra.mxu1 %v4567_v16  ;;  %v2508_v16 = vrot.slane %v2506_v47, 4  ;;  %v4577_v19 = vld [vmem:[%s5785_s1 + $0x200] sm:$0xff]   ;;  %v2481_v41 = vsel %vm4782_vm2, %v2476_v20, %v5486_v12 }
  0x9f   : > { %4253 = vmatpush3.bf16.msra.mxu0 %v4566_v58  ;;  %4240 = vmatprep.mubr.bf16.mxu0 %v4569_v1  ;;  %v3704_v58 = vld [vmem:[%s4737_s8 + $0x54] sm:$0xf]  ;;  %v2499_v1 = vor.u32 %v2498_v34, %v2495_v14  ;;  %v2546_v14 = vrot.slane %v2544_v62, 5  ;;  %v5559_v34 = vrot.slane %v2550_v39, 5 }
  0xa0   : > { %4254 = vmatprep.subr.bf16.mxu0 %v4568_v54  ;;  %4128 = vmatprep.subr.bf16.mxu1 %v4570_v24  ;;  %v2509_v22 = vor.u32 %v2508_v16, %v5495_v48  ;;  %v2517_v5 = vshrl.u32 %v3704_v58, 16  ;;  %v2520_v29 = vshll.u32 %v3704_v58, 16  ;;  %v2556_v16 = vrot.slane %v2554_v11, 4  ;;  %v5569_v58 = vld [vmem:[%s4737_s8 + $0x68] sm:$0x1] }
  0xa1   : > { %4113 = vmatmul.mubr.bf16.gmra.mrb[12].mxu1 %v3480_v4  ;;  %v2485_v4 = vor.u32 %v2484_v18, %v5486_v12  ;;  %v2500_v7 = vrot.slane %v2499_v1, 4  ;;  %v5557_v18 = vld [vmem:[%s4737_s8 + $0x70] sm:$0xf]  ;;  %v5578_v12 = vld [vmem:[%s5785_s1 + $0x218] sm:$0xff]   ;;  %v2536_v1 = vshll.u32 %v5550_v53, 16 }
  0xa2   : > { %4129 = vmatpush3.bf16.msra.mxu1 %v4570_v24  ;;  %4132 = vmatprep.mubr.bf16.mxu1 %v4575_v52  ;;  %v2467_v24 = vsel %vm4782_vm2, %v2462_v13, %v5481_v38  ;;  %v2510_v47 = vrot.slane %v2509_v22, 4  ;;  %v3730_v52 = vcombine.low %v2433_v0, %v2443_v2  ;;  %v2532_v38 = vrot.slane %v2530_v56, 4  ;;  %v4583_v13 = vld [vmem:[%s4737_s8 + $0x3c] sm:$0xff]   ;;  %v3749_v11 = vld [vmem:[%s4737_s8 + $0x48] sm:$0xe] }
  0xa3   : > { %4255 = vmatpush3.bf16.msra.mxu0 %v4568_v54  ;;  %4130 = vmatprep.subr.bf16.mxu1 %v4573_v55  ;;  %v5535_v54 = vld [vmem:[%s5785_s1 + $0x208] sm:$0xff]   ;;  %v2486_v60 = vrot.slane %v2485_v4, 4  ;;  %v3731_v40 = vcombine.low %v2457_v63, %v2467_v24  ;;  %v2568_v4 = vshll.u32 %v3710_v50, 16  ;;  %v2574_v42 = vshll.u32 %v5557_v18, 16 }
  0xa4   : > { %4256 = vmatprep.subr.bf16.mxu0 %v4572_v49  ;;  %v2505_v0 = vsel %vm4782_vm2, %v2500_v7, %v5495_v48  ;;  %v2533_v2 = vor.u32 %v2532_v38, %v5552_v35  ;;  %v2538_v20 = vrot.slane %v2536_v1, 5  ;;  %v4584_v7 = vld [vmem:[%s4737_s8 + $0x48] sm:$0xff]  }
  0xa5   : > { %v2570_v63 = vrot.slane %v2568_v4, 5  ;;  %v4586_v50 = vld [vmem:[%s5785_s1 + $0x228] sm:$0xff]  }
  0xa6   : > { %4241 = vmatmul.mubr.bf16.gmra.mrb[12].mxu0 %v4571_v31  ;;  %4131 = vmatpush3.bf16.msra.mxu1 %v4573_v55  ;;  %v2522_v55 = vrot.slane %v2520_v29, 5  ;;  %v2543_v31 = vrot.slane %v2541_v21, 4  ;;  %v2560_v29 = vshll.u32 %v5569_v58, 16  ;;  %v2534_v24 = vrot.slane %v2533_v2, 4  ;;  %v4585_v21 = vld [vmem:[%s5785_s1 + $0x220] sm:$0xff]  }
  0xa7   : > { %4257 = vmatpush3.bf16.msra.mxu0 %v4572_v49  ;;  %4260 = vmatprep.mubr.bf16.mxu0 %v3729_v17  ;;  %v2519_v49 = vrot.slane %v2517_v5, 4  ;;  %v4580_v17 = vld [vmem:[%s4737_s8 + $0x30] sm:$0xff]   ;;  %v2557_v5 = vor.u32 %v2556_v16, %v5559_v34  ;;  %v3751_v2 = vld [vmem:[%s4737_s8 + $0x60] sm:$0xe] }
  0xa8   : > { %4258 = vmatprep.subr.bf16.mxu0 %v4574_v23  ;;  %4308 = vmatprep.subr.bf16.mxu1 %v4577_v19  ;;  %v2547_v22 = vor.u32 %v2546_v14, %v2543_v31  ;;  %v3757_v31 = vrot.slane %v3749_v11, 9 }
  0xa9   : > { %4133 = vmatmul.mubr.bf16.vlgmr.msra.gmra.mrb[0].mxu1 %v4576_v45  ;;  %v2523_v10 = vor.u32 %v2522_v55, %v2519_v49  ;;  %v2578_v45 = vshrl.u32 %v5557_v18, 16  ;;  %v2558_v39 = vrot.slane %v2557_v5, 4  ;;  %v4587_v49 = vld [vmem:[%s4737_s8 + $0x54] sm:$0xff]  }
  0xaa   : > { %4316 = vmatpush3.bf16.msra.mxu1 %v4577_v19  ;;  %4136 = vmatprep.mubr.bf16.mxu1 %v4579_v51  ;;  %v2567_v51 = vrot.slane %v2565_v59, 4  ;;  %v2548_v62 = vrot.slane %v2547_v22, 4 }
  0xab   : > { %4259 = vmatpush3.bf16.msra.mxu0 %v4574_v23  ;;  %4309 = vmatprep.subr.bf16.mxu1 %v5535_v54  ;;  %v2491_v23 = vsel %vm4782_vm2, %v2486_v60, %v5528_v33  ;;  %v2524_v30 = vrot.slane %v2523_v10, 4  ;;  %v5593_v33 = vrot.slane %v2574_v42, 5  ;;  %v2580_v57 = vrot.slane %v2578_v45, 4  ;;  %v5598_v60 = vld [vmem:[%s4737_s8 + $0x74] sm:$0x1] }
  0xac   : > { %4276 = vmatprep.subr.bf16.mxu0 %v4577_v19  ;;  %v3732_v48 = vcombine.low %v2481_v41, %v2491_v23  ;;  %v2571_v55 = vor.u32 %v2570_v63, %v2567_v51  ;;  %v2584_v38 = vshll.u32 %v5598_v60, 16  ;;  %v2553_v16 = vsel %vm4782_vm2, %v2548_v62, %v5559_v34  ;;  %v4590_v51 = vld [vmem:[%s5785_s1 + $0x238] sm:$0xff]  }
  0xad   : > { %v2835_v10 = vrot.slane %v5359_v26, 5  ;;  %v3750_v26 = vld [vmem:[%s4737_s8 + $0x54] sm:$0xe]  ;;  %v2874_v45 = vrot.slane %v5522_v32, 5  ;;  %v2839_v63 = vrot.slane %v5380_v25, 5  ;;  %v2884_v3 = vrot.slane %v5598_v60, 5 }
  0xae   : > { %4261 = vmatmul.mubr.bf16.vlgmr.msra.gmra.mrb[0].mxu0 %v3730_v52  ;;  %4317 = vmatpush3.bf16.msra.mxu1 %v5535_v54  ;;  %v2581_v52 = vor.u32 %v2580_v57, %v5593_v33  ;;  %v2586_v4 = vrot.slane %v2584_v38, 5  ;;  %v3759_v57 = vrot.slane %v3751_v2, 9 }
  0xaf   : > { %4277 = vmatpush3.bf16.msra.mxu0 %v4577_v19  ;;  %4264 = vmatprep.mubr.bf16.mxu0 %v3731_v40  ;;  %v2515_v19 = vsel %vm4782_vm2, %v2510_v47, %v5540_v8  ;;  %v2860_v8 = vrot.slane %v5448_v44, 5  ;;  %v2832_v47 = vrot.slane %v5354_v9, 5  ;;  %v2529_v44 = vsel %vm4782_vm2, %v2524_v30, %v5552_v35  ;;  %v3745_v40 = vld [vmem:[%s4737_s8 + $0x18] sm:$0xe]  ;;  %v3746_v30 = vld [vmem:[%s4737_s8 + $0x24] sm:$0xe] }
  0xb0   : > { %4278 = vmatprep.subr.bf16.mxu0 %v5535_v54  ;;  %4310 = vmatprep.subr.bf16.mxu1 %v5547_v61  ;;  %v3733_v56 = vcombine.low %v2505_v0, %v2515_v19  ;;  %v2539_v9 = vsel %vm4782_vm2, %v2534_v24, %v2538_v20  ;;  %v2863_v35 = vrot.slane %v5490_v15, 5  ;;  %v3753_v41 = vrot.slane %v3745_v40, 9  ;;  %v4589_v0 = vld [vmem:[%s5785_s1 + $0x230] sm:$0xff]   ;;  %v4588_v19 = vld [vmem:[%s4737_s8 + $0x60] sm:$0xff]  }
  0xb1   : > { %4137 = vmatmul.mubr.bf16.gmra.mrb[4].mxu1 %v4580_v17  ;;  %v2862_v14 = vrot.slane %v2860_v8, 4  ;;  %v2867_v17 = vrot.slane %v5505_v6, 5  ;;  %v2834_v23 = vrot.slane %v2832_v47, 4  ;;  %v3734_v15 = vcombine.low %v2529_v44, %v2539_v9 }
  0xb2   : > { %4318 = vmatpush3.bf16.msra.mxu1 %v5547_v61  ;;  %4140 = vmatprep.mubr.bf16.mxu1 %v4583_v13  ;;  %v2572_v13 = vrot.slane %v2571_v55, 4  ;;  %v2582_v59 = vrot.slane %v2581_v52, 4  ;;  %v2861_v42 = vsel %vm5079_vm5, %v3757_v31, %v2860_v8  ;;  %v2833_v22 = vsel %vm5079_vm5, %v3753_v41, %v2832_v47  ;;  %v3747_v8 = vld [vmem:[%s4737_s8 + $0x30] sm:$0xe] }
  0xb3   : > { %4279 = vmatpush3.bf16.msra.mxu0 %v5535_v54  ;;  %4311 = vmatprep.subr.bf16.mxu1 %v5578_v12  ;;  %v2562_v54 = vrot.slane %v2560_v29, 5  ;;  %v2864_v6 = vsel %vm5079_vm5, %v2862_v14, %v2863_v35  ;;  %v2869_v1 = vrot.slane %v2867_v17, 4  ;;  %v2836_v5 = vsel %vm5079_vm5, %v2834_v23, %v2835_v10  ;;  %v3748_v14 = vld [vmem:[%s4737_s8 + $0x3c] sm:$0xe] }
  0xb4   : > { %4280 = vmatprep.subr.bf16.mxu0 %v5547_v61  ;;  %v2577_v32 = vsel %vm4782_vm2, %v2572_v13, %v5593_v33  ;;  %v2587_v29 = vsel %vm4782_vm2, %v2582_v59, %v2586_v4  ;;  %v2877_v24 = vrot.slane %v5569_v58, 5  ;;  %v3754_v33 = vrot.slane %v3746_v30, 9 }
  0xb5   : > { %v3777_v62 = vcombine.low %v2833_v22, %v2836_v5  ;;  %v2881_v58 = vrot.slane %v5557_v18, 5  ;;  %v3755_v47 = vrot.slane %v3747_v8, 9  ;;  %v2848_v44 = vrot.slane %v2846_v36, 4 }
  0xb6   : > { %4265 = vmatmul.mubr.bf16.gmra.mrb[4].mxu0 %v3732_v48  ;;  %4319 = vmatpush3.bf16.msra.mxu1 %v5578_v12  ;;  %v3781_v48 = vcombine.low %v2861_v42, %v2864_v6  ;;  %v2840_v40 = vsel %vm5079_vm5, %v3754_v33, %v2839_v63  ;;  %v2856_v41 = vrot.slane %v5484_v27, 5 }
  0xb7   : > { %4281 = vmatpush3.bf16.msra.mxu0 %v5547_v61  ;;  %4268 = vmatprep.mubr.bf16.mxu0 %v3733_v56  ;;  %v2563_v61 = vsel %vm4782_vm2, %v2558_v39, %v2562_v54  ;;  %v2876_v56 = vrot.slane %v2874_v45, 4  ;;  %v2841_v39 = vrot.slane %v2839_v63, 4  ;;  %v2875_v54 = vsel %vm5079_vm5, %v3759_v57, %v2874_v45 }
  0xb8   : > { %4282 = vmatprep.subr.bf16.mxu0 %v5578_v12  ;;  %4312 = vmatprep.subr.bf16.mxu1 %v4585_v21  ;;  %v3735_v34 = vcombine.low %v2553_v16, %v2563_v61  ;;  %v2883_v38 = vrot.slane %v2881_v58, 4 }
  0xb9   : > { %4141 = vmatmul.mubr.bf16.gmra.mrb[8].mxu1 %v4584_v7  ;;  %v2878_v11 = vsel %vm5079_vm5, %v2876_v56, %v2877_v24  ;;  %v3752_v7 = vld [vmem:[%s4737_s8 + $0x6c] sm:$0xe]  ;;  %v2843_v9 = vsel %vm5079_vm5, %v2841_v39, %v2842_v46  ;;  %s3397_s8 = sshll.u32 %s4617_s15, 4  ;;  %v5706_v46 = vld [vmem:[%s5786_s2] ss:$0 sm:$0xff] }
  0xba   : > { %4320 = vmatpush3.bf16.msra.mxu1 %v4585_v21  ;;  %4144 = vmatprep.mubr.bf16.mxu1 %v4587_v49  ;;  %v2849_v49 = vrot.slane %v5422_v37, 5  ;;  %v3783_v18 = vcombine.low %v2875_v54, %v2878_v11  ;;  %v3760_v52 = vrot.slane %v3752_v7, 9  ;;  %v2847_v37 = vsel %vm5079_vm5, %v3755_v47, %v2846_v36  ;;  %p235_p7 = scmp.lt.s32.totalorder %s3397_s8, 31 }
  0xbb   : > { %4283 = vmatpush3.bf16.msra.mxu0 %v5578_v12  ;;  %4313 = vmatprep.subr.bf16.mxu1 %v4586_v50  ;;  %v2870_v12 = vrot.slane %v5550_v53, 5  ;;  %v3758_v53 = vrot.slane %v3750_v26, 9  ;;  %v3778_v60 = vcombine.low %v2840_v40, %v2843_v9  ;;  %v2885_v16 = vsel %vm5079_vm5, %v2883_v38, %v2884_v3 }
  0xbc   : > { %4284 = vmatprep.subr.bf16.mxu0 %v4585_v21  ;;  %v2850_v31 = vsel %vm5079_vm5, %v2848_v44, %v2849_v49  ;;  %v2882_v35 = vsel %vm5079_vm5, %v3760_v52, %v2881_v58  ;;  %s5815_s8 = smov (!%p235_p7, %s3397_s8), 31 }
  0xbd   : > { %v2871_v20 = vsel %vm5079_vm5, %v2869_v1, %v2870_v12  ;;  %v2868_v25 = vsel %vm5079_vm5, %v3758_v53, %v2867_v17  ;;  %v3779_v61 = vcombine.low %v2847_v37, %v2850_v31  ;;  %v3784_v23 = vcombine.low %v2882_v35, %v2885_v16  ;;  %s238_s23 = sadd.s32 %s3398_s14, %s5815_s8 }
  0xbe   : > { %4269 = vmatmul.mubr.bf16.gmra.mrb[8].mxu0 %v3734_v15  ;;  %4321 = vmatpush3.bf16.msra.mxu1 %v4586_v50  ;;  %v3782_v55 = vcombine.low %v2868_v25, %v2871_v20  ;;  %s3399_s26 = sshll.u32 %s238_s23, 2 }
  0xbf   : > { %4285 = vmatpush3.bf16.msra.mxu0 %v4585_v21  ;;  %4272 = vmatprep.mubr.bf16.mxu0 %v3735_v34  ;;  %v3736_v21 = vcombine.low %v2577_v32, %v2587_v29  ;;  %s5720_s28 = scalar_lea.vmem %s5787_s3, %s3399_s26 }
  0xc0   : > { %4286 = vmatprep.subr.bf16.mxu0 %v4586_v50  ;;  %4314 = vmatprep.subr.bf16.mxu1 %v4589_v0 }
  0xc1   : > { %4145 = vmatmul.mubr.bf16.gmra.mrb[12].mxu1 %v4588_v19 }
  0xc2   : > { %4322 = vmatpush3.bf16.msra.mxu1 %v4589_v0  ;;  %4300 = vmatprep.mubr.bf16.mxu1 %v3781_v48 }
  0xc3   : > { %4287 = vmatpush3.bf16.msra.mxu0 %v4586_v50  ;;  %4315 = vmatprep.subr.bf16.mxu1 %v4590_v51  ;;  %v2853_v50 = vrot.slane %v5430_v43, 5  ;;  %v3756_v43 = vrot.slane %v3748_v14, 9 }
  0xc4   : > { %4288 = vmatprep.subr.bf16.mxu0 %v4589_v0 }
  0xc5   : > { %v2855_v17 = vrot.slane %v2853_v50, 4  ;;  %v2854_v10 = vsel %vm5079_vm5, %v3756_v43, %v2853_v50 }
  0xc6   : > { %4273 = vmatmul.mubr.bf16.gmra.mrb[12].mxu0 %v3736_v21  ;;  %4323 = vmatpush3.bf16.msra.mxu1 %v4590_v51 }
  0xc7   : > { %4289 = vmatpush3.bf16.msra.mxu0 %v4589_v0  ;;  %4292 = vmatprep.mubr.bf16.mxu0 %v3777_v62  ;;  %v2857_v15 = vsel %vm5079_vm5, %v2855_v17, %v2856_v41 }
  0xc8   : > { %4290 = vmatprep.subr.bf16.mxu0 %v4590_v51  ;;  %v3780_v13 = vcombine.low %v2854_v10, %v2857_v15 }
  0xc9   : > { %4301 = vmatmul.mubr.bf16.vlgmr.msra.gmra.mrb[16].mxu1 %v3782_v55 }
  0xca   : > { %4304 = vmatprep.mubr.bf16.mxu1 %v3783_v18 }
  0xcb   : > { %4291 = vmatpush3.bf16.msra.mxu0 %v4590_v51 }
  0xce   : > { %4293 = vmatmul.mubr.bf16.vlgmr.msra.gmra.mrb[0].mxu0 %v3778_v60 }
  0xcf   : > { %4296 = vmatprep.mubr.bf16.mxu0 %v3779_v61 }
  0xd1   : > { %4305 = vmatmul.mubr.bf16.gmra.mrb[20].mxu1 %v3784_v23 }
  0xd6   : > { %4297 = vmatmul.mubr.bf16.gmra.mrb[4].mxu0 %v3780_v13 }
 0x17c   : > { %v4134_v59 = vpop.f32.mrb[0].mxu1 }
 0x17d   : > { %v1326_v4 = vpop.f32.mrb[1].mxu1 }
 0x17e   : > { %v4135_v34 = vpop.f32.mrb[2].mxu1 }
 0x17f   : > { %v1329_v42 = vpop.f32.mrb[3].mxu1 }
 0x184   : > { %v5693_v6 = vpop.f32.mrb[4].mxu1 }
 0x185   : > { %v5695_v27 = vpop.f32.mrb[5].mxu1 }
 0x186   : > { %v5697_v26 = vpop.f32.mrb[6].mxu1 }
 0x187   : > { %v5699_v45 = vpop.f32.mrb[7].mxu1 }
 0x18c   : > { %v4142_v0 = vpop.f32.mrb[8].mxu1 }
 0x18d   : > { %v1358_v2 = vpop.f32.mrb[9].mxu1 }
 0x18e   : > { %v4143_v28 = vpop.f32.mrb[10].mxu1 }
 0x18f   : > { %v1361_v1 = vpop.f32.mrb[11].mxu1 }
 0x191   : > { %v4270_v12 = vpop.f32.mrb[8].mxu0 }
 0x192   : > { %v4332_v19 = vadd.f32 %v4270_v12, %v4142_v0  ;;  %v2751_v22 = vpop.f32.mrb[9].mxu0 }
 0x193   : > { %v4334_v5 = vadd.f32 %v2751_v22, %v1358_v2  ;;  %v4271_v32 = vpop.f32.mrb[10].mxu0 }
 0x194   : > { %v4336_v29 = vadd.f32 %v4271_v32, %v4143_v28  ;;  %v2754_v48 = vpop.f32.mrb[11].mxu0  ;;  %v4146_v30 = vpop.f32.mrb[12].mxu1 }
 0x195   : > { %v4338_v53 = vadd.f32 %v2754_v48, %v1361_v1  ;;  %v1374_v51 = vpop.f32.mrb[13].mxu1 }
 0x196   : > { %v4147_v63 = vpop.f32.mrb[14].mxu1 }
 0x197   : > { %v1377_v57 = vpop.f32.mrb[15].mxu1 }
 0x199   : > { %v4274_v56 = vpop.f32.mrb[12].mxu0 }
 0x19a   : > { %v4340_v24 = vadd.f32 %v4274_v56, %v4146_v30  ;;  %v2767_v36 = vpop.f32.mrb[13].mxu0 }
 0x19b   : > { %v4342_v33 = vadd.f32 %v2767_v36, %v1374_v51  ;;  %v4275_v20 = vpop.f32.mrb[14].mxu0 }
 0x19c   : > { %v4344_v8 = vadd.f32 %v4275_v20, %v4147_v63  ;;  %v2770_v21 = vpop.f32.mrb[15].mxu0  ;;  %v4302_v62 = vpop.f32.mrb[16].mxu1 }
 0x19d   : > { %v4346_v25 = vadd.f32 %v2770_v21, %v1377_v57  ;;  %v4333_v58 = vadd.f32 %v4332_v19, %v4302_v62  ;;  %v3049_v39 = vpop.f32.mrb[17].mxu1 }
 0x19e   : > { %v4335_v54 = vadd.f32 %v4334_v5, %v3049_v39  ;;  %v4303_v11 = vpop.f32.mrb[18].mxu1 }
 0x19f   : > { %v4337_v7 = vadd.f32 %v4336_v29, %v4303_v11  ;;  %v3052_v47 = vpop.f32.mrb[19].mxu1  ;;  %v5709_v55 = vadd.f32 %v4333_v58, %v5706_v46 }
 0x1a0   : > { %v4339_v44 = vadd.f32 %v4338_v53, %v3052_v47  ;;  %v5715_v3 = vadd.f32 %v4335_v54, %v5706_v46 }
 0x1a1   : > { %v4294_v49 = vpop.f32.mrb[0].mxu0  ;;  %v5712_v18 = vadd.f32 %v4337_v7, %v5706_v46 }
 0x1a2   : > { %v4324_v52 = vadd.f32 %v4294_v49, %v4134_v59  ;;  %v3017_v38 = vpop.f32.mrb[1].mxu0  ;;  %v5723_v40 = vadd.f32 %v4339_v44, %v5706_v46 }
 0x1a3   : > { %v4325_v9 = vadd.f32 %v3017_v38, %v1326_v4  ;;  %v4295_v50 = vpop.f32.mrb[2].mxu0  ;;  %v3857_v37 = vpack.c.bf16 %v5712_v18, %v5709_v55 }
 0x1a4   : > { %v4326_v31 = vadd.f32 %v4295_v50, %v4135_v34  ;;  %v3020_v14 = vpop.f32.mrb[3].mxu0  ;;  %v3852_v60 = vpack.c.bf16 %v5723_v40, %v5715_v3  ;;  %v4306_v35 = vpop.f32.mrb[20].mxu1  ;;  %v3105_v41 = vadd.f32 %v4324_v52, %v5706_v46 }
 0x1a5   : > { %v3103_v16 = vadd.f32 %v4325_v9, %v5706_v46  ;;  %3873 = vst [vmem:[%s5720_s28 + $0x28] sm:$0xff] %v3857_v37   ;;  %v4327_v61 = vadd.f32 %v3020_v14, %v1329_v42  ;;  %v4341_v43 = vadd.f32 %v4340_v24, %v4306_v35  ;;  %v3065_v17 = vpop.f32.mrb[21].mxu1 }
 0x1a6   : > { %v3106_v23 = vadd.f32 %v4326_v31, %v5706_v46  ;;  %3872 = vst [vmem:[%s5720_s28 + $0x20] sm:$0xff] %v3852_v60   ;;  %v4343_v10 = vadd.f32 %v4342_v33, %v3065_v17  ;;  %v4307_v15 = vpop.f32.mrb[22].mxu1  ;;  %v3222_v48 = vmul.f32 %v3105_v41, %v3105_v41  ;;  %v3228_v31 = vmul.f32 %v5715_v3, %v5715_v3 }
 0x1a7   : > { %v3104_v13 = vadd.f32 %v4327_v61, %v5706_v46  ;;  %v4345_v59 = vadd.f32 %v4344_v8, %v4307_v15  ;;  %v3068_v4 = vpop.f32.mrb[23].mxu1  ;;  %v3220_v2 = vmul.f32 %v3103_v16, %v3103_v16  ;;  %v3117_v22 = vadd.f32 %v4341_v43, %v5706_v46 }
 0x1a8   : > { %v3837_v34 = vpack.c.bf16 %v3106_v23, %v3105_v41  ;;  %v4347_v0 = vadd.f32 %v4346_v25, %v3068_v4  ;;  %v3223_v57 = vmul.f32 %v3106_v23, %v3106_v23  ;;  %v3115_v56 = vadd.f32 %v4343_v10, %v5706_v46 }
 0x1a9   : > { %v3832_v28 = vpack.c.bf16 %v3104_v13, %v3103_v16  ;;  %v3199_v42 = vadd.f32 %v3104_v13, %v3103_v16  ;;  %v3221_v1 = vmul.f32 %v3104_v13, %v3104_v13  ;;  %v4298_v12 = vpop.f32.mrb[4].mxu0  ;;  %v3118_v32 = vadd.f32 %v4345_v59, %v5706_v46 }
 0x1aa   : > { %3869 = vst [vmem:[%s5720_s28 + $0x8] sm:$0xff] %v3837_v34   ;;  %v4328_v19 = vadd.f32 %v4298_v12, %v5693_v6  ;;  %v3033_v5 = vpop.f32.mrb[5].mxu0  ;;  %v3116_v29 = vadd.f32 %v4347_v0, %v5706_v46  ;;  %v3229_v60 = vmul.f32 %v5723_v40, %v5723_v40  ;;  %v3230_v61 = vmul.f32 %v5709_v55, %v5709_v55 }
 0x1ab   : > { %3833 = vst [vmem:[%s5720_s28] sm:$0xff] %v3832_v28   ;;  %v3200_v30 = vadd.f32 %v3199_v42, %v3105_v41  ;;  %v3236_v53 = vadd.f32 %v3221_v1, %v3220_v2  ;;  %v4329_v51 = vadd.f32 %v3033_v5, %v5695_v27  ;;  %v4299_v63 = vpop.f32.mrb[6].mxu0  ;;  %v3867_v24 = vpack.c.bf16 %v3118_v32, %v3117_v22 }
 0x1ac   : > { %v4330_v6 = vadd.f32 %v4299_v63, %v5697_v26  ;;  %v3036_v36 = vpop.f32.mrb[7].mxu0  ;;  %v3109_v62 = vadd.f32 %v4328_v19, %v5706_v46  ;;  %v3862_v25 = vpack.c.bf16 %v3116_v29, %v3115_v56  ;;  %v3231_v41 = vmul.f32 %v5712_v18, %v5712_v18 }
 0x1ad   : > { %v3237_v33 = vadd.f32 %v3236_v53, %v3222_v48  ;;  %v3107_v20 = vadd.f32 %v4329_v51, %v5706_v46  ;;  %v3201_v8 = vadd.f32 %v3200_v30, %v3106_v23  ;;  %v4331_v21 = vadd.f32 %v3036_v36, %v5699_v45  ;;  %3875 = vst [vmem:[%s5720_s28 + $0x38] sm:$0xff] %v3867_v24  }
 0x1ae   : > { %v3110_v27 = vadd.f32 %v4330_v6, %v5706_v46  ;;  %3874 = vst [vmem:[%s5720_s28 + $0x30] sm:$0xff] %v3862_v25   ;;  %v3226_v45 = vmul.f32 %v3109_v62, %v3109_v62  ;;  %v3233_v4 = vmul.f32 %v3116_v29, %v3116_v29  ;;  %v3234_v0 = vmul.f32 %v3117_v22, %v3117_v22 }
 0x1af   : > { %v3202_v58 = vadd.f32 %v3201_v8, %v3107_v20  ;;  %v3224_v39 = vmul.f32 %v3107_v20, %v3107_v20  ;;  %v3238_v26 = vadd.f32 %v3237_v33, %v3223_v57  ;;  %v3108_v54 = vadd.f32 %v4331_v21, %v5706_v46 }
 0x1b0   : > { %v3847_v11 = vpack.c.bf16 %v3110_v27, %v3109_v62  ;;  %v3227_v9 = vmul.f32 %v3110_v27, %v3110_v27  ;;  %v3235_v28 = vmul.f32 %v3118_v32, %v3118_v32 }
 0x1b1   : > { %v3239_v7 = vadd.f32 %v3238_v26, %v3224_v39  ;;  %v3842_v47 = vpack.c.bf16 %v3108_v54, %v3107_v20  ;;  %v3203_v44 = vadd.f32 %v3202_v58, %v3108_v54  ;;  %v3225_v49 = vmul.f32 %v3108_v54, %v3108_v54 }
 0x1b2   : > { %3871 = vst [vmem:[%s5720_s28 + $0x18] sm:$0xff] %v3847_v11  }
 0x1b3   : > { %3870 = vst [vmem:[%s5720_s28 + $0x10] sm:$0xff] %v3842_v47   ;;  %v3204_v52 = vadd.f32 %v3203_v44, %v3109_v62  ;;  %v3240_v38 = vadd.f32 %v3239_v7, %v3225_v49 }
 0x1b5   : > { %v3205_v50 = vadd.f32 %v3204_v52, %v3110_v27  ;;  %v3241_v37 = vadd.f32 %v3240_v38, %v3226_v45 }
 0x1b7   : > { %v3206_v14 = vadd.f32 %v3205_v50, %v5715_v3  ;;  %v3242_v46 = vadd.f32 %v3241_v37, %v3227_v9  ;;  %v3232_v3 = vmul.f32 %v3115_v56, %v3115_v56 }
 0x1b9   : > { %v3243_v35 = vadd.f32 %v3242_v46, %v3228_v31  ;;  %v3207_v16 = vadd.f32 %v3206_v14, %v5723_v40 }
 0x1bb   : > { %v3208_v43 = vadd.f32 %v3207_v16, %v5709_v55  ;;  %v3244_v17 = vadd.f32 %v3243_v35, %v3229_v60 }
 0x1bd   : > { %v3209_v23 = vadd.f32 %v3208_v43, %v5712_v18  ;;  %v3245_v10 = vadd.f32 %v3244_v17, %v3230_v61 }
 0x1bf   : > { %v3210_v15 = vadd.f32 %v3209_v23, %v3115_v56  ;;  %v3246_v13 = vadd.f32 %v3245_v10, %v3231_v41 }
 0x1c1   : > { %v3211_v59 = vadd.f32 %v3210_v15, %v3116_v29  ;;  %v3247_v34 = vadd.f32 %v3246_v13, %v3232_v3 }
 0x1c3   : > { %v3212_v40 = vadd.f32 %v3211_v59, %v3117_v22  ;;  %v3248_v2 = vadd.f32 %v3247_v34, %v3233_v4  ;;  %v4635_v22 = vmov (!%p3810_p8), 0.0  }
 0x1c4   : > { %3263 = vst [vmem:[%s4720_s22] sm:$0x3] (!%p3810_p8), %v4635_v22 }
 0x1c5   : > { %v3213_v42 = vadd.f32 %v3212_v40, %v3118_v32  ;;  %v3249_v1 = vadd.f32 %v3248_v2, %v3234_v0 }
 0x1c7   : > { %v3214_v55 = vrot.slane %v3213_v42, 4  ;;  %v3250_v12 = vadd.f32 %v3249_v1, %v3235_v28 }
 0x1c9   : > { %v3215_v19 = vadd.f32 %v3214_v55, %v3213_v42  ;;  %v3251_v5 = vrot.slane %v3250_v12, 4 }
 0x1cb   : > { %v3216_v48 = vrot.slane %v3215_v19, 2  ;;  %v3252_v30 = vadd.f32 %v3251_v5, %v3250_v12 }
 0x1cd   : > { %v3217_v18 = vadd.f32 %v3216_v48, %v3215_v19  ;;  %v3253_v53 = vrot.slane %v3252_v30, 2 }
 0x1cf   : > { %v3218_v51 = vrot.slane %v3217_v18, 1  ;;  %v3254_v63 = vadd.f32 %v3253_v53, %v3252_v30  ;;  %3262 = sbr.rel (%p3810_p8) target bundleno = 470 (0x1d6), region = 36 }
 0x1d1   : > { %v3255_v57 = vrot.slane %v3254_v63, 1  ;;  %v3219_v29 = vadd.f32 %v3218_v51, %v3217_v18 }
 0x1d3   : > { %v3256_v56 = vadd.f32 %v3255_v57, %v3254_v63 }
 0x1d5   : > { %v3258_v6 = vsel %vm3257_vm6, %v3219_v29, %v3256_v56 }
 0x1d6 PF: > { %v3264_v32 = vld [vmem:[%s4720_s22] sm:$0x3] }
 0x1d7   : > { %v3265_v24 = vadd.f32 %v3264_v32, %v3258_v6 }
 0x1d9   : > { %3266 = vst [vmem:[%s4720_s22] sm:$0x3] %v3265_v24 }
 0x1da PF: > { %s15_s19 = sadd.s32 1, %s4633_s19   ;;  %s5802_s15 = smov %s4625_s17 }
 0x1db   : > { %p12_p9 = scmp.ge.s32.totalorder %s15_s19, 6   ;;  %s5803_s16 = smov %s4629_s18 }
 0x1dc   : > { %s5804_s17 = smov %s5807_s20  ;;  %s5805_s18 = smov %s5811_s21 }
 0x1dd   :  { %14 = sbr.rel (!%p12_p9) target bundleno = 3 (0x3), region = 88 }

</bundles_post_ra>
